<compile_context>
chip_gen: v5e
topology: v5e:2x2
jax: 0.10.0
libtpu: 0.0.40
codegen_flags: <defaults>
</compile_context>

<pallas_src>
import functools

import jax
import jax.numpy as jnp
from jax.experimental import pallas as pl
from jax.experimental.pallas import tpu as pltpu


# --------------------------------------------------------------------------
# Helpers
# --------------------------------------------------------------------------
def _round_up(x, m):
    return ((x + m - 1) // m) * m


def _cout_tiling(cout, lane=128):
    """Per-layer output-channel padding + lane tile.

    Wide layers tile by 128 (lane-dense stores); narrow layers (e.g. ndf=64 or
    the final Cout=1 head) are padded only to a multiple of 8 so the NEXT
    layer's contraction dim is not needlessly doubled and the final layer does
    not do 128x the required matmul width."""
    if cout >= lane:
        return _round_up(cout, lane), lane
    cp = _round_up(cout, 8)
    return cp, cp


@functools.lru_cache(maxsize=1)
def _vmem_limit_bytes():
    """~80% of physical VMEM (v5e/v6e: ~105 MiB, v7x: ~52 MiB); safe fallback."""
    limit = 48 * 1024 * 1024
    try:
        cap = getattr(pltpu.get_tpu_info(), "vmem_capacity_bytes", None)
        if cap:
            limit = int(cap * 0.80)
    except Exception:
        pass
    return limit


# --------------------------------------------------------------------------
# Layer 0: im2col-packed conv (+ bias + LeakyReLU), spatially tiled
# --------------------------------------------------------------------------
def _mm_bias_act_kernel(x_ref, w_ref, b_ref, o_ref, *, use_lrelu, slope):
    acc = jnp.dot(x_ref[0], w_ref[...], preferred_element_type=jnp.float32)
    acc = acc + b_ref[...]
    if use_lrelu:
        acc = jnp.where(acc >= 0.0, acc, slope * acc)
    o_ref[0] = acc.astype(o_ref.dtype)


def conv_first_layer_pallas(x, w, b, *, stride, use_lrelu, pad=1, slope=0.2,
                            row_tile=1024):
    """First conv layer (tiny Cin): fold KH*KW*Cin into the lane dim so the
    MXU sees one dense K=48 contraction instead of 16 K=3-sparse taps, and the
    spatial axis becomes a halo-free, tileable grid axis."""
    N, H, W, Cin = x.shape
    Cout, Cin_w, KH, KW = w.shape
    assert Cin_w == Cin
    OH = (H + 2 * pad - KH) // stride + 1
    OW = (W + 2 * pad - KW) // stride + 1
    assert OH > 0 and OW > 0, "spatial size collapsed to zero"

    xp = jnp.pad(x, ((0, 0), (pad, pad), (pad, pad), (0, 0)))
    cols = []
    for kh in range(KH):
        for kw in range(KW):
            cols.append(xp[:, kh:kh + stride * OH:stride,
                           kw:kw + stride * OW:stride, :])
    K = KH * KW * Cin
    R = OH * OW
    xim = jnp.concatenate(cols, axis=-1).reshape(N, R, K)

    TR = row_tile if R >= row_tile else _round_up(R, 8)
    R_pad = _round_up(R, TR)
    if R_pad != R:
        xim = jnp.pad(xim, ((0, 0), (0, R_pad - R), (0, 0)))

    Cout_p, TN = _cout_tiling(Cout)
    wk = jnp.transpose(w, (2, 3, 1, 0)).reshape(K, Cout)
    wk = jnp.pad(wk, ((0, 0), (0, Cout_p - Cout))).astype(x.dtype)
    bk = jnp.pad(b, (0, Cout_p - Cout)).reshape(1, Cout_p).astype(jnp.float32)

    esz = x.dtype.itemsize
    cost = pl.CostEstimate(
        flops=2 * N * R_pad * K * Cout_p,
        transcendentals=0,
        bytes_accessed=int((xim.size + wk.size + N * R_pad * Cout_p) * esz))

    out = pl.pallas_call(
        functools.partial(_mm_bias_act_kernel, use_lrelu=use_lrelu, slope=slope),
        out_shape=jax.ShapeDtypeStruct((N, R_pad, Cout_p), x.dtype),
        grid=(N, R_pad // TR, Cout_p // TN),
        in_specs=[
            pl.BlockSpec((1, TR, K), lambda n, r, j: (n, r, 0)),
            pl.BlockSpec((K, TN), lambda n, r, j: (0, j)),
            pl.BlockSpec((1, TN), lambda n, r, j: (0, j)),
        ],
        out_specs=pl.BlockSpec((1, TR, TN), lambda n, r, j: (n, r, j)),
        compiler_params=pltpu.CompilerParams(
            dimension_semantics=("parallel", "parallel", "parallel"),
            vmem_limit_bytes=_vmem_limit_bytes()),
        cost_estimate=cost,
    )(xim, wk, bk)

    return out[:, :R, :].reshape(N, OH, OW, Cout_p)


# --------------------------------------------------------------------------
# General layer: fused tap-walk conv (+ bias + InstanceNorm + LeakyReLU)
# --------------------------------------------------------------------------
def _conv_tap_kernel(x_ref, w_ref, b_ref, o_ref, *, taps, R, We, OW, count,
                     use_norm, use_lrelu, eps, slope):
    tn = o_ref.shape[-1]
    acc = jnp.zeros((R, tn), jnp.float32)
    # Each tap is a contiguous (R, Cin) row window of the flattened
    # phase-split input -> plain 2-D matmul on the MXU, f32 accumulate.
    for t, start in enumerate(taps):
        acc = acc + jnp.dot(x_ref[0, start:start + R, :], w_ref[t],
                            preferred_element_type=jnp.float32)
    acc = acc + b_ref[...]                                   # (1, tn) f32 bias
    if use_norm:
        # InstanceNorm2d(affine=False): per-channel biased stats over the
        # OH*OW real positions; junk columns (>= OW) are masked out.
        inv_n = 1.0 / float(count)
        if We != OW:
            col = jax.lax.broadcasted_iota(jnp.int32, (R, 1), 0) % We
            mask = (col < OW).astype(jnp.float32)
            mean = jnp.sum(acc * mask, axis=0, keepdims=True) * inv_n
            cen = (acc - mean) * mask        # junk cols zeroed (sliced off outside)
        else:
            mean = jnp.sum(acc, axis=0, keepdims=True) * inv_n
            cen = acc - mean
        var = jnp.sum(cen * cen, axis=0, keepdims=True) * inv_n
        acc = cen * jax.lax.rsqrt(var + eps)  # reuse centred tensor (saves a VPU pass)
    if use_lrelu:
        acc = jnp.where(acc >= 0.0, acc, slope * acc)
    o_ref[0] = acc.astype(o_ref.dtype)


def conv_layer_pallas(x, w, b, *, stride, use_norm, use_lrelu, pad=1,
                      eps=1e-5, slope=0.2):
    """x: (N, H, W, Cin_p) NHWC (channels possibly zero-padded).
    w: (Cout, Cin, KH, KW) PyTorch layout.  Returns (N, OH, OW, Cout_p)."""
    N, H, W, Cin_p = x.shape
    Cout, Cin, KH, KW = w.shape
    assert Cin <= Cin_p
    OH = (H + 2 * pad - KH) // stride + 1
    OW = (W + 2 * pad - KW) // stride + 1
    assert OH > 0 and OW > 0, "spatial size collapsed to zero"
    He = (KH - 1) // stride + OH
    We = (KW - 1) // stride + OW

    if stride == 1:
        # No phase split needed: pad one extra bottom row for the tap overrun
        # and reshape in place (saves the concat copy / extra HBM pass).
        xp = jnp.pad(x, ((0, 0), (pad, pad + 1), (pad, pad), (0, 0)))
        xflat = xp.reshape(N, (He + 1) * We, Cin_p)
    else:
        pad_b = max(0, stride * He - (H + pad))
        pad_r = max(0, stride * We - (W + pad))
        xp = jnp.pad(x, ((0, 0), (pad, pad_b), (pad, pad_r), (0, 0)))
        phases = []
        for ph in range(stride):
            for pw in range(stride):
                phs = xp[:, ph::stride, pw::stride, :][:, :He, :We, :]
                phases.append(phs.reshape(N, He * We, Cin_p))
        tail = jnp.zeros((N, We, Cin_p), x.dtype)       # overrun-guard rows
        xflat = jnp.concatenate(phases + [tail], axis=1)
    Ltot = xflat.shape[1]

    # Static row offset of each (kh, kw) tap inside the flattened input.
    taps = []
    for kh in range(KH):
        for kw in range(KW):
            p = (kh % stride) * stride + (kw % stride)
            taps.append(p * He * We + (kh // stride) * We + (kw // stride))
    taps = tuple(taps)

    # Weights -> (KH*KW, Cin_p, Cout_p), per-layer lane padding.
    Cout_p, TN = _cout_tiling(Cout)
    wk = jnp.transpose(w, (2, 3, 1, 0)).reshape(KH * KW, Cin, Cout)
    wk = jnp.pad(wk, ((0, 0), (0, Cin_p - Cin), (0, Cout_p - Cout))).astype(x.dtype)
    bk = jnp.pad(b, (0, Cout_p - Cout)).reshape(1, Cout_p).astype(jnp.float32)

    R = OH * We                  # rows produced per step (cols >= OW are junk)
    J = Cout_p // TN
    esz = x.dtype.itemsize
    w_bytes = wk.size * esz
    slab_bytes = Ltot * Cin_p * esz
    # Deep stride-1 layers: weights dominate HBM traffic -> keep them
    # VMEM-resident across images (Cout-block axis outer); otherwise keep the
    # input slab resident across Cout blocks (batch axis outer).
    weight_resident = (N > 1 and J > 1 and
                       w_bytes * (N - 1) > N * slab_bytes * (J - 1))
    if weight_resident:
        grid = (J, N)
        x_map = lambda j, n: (n, 0, 0)
        w_map = lambda j, n: (0, 0, j)
        b_map = lambda j, n: (0, j)
        o_map = lambda j, n: (n, 0, j)
    else:
        grid = (N, J)
        x_map = lambda n, j: (n, 0, 0)
        w_map = lambda n, j: (0, 0, j)
        b_map = lambda n, j: (0, j)
        o_map = lambda n, j: (n, 0, j)

    kern = functools.partial(
        _conv_tap_kernel, taps=taps, R=R, We=We, OW=OW, count=OH * OW,
        use_norm=use_norm, use_lrelu=use_lrelu, eps=eps, slope=slope)

    cost = pl.CostEstimate(
        flops=2 * N * R * Cin_p * Cout_p * KH * KW,
        transcendentals=int(N * Cout_p) if use_norm else 0,
        bytes_accessed=int((xflat.size + wk.size + N * R * Cout_p) * esz))

    out = pl.pallas_call(
        kern,
        out_shape=jax.ShapeDtypeStruct((N, R, Cout_p), x.dtype),
        grid=grid,
        in_specs=[
            pl.BlockSpec((1, Ltot, Cin_p), x_map),
            pl.BlockSpec((KH * KW, Cin_p, TN), w_map),
            pl.BlockSpec((1, TN), b_map),
        ],
        out_specs=pl.BlockSpec((1, R, TN), o_map),
        compiler_params=pltpu.CompilerParams(
            dimension_semantics=("parallel", "parallel"),
            vmem_limit_bytes=_vmem_limit_bytes()),
        cost_estimate=cost,
    )(xflat, wk, bk)

    # (N, OH*We, Cout_p) -> (N, OH, OW, Cout_p): drop the junk columns.
    return out.reshape(N, OH, We, Cout_p)[:, :, :OW, :]


# --------------------------------------------------------------------------
# Module: parameter construction + forward (matches nets.py NLayerDiscriminator)
# --------------------------------------------------------------------------
def build_layer_specs(input_nc, ndf, n_layers):
    """List of (cin, cout, stride, use_norm, use_lrelu) matching the Sequential."""
    specs = [(input_nc, ndf, 2, False, True)]
    nf_mult = 1
    for n in range(1, n_layers):
        nf_mult_prev = nf_mult
        nf_mult = min(2 ** n, 8)
        specs.append((ndf * nf_mult_prev, ndf * nf_mult, 2, True, True))
    nf_mult_prev = nf_mult
    nf_mult = min(2 ** n_layers, 8)
    specs.append((ndf * nf_mult_prev, ndf * nf_mult, 1, True, True))
    specs.append((ndf * nf_mult, 1, 1, False, False))
    return specs


def init_params(key, input_nc, ndf, n_layers):
    params = []
    for (cin, cout, stride, use_norm, use_lrelu) in build_layer_specs(
            input_nc, ndf, n_layers):
        key, kw_key, kb_key = jax.random.split(key, 3)
        w = 0.02 * jax.random.normal(kw_key, (cout, cin, 4, 4), jnp.float32)
        b = 0.01 * jax.random.normal(kb_key, (cout,), jnp.float32)
        params.append(dict(w=w, b=b, stride=stride, norm=use_norm, lrelu=use_lrelu))
    return params


def nlayer_discriminator_forward(x_nchw, params, act_dtype=jnp.bfloat16):
    """bf16 operands by default (f32 accumulation in-kernel) -- bf16 MXU on
    v5e/v6e/v7x and half the HBM/VMEM traffic.  Pass act_dtype=jnp.float32
    for exact comparison against an f32 reference."""
    x = jnp.transpose(x_nchw, (0, 2, 3, 1)).astype(act_dtype)   # NCHW -> NHWC
    for li, p in enumerate(params):
        if li == 0 and (not p["norm"]) and p["w"].shape[1] <= 16:
            x = conv_first_layer_pallas(x, p["w"], p["b"], stride=p["stride"],
                                        use_lrelu=p["lrelu"])
        else:
            x = conv_layer_pallas(x, p["w"], p["b"], stride=p["stride"],
                                  use_norm=p["norm"], use_lrelu=p["lrelu"])
    x = x[..., :params[-1]["w"].shape[0]]        # drop zero-padded channels
    return jnp.transpose(x, (0, 3, 1, 2))        # NHWC -> NCHW


# --------------------------------------------------------------------------
# Pure-JAX reference (for self-check)
# --------------------------------------------------------------------------
def _ref_forward(x_nchw, params):
    x = x_nchw.astype(jnp.float32)
    for p in params:
        x = jax.lax.conv_general_dilated(
            x, p["w"], window_strides=(p["stride"], p["stride"]),
            padding=((1, 1), (1, 1)),
            dimension_numbers=("NCHW", "OIHW", "NCHW"))
        x = x + p["b"][None, :, None, None]
        if p["norm"]:
            mean = jnp.mean(x, axis=(2, 3), keepdims=True)
            var = jnp.mean((x - mean) ** 2, axis=(2, 3), keepdims=True)
            x = (x - mean) * jax.lax.rsqrt(var + 1e-5)
        if p["lrelu"]:
            x = jnp.where(x >= 0, x, 0.2 * x)
    return x


# --------------------------------------------------------------------------
if __name__ == "__main__":
    # Small config: input_nc=3, ndf=8, n_layers=2, 16x16 input
    # (spatial path: 16 -> 8 -> 4 -> 3 -> 2).
    input_nc, ndf, n_layers = 3, 8, 2
    key = jax.random.PRNGKey(0)
    k_x, k_p = jax.random.split(key)
    x = jax.random.normal(k_x, (2, input_nc, 16, 16), jnp.float32)
    params = init_params(k_p, input_nc, ndf, n_layers)

    # f32-operand path: exact check against the pure-JAX reference.
    fwd_f32 = jax.jit(lambda t: nlayer_discriminator_forward(t, params, jnp.float32))
    out = jax.block_until_ready(fwd_f32(x))
    ref = jax.block_until_ready(_ref_forward(x, params))
    assert out.shape == ref.shape == (2, 1, 2, 2), (out.shape, ref.shape)
    assert jnp.allclose(out, ref, atol=1e-4, rtol=1e-4), \
        float(jnp.max(jnp.abs(out - ref)))

    # Default bf16-operand path (f32 accumulate): smoke test.
    fwd_bf16 = jax.jit(lambda t: nlayer_discriminator_forward(t, params))
    out_bf16 = jax.block_until_ready(fwd_bf16(x))
    assert out_bf16.shape == (2, 1, 2, 2)
    assert bool(jnp.all(jnp.isfinite(out_bf16.astype(jnp.float32))))

    print("KERNEL_OK")
</pallas_src>

<mosaic_0001>
module attributes {stable_mosaic.version = 11 : i64} {
  func.func @_mm_bias_act_kernel(%arg0: i32, %arg1: i32, %arg2: i32, %arg3: memref<1x64x48xf32, #tpu.memory_space<vmem>>, %arg4: memref<48x8xf32, #tpu.memory_space<vmem>>, %arg5: memref<1x8xf32, #tpu.memory_space<vmem>>, %arg6: memref<1x64x8xf32, #tpu.memory_space<vmem>>) attributes {dimension_semantics = [#tpu.dimension_semantics<parallel>, #tpu.dimension_semantics<parallel>, #tpu.dimension_semantics<parallel>], iteration_bounds = array<i64: 2, 1, 1>, scalar_prefetch = 0 : i64, scratch_operands = 0 : i64, tpu.core_type = #tpu.core_type<tc>, window_params = [{transform_indices = @transform_0, window_bounds = array<i64: 1, 64, 48>}, {transform_indices = @transform_1, window_bounds = array<i64: 48, 8>}, {transform_indices = @transform_2, window_bounds = array<i64: 1, 8>}, {transform_indices = @transform_3, window_bounds = array<i64: 1, 64, 8>}]} {
    %c0 = arith.constant 0 : index
    %c0_0 = arith.constant 0 : index
    %c0_1 = arith.constant 0 : index
    %0 = vector.load %arg3[%c0, %c0_0, %c0_1] : memref<1x64x48xf32, #tpu.memory_space<vmem>>, vector<1x64x48xf32>
    %1 = vector.shape_cast %0 : vector<1x64x48xf32> to vector<64x48xf32>
    %c0_2 = arith.constant 0 : index
    %c0_3 = arith.constant 0 : index
    %2 = vector.load %arg4[%c0_2, %c0_3] : memref<48x8xf32, #tpu.memory_space<vmem>>, vector<48x8xf32>
    %cst = arith.constant dense<0.000000e+00> : vector<64x8xf32>
    %3 = tpu.matmul %1, %2, %cst {dimension_numbers = #tpu.dot_dimension_numbers<[1], [0], [0], [1], [0, 0, 1, 1], [], []>} : vector<64x48xf32>, vector<48x8xf32>, vector<64x8xf32> -> vector<64x8xf32>
    %c0_4 = arith.constant 0 : index
    %c0_5 = arith.constant 0 : index
    %4 = vector.load %arg5[%c0_4, %c0_5] : memref<1x8xf32, #tpu.memory_space<vmem>>, vector<1x8xf32>
    %5 = vector.broadcast %4 : vector<1x8xf32> to vector<64x8xf32>
    %6 = arith.addf %3, %5 : vector<64x8xf32>
    %cst_6 = arith.constant 0.000000e+00 : f32
    %7 = vector.broadcast %cst_6 : f32 to vector<64x8xf32>
    %8 = arith.cmpf oge, %6, %7 : vector<64x8xf32>
    %cst_7 = arith.constant 2.000000e-01 : f32
    %9 = vector.broadcast %cst_7 : f32 to vector<64x8xf32>
    %10 = arith.mulf %9, %6 : vector<64x8xf32>
    %11 = arith.select %8, %6, %10 : vector<64x8xi1>, vector<64x8xf32>
    %c0_8 = arith.constant 0 : index
    %c0_9 = arith.constant 0 : index
    %c0_10 = arith.constant 0 : index
    %12 = vector.load %arg6[%c0_8, %c0_9, %c0_10] : memref<1x64x8xf32, #tpu.memory_space<vmem>>, vector<1x64x8xf32>
    %13 = vector.shape_cast %12 : vector<1x64x8xf32> to vector<64x8xf32>
    %14 = vector.shape_cast %11 : vector<64x8xf32> to vector<1x64x8xf32>
    tpu.vector_store %arg6[%c0_8, %c0_9, %c0_10], %14 {strides = array<i32>} : memref<1x64x8xf32, #tpu.memory_space<vmem>>, vector<1x64x8xf32>,
    return
  }
  func.func @transform_0(%arg0: i32, %arg1: i32, %arg2: i32) -> (i32, i32, i32) {
    %c0_i32 = arith.constant 0 : i32
    %c0_i32_0 = arith.constant 0 : i32
    return %arg0, %arg1, %c0_i32 : i32, i32, i32
  }
  func.func @transform_1(%arg0: i32, %arg1: i32, %arg2: i32) -> (i32, i32) {
    %c0_i32 = arith.constant 0 : i32
    %c0_i32_0 = arith.constant 0 : i32
    return %c0_i32, %arg2 : i32, i32
  }
  func.func @transform_2(%arg0: i32, %arg1: i32, %arg2: i32) -> (i32, i32) {
    %c0_i32 = arith.constant 0 : i32
    %c0_i32_0 = arith.constant 0 : i32
    return %c0_i32, %arg2 : i32, i32
  }
  func.func @transform_3(%arg0: i32, %arg1: i32, %arg2: i32) -> (i32, i32, i32) {
    %c0_i32 = arith.constant 0 : i32
    return %arg0, %arg1, %arg2 : i32, i32, i32
  }
}

module attributes {stable_mosaic.version = 11 : i64} {
  func.func @_conv_tap_kernel(%arg0: i32, %arg1: i32, %arg2: memref<1x105x8xf32, #tpu.memory_space<vmem>>, %arg3: memref<16x8x16xf32, #tpu.memory_space<vmem>>, %arg4: memref<1x16xf32, #tpu.memory_space<vmem>>, %arg5: memref<1x20x16xf32, #tpu.memory_space<vmem>>) attributes {dimension_semantics = [#tpu.dimension_semantics<parallel>, #tpu.dimension_semantics<parallel>], iteration_bounds = array<i64: 2, 1>, scalar_prefetch = 0 : i64, scratch_operands = 0 : i64, tpu.core_type = #tpu.core_type<tc>, window_params = [{transform_indices = @transform_0, window_bounds = array<i64: 1, 105, 8>}, {transform_indices = @transform_1, window_bounds = array<i64: 16, 8, 16>}, {transform_indices = @transform_2, window_bounds = array<i64: 1, 16>}, {transform_indices = @transform_3, window_bounds = array<i64: 1, 20, 16>}]} {
    %cst = arith.constant 0.000000e+00 : f32
    %0 = vector.broadcast %cst : f32 to vector<20x16xf32>
    %c0 = arith.constant 0 : index
    %c0_0 = arith.constant 0 : index
    %c0_1 = arith.constant 0 : index
    %1 = vector.load %arg2[%c0, %c0_0, %c0_1] : memref<1x105x8xf32, #tpu.memory_space<vmem>>, vector<1x20x8xf32>
    %2 = vector.shape_cast %1 : vector<1x20x8xf32> to vector<20x8xf32>
    %c0_2 = arith.constant 0 : index
    %c0_3 = arith.constant 0 : index
    %c0_4 = arith.constant 0 : index
    %3 = vector.load %arg3[%c0_2, %c0_3, %c0_4] : memref<16x8x16xf32, #tpu.memory_space<vmem>>, vector<1x8x16xf32>
    %4 = vector.shape_cast %3 : vector<1x8x16xf32> to vector<8x16xf32>
    %cst_5 = arith.constant dense<0.000000e+00> : vector<20x16xf32>
    %5 = tpu.matmul %2, %4, %cst_5 {dimension_numbers = #tpu.dot_dimension_numbers<[1], [0], [0], [1], [0, 0, 1, 1], [], []>} : vector<20x8xf32>, vector<8x16xf32>, vector<20x16xf32> -> vector<20x16xf32>
    %6 = arith.addf %0, %5 : vector<20x16xf32>
    %c0_6 = arith.constant 0 : index
    %c25 = arith.constant 25 : index
    %c0_7 = arith.constant 0 : index
    %7 = vector.load %arg2[%c0_6, %c25, %c0_7] : memref<1x105x8xf32, #tpu.memory_space<vmem>>, vector<1x20x8xf32>
    %8 = vector.shape_cast %7 : vector<1x20x8xf32> to vector<20x8xf32>
    %c1 = arith.constant 1 : index
    %c0_8 = arith.constant 0 : index
    %c0_9 = arith.constant 0 : index
    %9 = vector.load %arg3[%c1, %c0_8, %c0_9] : memref<16x8x16xf32, #tpu.memory_space<vmem>>, vector<1x8x16xf32>
    %10 = vector.shape_cast %9 : vector<1x8x16xf32> to vector<8x16xf32>
    %cst_10 = arith.constant dense<0.000000e+00> : vector<20x16xf32>
    %11 = tpu.matmul %8, %10, %cst_10 {dimension_numbers = #tpu.dot_dimension_numbers<[1], [0], [0], [1], [0, 0, 1, 1], [], []>} : vector<20x8xf32>, vector<8x16xf32>, vector<20x16xf32> -> vector<20x16xf32>
    %12 = arith.addf %6, %11 : vector<20x16xf32>
    %c0_11 = arith.constant 0 : index
    %c1_12 = arith.constant 1 : index
    %c0_13 = arith.constant 0 : index
    %13 = vector.load %arg2[%c0_11, %c1_12, %c0_13] : memref<1x105x8xf32, #tpu.memory_space<vmem>>, vector<1x20x8xf32>
    %14 = vector.shape_cast %13 : vector<1x20x8xf32> to vector<20x8xf32>
    %c2 = arith.constant 2 : index
    %c0_14 = arith.constant 0 : index
    %c0_15 = arith.constant 0 : index
    %15 = vector.load %arg3[%c2, %c0_14, %c0_15] : memref<16x8x16xf32, #tpu.memory_space<vmem>>, vector<1x8x16xf32>
    %16 = vector.shape_cast %15 : vector<1x8x16xf32> to vector<8x16xf32>
    %cst_16 = arith.constant dense<0.000000e+00> : vector<20x16xf32>
    %17 = tpu.matmul %14, %16, %cst_16 {dimension_numbers = #tpu.dot_dimension_numbers<[1], [0], [0], [1], [0, 0, 1, 1], [], []>} : vector<20x8xf32>, vector<8x16xf32>, vector<20x16xf32> -> vector<20x16xf32>
    %18 = arith.addf %12, %17 : vector<20x16xf32>
    %c0_17 = arith.constant 0 : index
    %c26 = arith.constant 26 : index
    %c0_18 = arith.constant 0 : index
    %19 = vector.load %arg2[%c0_17, %c26, %c0_18] : memref<1x105x8xf32, #tpu.memory_space<vmem>>, vector<1x20x8xf32>
    %20 = vector.shape_cast %19 : vector<1x20x8xf32> to vector<20x8xf32>
    %c3 = arith.constant 3 : index
    %c0_19 = arith.constant 0 : index
    %c0_20 = arith.constant 0 : index
    %21 = vector.load %arg3[%c3, %c0_19, %c0_20] : memref<16x8x16xf32, #tpu.memory_space<vmem>>, vector<1x8x16xf32>
    %22 = vector.shape_cast %21 : vector<1x8x16xf32> to vector<8x16xf32>
    %cst_21 = arith.constant dense<0.000000e+00> : vector<20x16xf32>
    %23 = tpu.matmul %20, %22, %cst_21 {dimension_numbers = #tpu.dot_dimension_numbers<[1], [0], [0], [1], [0, 0, 1, 1], [], []>} : vector<20x8xf32>, vector<8x16xf32>, vector<20x16xf32> -> vector<20x16xf32>
    %24 = arith.addf %18, %23 : vector<20x16xf32>
    %c0_22 = arith.constant 0 : index
    %c50 = arith.constant 50 : index
    %c0_23 = arith.constant 0 : index
    %25 = vector.load %arg2[%c0_22, %c50, %c0_23] : memref<1x105x8xf32, #tpu.memory_space<vmem>>, vector<1x20x8xf32>
    %26 = vector.shape_cast %25 : vector<1x20x8xf32> to vector<20x8xf32>
    %c4 = arith.constant 4 : index
    %c0_24 = arith.constant 0 : index
    %c0_25 = arith.constant 0 : index
    %27 = vector.load %arg3[%c4, %c0_24, %c0_25] : memref<16x8x16xf32, #tpu.memory_space<vmem>>, vector<1x8x16xf32>
    %28 = vector.shape_cast %27 : vector<1x8x16xf32> to vector<8x16xf32>
    %cst_26 = arith.constant dense<0.000000e+00> : vector<20x16xf32>
    %29 = tpu.matmul %26, %28, %cst_26 {dimension_numbers = #tpu.dot_dimension_numbers<[1], [0], [0], [1], [0, 0, 1, 1], [], []>} : vector<20x8xf32>, vector<8x16xf32>, vector<20x16xf32> -> vector<20x16xf32>
    %30 = arith.addf %24, %29 : vector<20x16xf32>
    %c0_27 = arith.constant 0 : index
    %c75 = arith.constant 75 : index
    %c0_28 = arith.constant 0 : index
    %31 = vector.load %arg2[%c0_27, %c75, %c0_28] : memref<1x105x8xf32, #tpu.memory_space<vmem>>, vector<1x20x8xf32>
    %32 = vector.shape_cast %31 : vector<1x20x8xf32> to vector<20x8xf32>
    %c5 = arith.constant 5 : index
    %c0_29 = arith.constant 0 : index
    %c0_30 = arith.constant 0 : index
    %33 = vector.load %arg3[%c5, %c0_29, %c0_30] : memref<16x8x16xf32, #tpu.memory_space<vmem>>, vector<1x8x16xf32>
    %34 = vector.shape_cast %33 : vector<1x8x16xf32> to vector<8x16xf32>
    %cst_31 = arith.constant dense<0.000000e+00> : vector<20x16xf32>
    %35 = tpu.matmul %32, %34, %cst_31 {dimension_numbers = #tpu.dot_dimension_numbers<[1], [0], [0], [1], [0, 0, 1, 1], [], []>} : vector<20x8xf32>, vector<8x16xf32>, vector<20x16xf32> -> vector<20x16xf32>
    %36 = arith.addf %30, %35 : vector<20x16xf32>
    %c0_32 = arith.constant 0 : index
    %c51 = arith.constant 51 : index
    %c0_33 = arith.constant 0 : index
    %37 = vector.load %arg2[%c0_32, %c51, %c0_33] : memref<1x105x8xf32, #tpu.memory_space<vmem>>, vector<1x20x8xf32>
    %38 = vector.shape_cast %37 : vector<1x20x8xf32> to vector<20x8xf32>
    %c6 = arith.constant 6 : index
    %c0_34 = arith.constant 0 : index
    %c0_35 = arith.constant 0 : index
    %39 = vector.load %arg3[%c6, %c0_34, %c0_35] : memref<16x8x16xf32, #tpu.memory_space<vmem>>, vector<1x8x16xf32>
    %40 = vector.shape_cast %39 : vector<1x8x16xf32> to vector<8x16xf32>
    %cst_36 = arith.constant dense<0.000000e+00> : vector<20x16xf32>
    %41 = tpu.matmul %38, %40, %cst_36 {dimension_numbers = #tpu.dot_dimension_numbers<[1], [0], [0], [1], [0, 0, 1, 1], [], []>} : vector<20x8xf32>, vector<8x16xf32>, vector<20x16xf32> -> vector<20x16xf32>
    %42 = arith.addf %36, %41 : vector<20x16xf32>
    %c0_37 = arith.constant 0 : index
    %c76 = arith.constant 76 : index
    %c0_38 = arith.constant 0 : index
    %43 = vector.load %arg2[%c0_37, %c76, %c0_38] : memref<1x105x8xf32, #tpu.memory_space<vmem>>, vector<1x20x8xf32>
    %44 = vector.shape_cast %43 : vector<1x20x8xf32> to vector<20x8xf32>
    %c7 = arith.constant 7 : index
    %c0_39 = arith.constant 0 : index
    %c0_40 = arith.constant 0 : index
    %45 = vector.load %arg3[%c7, %c0_39, %c0_40] : memref<16x8x16xf32, #tpu.memory_space<vmem>>, vector<1x8x16xf32>
    %46 = vector.shape_cast %45 : vector<1x8x16xf32> to vector<8x16xf32>
    %cst_41 = arith.constant dense<0.000000e+00> : vector<20x16xf32>
    %47 = tpu.matmul %44, %46, %cst_41 {dimension_numbers = #tpu.dot_dimension_numbers<[1], [0], [0], [1], [0, 0, 1, 1], [], []>} : vector<20x8xf32>, vector<8x16xf32>, vector<20x16xf32> -> vector<20x16xf32>
    %48 = arith.addf %42, %47 : vector<20x16xf32>
    %c0_42 = arith.constant 0 : index
    %c5_43 = arith.constant 5 : index
    %c0_44 = arith.constant 0 : index
    %49 = vector.load %arg2[%c0_42, %c5_43, %c0_44] : memref<1x105x8xf32, #tpu.memory_space<vmem>>, vector<1x20x8xf32>
    %50 = vector.shape_cast %49 : vector<1x20x8xf32> to vector<20x8xf32>
    %c8 = arith.constant 8 : index
    %c0_45 = arith.constant 0 : index
    %c0_46 = arith.constant 0 : index
    %51 = vector.load %arg3[%c8, %c0_45, %c0_46] : memref<16x8x16xf32, #tpu.memory_space<vmem>>, vector<1x8x16xf32>
    %52 = vector.shape_cast %51 : vector<1x8x16xf32> to vector<8x16xf32>
    %cst_47 = arith.constant dense<0.000000e+00> : vector<20x16xf32>
    %53 = tpu.matmul %50, %52, %cst_47 {dimension_numbers = #tpu.dot_dimension_numbers<[1], [0], [0], [1], [0, 0, 1, 1], [], []>} : vector<20x8xf32>, vector<8x16xf32>, vector<20x16xf32> -> vector<20x16xf32>
    %54 = arith.addf %48, %53 : vector<20x16xf32>
    %c0_48 = arith.constant 0 : index
    %c30 = arith.constant 30 : index
    %c0_49 = arith.constant 0 : index
    %55 = vector.load %arg2[%c0_48, %c30, %c0_49] : memref<1x105x8xf32, #tpu.memory_space<vmem>>, vector<1x20x8xf32>
    %56 = vector.shape_cast %55 : vector<1x20x8xf32> to vector<20x8xf32>
    %c9 = arith.constant 9 : index
    %c0_50 = arith.constant 0 : index
    %c0_51 = arith.constant 0 : index
    %57 = vector.load %arg3[%c9, %c0_50, %c0_51] : memref<16x8x16xf32, #tpu.memory_space<vmem>>, vector<1x8x16xf32>
    %58 = vector.shape_cast %57 : vector<1x8x16xf32> to vector<8x16xf32>
    %cst_52 = arith.constant dense<0.000000e+00> : vector<20x16xf32>
    %59 = tpu.matmul %56, %58, %cst_52 {dimension_numbers = #tpu.dot_dimension_numbers<[1], [0], [0], [1], [0, 0, 1, 1], [], []>} : vector<20x8xf32>, vector<8x16xf32>, vector<20x16xf32> -> vector<20x16xf32>
    %60 = arith.addf %54, %59 : vector<20x16xf32>
    %c0_53 = arith.constant 0 : index
    %c6_54 = arith.constant 6 : index
    %c0_55 = arith.constant 0 : index
    %61 = vector.load %arg2[%c0_53, %c6_54, %c0_55] : memref<1x105x8xf32, #tpu.memory_space<vmem>>, vector<1x20x8xf32>
    %62 = vector.shape_cast %61 : vector<1x20x8xf32> to vector<20x8xf32>
    %c10 = arith.constant 10 : index
    %c0_56 = arith.constant 0 : index
    %c0_57 = arith.constant 0 : index
    %63 = vector.load %arg3[%c10, %c0_56, %c0_57] : memref<16x8x16xf32, #tpu.memory_space<vmem>>, vector<1x8x16xf32>
    %64 = vector.shape_cast %63 : vector<1x8x16xf32> to vector<8x16xf32>
    %cst_58 = arith.constant dense<0.000000e+00> : vector<20x16xf32>
    %65 = tpu.matmul %62, %64, %cst_58 {dimension_numbers = #tpu.dot_dimension_numbers<[1], [0], [0], [1], [0, 0, 1, 1], [], []>} : vector<20x8xf32>, vector<8x16xf32>, vector<20x16xf32> -> vector<20x16xf32>
    %66 = arith.addf %60, %65 : vector<20x16xf32>
    %c0_59 = arith.constant 0 : index
    %c31 = arith.constant 31 : index
    %c0_60 = arith.constant 0 : index
    %67 = vector.load %arg2[%c0_59, %c31, %c0_60] : memref<1x105x8xf32, #tpu.memory_space<vmem>>, vector<1x20x8xf32>
    %68 = vector.shape_cast %67 : vector<1x20x8xf32> to vector<20x8xf32>
    %c11 = arith.constant 11 : index
    %c0_61 = arith.constant 0 : index
    %c0_62 = arith.constant 0 : index
    %69 = vector.load %arg3[%c11, %c0_61, %c0_62] : memref<16x8x16xf32, #tpu.memory_space<vmem>>, vector<1x8x16xf32>
    %70 = vector.shape_cast %69 : vector<1x8x16xf32> to vector<8x16xf32>
    %cst_63 = arith.constant dense<0.000000e+00> : vector<20x16xf32>
    %71 = tpu.matmul %68, %70, %cst_63 {dimension_numbers = #tpu.dot_dimension_numbers<[1], [0], [0], [1], [0, 0, 1, 1], [], []>} : vector<20x8xf32>, vector<8x16xf32>, vector<20x16xf32> -> vector<20x16xf32>
    %72 = arith.addf %66, %71 : vector<20x16xf32>
    %c0_64 = arith.constant 0 : index
    %c55 = arith.constant 55 : index
    %c0_65 = arith.constant 0 : index
    %73 = vector.load %arg2[%c0_64, %c55, %c0_65] : memref<1x105x8xf32, #tpu.memory_space<vmem>>, vector<1x20x8xf32>
    %74 = vector.shape_cast %73 : vector<1x20x8xf32> to vector<20x8xf32>
    %c12 = arith.constant 12 : index
    %c0_66 = arith.constant 0 : index
    %c0_67 = arith.constant 0 : index
    %75 = vector.load %arg3[%c12, %c0_66, %c0_67] : memref<16x8x16xf32, #tpu.memory_space<vmem>>, vector<1x8x16xf32>
    %76 = vector.shape_cast %75 : vector<1x8x16xf32> to vector<8x16xf32>
    %cst_68 = arith.constant dense<0.000000e+00> : vector<20x16xf32>
    %77 = tpu.matmul %74, %76, %cst_68 {dimension_numbers = #tpu.dot_dimension_numbers<[1], [0], [0], [1], [0, 0, 1, 1], [], []>} : vector<20x8xf32>, vector<8x16xf32>, vector<20x16xf32> -> vector<20x16xf32>
    %78 = arith.addf %72, %77 : vector<20x16xf32>
    %c0_69 = arith.constant 0 : index
    %c80 = arith.constant 80 : index
    %c0_70 = arith.constant 0 : index
    %79 = vector.load %arg2[%c0_69, %c80, %c0_70] : memref<1x105x8xf32, #tpu.memory_space<vmem>>, vector<1x20x8xf32>
    %80 = vector.shape_cast %79 : vector<1x20x8xf32> to vector<20x8xf32>
    %c13 = arith.constant 13 : index
    %c0_71 = arith.constant 0 : index
    %c0_72 = arith.constant 0 : index
    %81 = vector.load %arg3[%c13, %c0_71, %c0_72] : memref<16x8x16xf32, #tpu.memory_space<vmem>>, vector<1x8x16xf32>
    %82 = vector.shape_cast %81 : vector<1x8x16xf32> to vector<8x16xf32>
    %cst_73 = arith.constant dense<0.000000e+00> : vector<20x16xf32>
    %83 = tpu.matmul %80, %82, %cst_73 {dimension_numbers = #tpu.dot_dimension_numbers<[1], [0], [0], [1], [0, 0, 1, 1], [], []>} : vector<20x8xf32>, vector<8x16xf32>, vector<20x16xf32> -> vector<20x16xf32>
    %84 = arith.addf %78, %83 : vector<20x16xf32>
    %c0_74 = arith.constant 0 : index
    %c56 = arith.constant 56 : index
    %c0_75 = arith.constant 0 : index
    %85 = vector.load %arg2[%c0_74, %c56, %c0_75] : memref<1x105x8xf32, #tpu.memory_space<vmem>>, vector<1x20x8xf32>
    %86 = vector.shape_cast %85 : vector<1x20x8xf32> to vector<20x8xf32>
    %c14 = arith.constant 14 : index
    %c0_76 = arith.constant 0 : index
    %c0_77 = arith.constant 0 : index
    %87 = vector.load %arg3[%c14, %c0_76, %c0_77] : memref<16x8x16xf32, #tpu.memory_space<vmem>>, vector<1x8x16xf32>
    %88 = vector.shape_cast %87 : vector<1x8x16xf32> to vector<8x16xf32>
    %cst_78 = arith.constant dense<0.000000e+00> : vector<20x16xf32>
    %89 = tpu.matmul %86, %88, %cst_78 {dimension_numbers = #tpu.dot_dimension_numbers<[1], [0], [0], [1], [0, 0, 1, 1], [], []>} : vector<20x8xf32>, vector<8x16xf32>, vector<20x16xf32> -> vector<20x16xf32>
    %90 = arith.addf %84, %89 : vector<20x16xf32>
    %c0_79 = arith.constant 0 : index
    %c81 = arith.constant 81 : index
    %c0_80 = arith.constant 0 : index
    %91 = vector.load %arg2[%c0_79, %c81, %c0_80] : memref<1x105x8xf32, #tpu.memory_space<vmem>>, vector<1x20x8xf32>
    %92 = vector.shape_cast %91 : vector<1x20x8xf32> to vector<20x8xf32>
    %c15 = arith.constant 15 : index
    %c0_81 = arith.constant 0 : index
    %c0_82 = arith.constant 0 : index
    %93 = vector.load %arg3[%c15, %c0_81, %c0_82] : memref<16x8x16xf32, #tpu.memory_space<vmem>>, vector<1x8x16xf32>
    %94 = vector.shape_cast %93 : vector<1x8x16xf32> to vector<8x16xf32>
    %cst_83 = arith.constant dense<0.000000e+00> : vector<20x16xf32>
    %95 = tpu.matmul %92, %94, %cst_83 {dimension_numbers = #tpu.dot_dimension_numbers<[1], [0], [0], [1], [0, 0, 1, 1], [], []>} : vector<20x8xf32>, vector<8x16xf32>, vector<20x16xf32> -> vector<20x16xf32>
    %96 = arith.addf %90, %95 : vector<20x16xf32>
    %c0_84 = arith.constant 0 : index
    %c0_85 = arith.constant 0 : index
    %97 = vector.load %arg4[%c0_84, %c0_85] : memref<1x16xf32, #tpu.memory_space<vmem>>, vector<1x16xf32>
    %98 = vector.broadcast %97 : vector<1x16xf32> to vector<20x16xf32>
    %99 = arith.addf %96, %98 : vector<20x16xf32>
    %100 = tpu.iota {dimensions = array<i32: 0>} : vector<20x1xi32>
    %c5_i32 = arith.constant 5 : i32
    %c0_i32 = arith.constant 0 : i32
    %101 = arith.cmpi eq, %c5_i32, %c0_i32 : i32
    %c1_i32 = arith.constant 1 : i32
    %102 = arith.select %101, %c1_i32, %c5_i32 : i32
    %103 = vector.broadcast %102 : i32 to vector<20x1xi32>
    %104 = arith.remsi %100, %103 : vector<20x1xi32>
    %c0_i32_86 = arith.constant 0 : i32
    %105 = vector.broadcast %c0_i32_86 : i32 to vector<20x1xi32>
    %106 = arith.cmpi ne, %104, %105 : vector<20x1xi32>
    %c0_i32_87 = arith.constant 0 : i32
    %107 = vector.broadcast %c0_i32_87 : i32 to vector<20x1xi32>
    %108 = arith.cmpi slt, %104, %107 : vector<20x1xi32>
    %c0_i32_88 = arith.constant 0 : i32
    %109 = arith.cmpi slt, %102, %c0_i32_88 : i32
    %110 = vector.broadcast %109 : i1 to vector<20x1xi1>
    %111 = vector.broadcast %110 : vector<20x1xi1> to vector<20x1xi1>
    %112 = arith.xori %108, %111 : vector<20x1xi1>
    %113 = arith.andi %112, %106 : vector<20x1xi1>
    %114 = vector.broadcast %102 : i32 to vector<20x1xi32>
    %115 = arith.addi %104, %114 : vector<20x1xi32>
    %116 = arith.select %113, %115, %104 : vector<20x1xi1>, vector<20x1xi32>
    %c4_i32 = arith.constant 4 : i32
    %117 = vector.broadcast %c4_i32 : i32 to vector<20x1xi32>
    %118 = arith.cmpi slt, %116, %117 : vector<20x1xi32>
    %119 = arith.extui %118 : vector<20x1xi1> to vector<20x1xi32>
    %120 = arith.sitofp %119 : vector<20x1xi32> to vector<20x1xf32>
    %121 = vector.broadcast %120 : vector<20x1xf32> to vector<20x16xf32>
    %122 = arith.mulf %99, %121 : vector<20x16xf32>
    %cst_89 = arith.constant dense<0.000000e+00> : vector<16xf32>
    %123 = vector.multi_reduction <add>, %122, %cst_89 [0] : vector<20x16xf32> to vector<16xf32>
    %124 = vector.shape_cast %123 : vector<16xf32> to vector<1x16xf32>
    %cst_90 = arith.constant 6.250000e-02 : f32
    %125 = vector.broadcast %cst_90 : f32 to vector<1x16xf32>
    %126 = arith.mulf %124, %125 : vector<1x16xf32>
    %127 = vector.broadcast %126 : vector<1x16xf32> to vector<20x16xf32>
    %128 = arith.subf %99, %127 : vector<20x16xf32>
    %129 = vector.broadcast %120 : vector<20x1xf32> to vector<20x16xf32>
    %130 = arith.mulf %128, %129 : vector<20x16xf32>
    %131 = arith.mulf %130, %130 : vector<20x16xf32>
    %cst_91 = arith.constant dense<0.000000e+00> : vector<16xf32>
    %132 = vector.multi_reduction <add>, %131, %cst_91 [0] : vector<20x16xf32> to vector<16xf32>
    %133 = vector.shape_cast %132 : vector<16xf32> to vector<1x16xf32>
    %cst_92 = arith.constant 6.250000e-02 : f32
    %134 = vector.broadcast %cst_92 : f32 to vector<1x16xf32>
    %135 = arith.mulf %133, %134 : vector<1x16xf32>
    %cst_93 = arith.constant 9.99999974E-6 : f32
    %136 = vector.broadcast %cst_93 : f32 to vector<1x16xf32>
    %137 = arith.addf %135, %136 : vector<1x16xf32>
    %138 = math.rsqrt %137 : vector<1x16xf32>
    %139 = vector.broadcast %138 : vector<1x16xf32> to vector<20x16xf32>
    %140 = arith.mulf %130, %139 : vector<20x16xf32>
    %cst_94 = arith.constant 0.000000e+00 : f32
    %141 = vector.broadcast %cst_94 : f32 to vector<20x16xf32>
    %142 = arith.cmpf oge, %140, %141 : vector<20x16xf32>
    %cst_95 = arith.constant 2.000000e-01 : f32
    %143 = vector.broadcast %cst_95 : f32 to vector<20x16xf32>
    %144 = arith.mulf %143, %140 : vector<20x16xf32>
    %145 = arith.select %142, %140, %144 : vector<20x16xi1>, vector<20x16xf32>
    %c0_96 = arith.constant 0 : index
    %c0_97 = arith.constant 0 : index
    %c0_98 = arith.constant 0 : index
    %146 = vector.load %arg5[%c0_96, %c0_97, %c0_98] : memref<1x20x16xf32, #tpu.memory_space<vmem>>, vector<1x20x16xf32>
    %147 = vector.shape_cast %146 : vector<1x20x16xf32> to vector<20x16xf32>
    %148 = vector.shape_cast %145 : vector<20x16xf32> to vector<1x20x16xf32>
    tpu.vector_store %arg5[%c0_96, %c0_97, %c0_98], %148 {strides = array<i32>} : memref<1x20x16xf32, #tpu.memory_space<vmem>>, vector<1x20x16xf32>,
    return
  }
  func.func @transform_0(%arg0: i32, %arg1: i32) -> (i32, i32, i32) {
    %c0_i32 = arith.constant 0 : i32
    %c0_i32_0 = arith.constant 0 : i32
    %c0_i32_1 = arith.constant 0 : i32
    return %arg0, %c0_i32, %c0_i32_0 : i32, i32, i32
  }
  func.func @transform_1(%arg0: i32, %arg1: i32) -> (i32, i32, i32) {
    %c0_i32 = arith.constant 0 : i32
    %c0_i32_0 = arith.constant 0 : i32
    %c0_i32_1 = arith.constant 0 : i32
    return %c0_i32, %c0_i32_0, %arg1 : i32, i32, i32
  }
  func.func @transform_2(%arg0: i32, %arg1: i32) -> (i32, i32) {
    %c0_i32 = arith.constant 0 : i32
    %c0_i32_0 = arith.constant 0 : i32
    return %c0_i32, %arg1 : i32, i32
  }
  func.func @transform_3(%arg0: i32, %arg1: i32) -> (i32, i32, i32) {
    %c0_i32 = arith.constant 0 : i32
    %c0_i32_0 = arith.constant 0 : i32
    return %arg0, %c0_i32, %arg1 : i32, i32, i32
  }
}

module attributes {stable_mosaic.version = 11 : i64} {
  func.func @_conv_tap_kernel(%arg0: i32, %arg1: i32, %arg2: memref<1x42x16xf32, #tpu.memory_space<vmem>>, %arg3: memref<16x16x32xf32, #tpu.memory_space<vmem>>, %arg4: memref<1x32xf32, #tpu.memory_space<vmem>>, %arg5: memref<1x18x32xf32, #tpu.memory_space<vmem>>) attributes {dimension_semantics = [#tpu.dimension_semantics<parallel>, #tpu.dimension_semantics<parallel>], iteration_bounds = array<i64: 2, 1>, scalar_prefetch = 0 : i64, scratch_operands = 0 : i64, tpu.core_type = #tpu.core_type<tc>, window_params = [{transform_indices = @transform_0, window_bounds = array<i64: 1, 42, 16>}, {transform_indices = @transform_1, window_bounds = array<i64: 16, 16, 32>}, {transform_indices = @transform_2, window_bounds = array<i64: 1, 32>}, {transform_indices = @transform_3, window_bounds = array<i64: 1, 18, 32>}]} {
    %cst = arith.constant 0.000000e+00 : f32
    %0 = vector.broadcast %cst : f32 to vector<18x32xf32>
    %c0 = arith.constant 0 : index
    %c0_0 = arith.constant 0 : index
    %c0_1 = arith.constant 0 : index
    %1 = vector.load %arg2[%c0, %c0_0, %c0_1] : memref<1x42x16xf32, #tpu.memory_space<vmem>>, vector<1x18x16xf32>
    %2 = vector.shape_cast %1 : vector<1x18x16xf32> to vector<18x16xf32>
    %c0_2 = arith.constant 0 : index
    %c0_3 = arith.constant 0 : index
    %c0_4 = arith.constant 0 : index
    %3 = vector.load %arg3[%c0_2, %c0_3, %c0_4] : memref<16x16x32xf32, #tpu.memory_space<vmem>>, vector<1x16x32xf32>
    %4 = vector.shape_cast %3 : vector<1x16x32xf32> to vector<16x32xf32>
    %cst_5 = arith.constant dense<0.000000e+00> : vector<18x32xf32>
    %5 = tpu.matmul %2, %4, %cst_5 {dimension_numbers = #tpu.dot_dimension_numbers<[1], [0], [0], [1], [0, 0, 1, 1], [], []>} : vector<18x16xf32>, vector<16x32xf32>, vector<18x32xf32> -> vector<18x32xf32>
    %6 = arith.addf %0, %5 : vector<18x32xf32>
    %c0_6 = arith.constant 0 : index
    %c1 = arith.constant 1 : index
    %c0_7 = arith.constant 0 : index
    %7 = vector.load %arg2[%c0_6, %c1, %c0_7] : memref<1x42x16xf32, #tpu.memory_space<vmem>>, vector<1x18x16xf32>
    %8 = vector.shape_cast %7 : vector<1x18x16xf32> to vector<18x16xf32>
    %c1_8 = arith.constant 1 : index
    %c0_9 = arith.constant 0 : index
    %c0_10 = arith.constant 0 : index
    %9 = vector.load %arg3[%c1_8, %c0_9, %c0_10] : memref<16x16x32xf32, #tpu.memory_space<vmem>>, vector<1x16x32xf32>
    %10 = vector.shape_cast %9 : vector<1x16x32xf32> to vector<16x32xf32>
    %cst_11 = arith.constant dense<0.000000e+00> : vector<18x32xf32>
    %11 = tpu.matmul %8, %10, %cst_11 {dimension_numbers = #tpu.dot_dimension_numbers<[1], [0], [0], [1], [0, 0, 1, 1], [], []>} : vector<18x16xf32>, vector<16x32xf32>, vector<18x32xf32> -> vector<18x32xf32>
    %12 = arith.addf %6, %11 : vector<18x32xf32>
    %c0_12 = arith.constant 0 : index
    %c2 = arith.constant 2 : index
    %c0_13 = arith.constant 0 : index
    %13 = vector.load %arg2[%c0_12, %c2, %c0_13] : memref<1x42x16xf32, #tpu.memory_space<vmem>>, vector<1x18x16xf32>
    %14 = vector.shape_cast %13 : vector<1x18x16xf32> to vector<18x16xf32>
    %c2_14 = arith.constant 2 : index
    %c0_15 = arith.constant 0 : index
    %c0_16 = arith.constant 0 : index
    %15 = vector.load %arg3[%c2_14, %c0_15, %c0_16] : memref<16x16x32xf32, #tpu.memory_space<vmem>>, vector<1x16x32xf32>
    %16 = vector.shape_cast %15 : vector<1x16x32xf32> to vector<16x32xf32>
    %cst_17 = arith.constant dense<0.000000e+00> : vector<18x32xf32>
    %17 = tpu.matmul %14, %16, %cst_17 {dimension_numbers = #tpu.dot_dimension_numbers<[1], [0], [0], [1], [0, 0, 1, 1], [], []>} : vector<18x16xf32>, vector<16x32xf32>, vector<18x32xf32> -> vector<18x32xf32>
    %18 = arith.addf %12, %17 : vector<18x32xf32>
    %c0_18 = arith.constant 0 : index
    %c3 = arith.constant 3 : index
    %c0_19 = arith.constant 0 : index
    %19 = vector.load %arg2[%c0_18, %c3, %c0_19] : memref<1x42x16xf32, #tpu.memory_space<vmem>>, vector<1x18x16xf32>
    %20 = vector.shape_cast %19 : vector<1x18x16xf32> to vector<18x16xf32>
    %c3_20 = arith.constant 3 : index
    %c0_21 = arith.constant 0 : index
    %c0_22 = arith.constant 0 : index
    %21 = vector.load %arg3[%c3_20, %c0_21, %c0_22] : memref<16x16x32xf32, #tpu.memory_space<vmem>>, vector<1x16x32xf32>
    %22 = vector.shape_cast %21 : vector<1x16x32xf32> to vector<16x32xf32>
    %cst_23 = arith.constant dense<0.000000e+00> : vector<18x32xf32>
    %23 = tpu.matmul %20, %22, %cst_23 {dimension_numbers = #tpu.dot_dimension_numbers<[1], [0], [0], [1], [0, 0, 1, 1], [], []>} : vector<18x16xf32>, vector<16x32xf32>, vector<18x32xf32> -> vector<18x32xf32>
    %24 = arith.addf %18, %23 : vector<18x32xf32>
    %c0_24 = arith.constant 0 : index
    %c6 = arith.constant 6 : index
    %c0_25 = arith.constant 0 : index
    %25 = vector.load %arg2[%c0_24, %c6, %c0_25] : memref<1x42x16xf32, #tpu.memory_space<vmem>>, vector<1x18x16xf32>
    %26 = vector.shape_cast %25 : vector<1x18x16xf32> to vector<18x16xf32>
    %c4 = arith.constant 4 : index
    %c0_26 = arith.constant 0 : index
    %c0_27 = arith.constant 0 : index
    %27 = vector.load %arg3[%c4, %c0_26, %c0_27] : memref<16x16x32xf32, #tpu.memory_space<vmem>>, vector<1x16x32xf32>
    %28 = vector.shape_cast %27 : vector<1x16x32xf32> to vector<16x32xf32>
    %cst_28 = arith.constant dense<0.000000e+00> : vector<18x32xf32>
    %29 = tpu.matmul %26, %28, %cst_28 {dimension_numbers = #tpu.dot_dimension_numbers<[1], [0], [0], [1], [0, 0, 1, 1], [], []>} : vector<18x16xf32>, vector<16x32xf32>, vector<18x32xf32> -> vector<18x32xf32>
    %30 = arith.addf %24, %29 : vector<18x32xf32>
    %c0_29 = arith.constant 0 : index
    %c7 = arith.constant 7 : index
    %c0_30 = arith.constant 0 : index
    %31 = vector.load %arg2[%c0_29, %c7, %c0_30] : memref<1x42x16xf32, #tpu.memory_space<vmem>>, vector<1x18x16xf32>
    %32 = vector.shape_cast %31 : vector<1x18x16xf32> to vector<18x16xf32>
    %c5 = arith.constant 5 : index
    %c0_31 = arith.constant 0 : index
    %c0_32 = arith.constant 0 : index
    %33 = vector.load %arg3[%c5, %c0_31, %c0_32] : memref<16x16x32xf32, #tpu.memory_space<vmem>>, vector<1x16x32xf32>
    %34 = vector.shape_cast %33 : vector<1x16x32xf32> to vector<16x32xf32>
    %cst_33 = arith.constant dense<0.000000e+00> : vector<18x32xf32>
    %35 = tpu.matmul %32, %34, %cst_33 {dimension_numbers = #tpu.dot_dimension_numbers<[1], [0], [0], [1], [0, 0, 1, 1], [], []>} : vector<18x16xf32>, vector<16x32xf32>, vector<18x32xf32> -> vector<18x32xf32>
    %36 = arith.addf %30, %35 : vector<18x32xf32>
    %c0_34 = arith.constant 0 : index
    %c8 = arith.constant 8 : index
    %c0_35 = arith.constant 0 : index
    %37 = vector.load %arg2[%c0_34, %c8, %c0_35] : memref<1x42x16xf32, #tpu.memory_space<vmem>>, vector<1x18x16xf32>
    %38 = vector.shape_cast %37 : vector<1x18x16xf32> to vector<18x16xf32>
    %c6_36 = arith.constant 6 : index
    %c0_37 = arith.constant 0 : index
    %c0_38 = arith.constant 0 : index
    %39 = vector.load %arg3[%c6_36, %c0_37, %c0_38] : memref<16x16x32xf32, #tpu.memory_space<vmem>>, vector<1x16x32xf32>
    %40 = vector.shape_cast %39 : vector<1x16x32xf32> to vector<16x32xf32>
    %cst_39 = arith.constant dense<0.000000e+00> : vector<18x32xf32>
    %41 = tpu.matmul %38, %40, %cst_39 {dimension_numbers = #tpu.dot_dimension_numbers<[1], [0], [0], [1], [0, 0, 1, 1], [], []>} : vector<18x16xf32>, vector<16x32xf32>, vector<18x32xf32> -> vector<18x32xf32>
    %42 = arith.addf %36, %41 : vector<18x32xf32>
    %c0_40 = arith.constant 0 : index
    %c9 = arith.constant 9 : index
    %c0_41 = arith.constant 0 : index
    %43 = vector.load %arg2[%c0_40, %c9, %c0_41] : memref<1x42x16xf32, #tpu.memory_space<vmem>>, vector<1x18x16xf32>
    %44 = vector.shape_cast %43 : vector<1x18x16xf32> to vector<18x16xf32>
    %c7_42 = arith.constant 7 : index
    %c0_43 = arith.constant 0 : index
    %c0_44 = arith.constant 0 : index
    %45 = vector.load %arg3[%c7_42, %c0_43, %c0_44] : memref<16x16x32xf32, #tpu.memory_space<vmem>>, vector<1x16x32xf32>
    %46 = vector.shape_cast %45 : vector<1x16x32xf32> to vector<16x32xf32>
    %cst_45 = arith.constant dense<0.000000e+00> : vector<18x32xf32>
    %47 = tpu.matmul %44, %46, %cst_45 {dimension_numbers = #tpu.dot_dimension_numbers<[1], [0], [0], [1], [0, 0, 1, 1], [], []>} : vector<18x16xf32>, vector<16x32xf32>, vector<18x32xf32> -> vector<18x32xf32>
    %48 = arith.addf %42, %47 : vector<18x32xf32>
    %c0_46 = arith.constant 0 : index
    %c12 = arith.constant 12 : index
    %c0_47 = arith.constant 0 : index
    %49 = vector.load %arg2[%c0_46, %c12, %c0_47] : memref<1x42x16xf32, #tpu.memory_space<vmem>>, vector<1x18x16xf32>
    %50 = vector.shape_cast %49 : vector<1x18x16xf32> to vector<18x16xf32>
    %c8_48 = arith.constant 8 : index
    %c0_49 = arith.constant 0 : index
    %c0_50 = arith.constant 0 : index
    %51 = vector.load %arg3[%c8_48, %c0_49, %c0_50] : memref<16x16x32xf32, #tpu.memory_space<vmem>>, vector<1x16x32xf32>
    %52 = vector.shape_cast %51 : vector<1x16x32xf32> to vector<16x32xf32>
    %cst_51 = arith.constant dense<0.000000e+00> : vector<18x32xf32>
    %53 = tpu.matmul %50, %52, %cst_51 {dimension_numbers = #tpu.dot_dimension_numbers<[1], [0], [0], [1], [0, 0, 1, 1], [], []>} : vector<18x16xf32>, vector<16x32xf32>, vector<18x32xf32> -> vector<18x32xf32>
    %54 = arith.addf %48, %53 : vector<18x32xf32>
    %c0_52 = arith.constant 0 : index
    %c13 = arith.constant 13 : index
    %c0_53 = arith.constant 0 : index
    %55 = vector.load %arg2[%c0_52, %c13, %c0_53] : memref<1x42x16xf32, #tpu.memory_space<vmem>>, vector<1x18x16xf32>
    %56 = vector.shape_cast %55 : vector<1x18x16xf32> to vector<18x16xf32>
    %c9_54 = arith.constant 9 : index
    %c0_55 = arith.constant 0 : index
    %c0_56 = arith.constant 0 : index
    %57 = vector.load %arg3[%c9_54, %c0_55, %c0_56] : memref<16x16x32xf32, #tpu.memory_space<vmem>>, vector<1x16x32xf32>
    %58 = vector.shape_cast %57 : vector<1x16x32xf32> to vector<16x32xf32>
    %cst_57 = arith.constant dense<0.000000e+00> : vector<18x32xf32>
    %59 = tpu.matmul %56, %58, %cst_57 {dimension_numbers = #tpu.dot_dimension_numbers<[1], [0], [0], [1], [0, 0, 1, 1], [], []>} : vector<18x16xf32>, vector<16x32xf32>, vector<18x32xf32> -> vector<18x32xf32>
    %60 = arith.addf %54, %59 : vector<18x32xf32>
    %c0_58 = arith.constant 0 : index
    %c14 = arith.constant 14 : index
    %c0_59 = arith.constant 0 : index
    %61 = vector.load %arg2[%c0_58, %c14, %c0_59] : memref<1x42x16xf32, #tpu.memory_space<vmem>>, vector<1x18x16xf32>
    %62 = vector.shape_cast %61 : vector<1x18x16xf32> to vector<18x16xf32>
    %c10 = arith.constant 10 : index
    %c0_60 = arith.constant 0 : index
    %c0_61 = arith.constant 0 : index
    %63 = vector.load %arg3[%c10, %c0_60, %c0_61] : memref<16x16x32xf32, #tpu.memory_space<vmem>>, vector<1x16x32xf32>
    %64 = vector.shape_cast %63 : vector<1x16x32xf32> to vector<16x32xf32>
    %cst_62 = arith.constant dense<0.000000e+00> : vector<18x32xf32>
    %65 = tpu.matmul %62, %64, %cst_62 {dimension_numbers = #tpu.dot_dimension_numbers<[1], [0], [0], [1], [0, 0, 1, 1], [], []>} : vector<18x16xf32>, vector<16x32xf32>, vector<18x32xf32> -> vector<18x32xf32>
    %66 = arith.addf %60, %65 : vector<18x32xf32>
    %c0_63 = arith.constant 0 : index
    %c15 = arith.constant 15 : index
    %c0_64 = arith.constant 0 : index
    %67 = vector.load %arg2[%c0_63, %c15, %c0_64] : memref<1x42x16xf32, #tpu.memory_space<vmem>>, vector<1x18x16xf32>
    %68 = vector.shape_cast %67 : vector<1x18x16xf32> to vector<18x16xf32>
    %c11 = arith.constant 11 : index
    %c0_65 = arith.constant 0 : index
    %c0_66 = arith.constant 0 : index
    %69 = vector.load %arg3[%c11, %c0_65, %c0_66] : memref<16x16x32xf32, #tpu.memory_space<vmem>>, vector<1x16x32xf32>
    %70 = vector.shape_cast %69 : vector<1x16x32xf32> to vector<16x32xf32>
    %cst_67 = arith.constant dense<0.000000e+00> : vector<18x32xf32>
    %71 = tpu.matmul %68, %70, %cst_67 {dimension_numbers = #tpu.dot_dimension_numbers<[1], [0], [0], [1], [0, 0, 1, 1], [], []>} : vector<18x16xf32>, vector<16x32xf32>, vector<18x32xf32> -> vector<18x32xf32>
    %72 = arith.addf %66, %71 : vector<18x32xf32>
    %c0_68 = arith.constant 0 : index
    %c18 = arith.constant 18 : index
    %c0_69 = arith.constant 0 : index
    %73 = vector.load %arg2[%c0_68, %c18, %c0_69] : memref<1x42x16xf32, #tpu.memory_space<vmem>>, vector<1x18x16xf32>
    %74 = vector.shape_cast %73 : vector<1x18x16xf32> to vector<18x16xf32>
    %c12_70 = arith.constant 12 : index
    %c0_71 = arith.constant 0 : index
    %c0_72 = arith.constant 0 : index
    %75 = vector.load %arg3[%c12_70, %c0_71, %c0_72] : memref<16x16x32xf32, #tpu.memory_space<vmem>>, vector<1x16x32xf32>
    %76 = vector.shape_cast %75 : vector<1x16x32xf32> to vector<16x32xf32>
    %cst_73 = arith.constant dense<0.000000e+00> : vector<18x32xf32>
    %77 = tpu.matmul %74, %76, %cst_73 {dimension_numbers = #tpu.dot_dimension_numbers<[1], [0], [0], [1], [0, 0, 1, 1], [], []>} : vector<18x16xf32>, vector<16x32xf32>, vector<18x32xf32> -> vector<18x32xf32>
    %78 = arith.addf %72, %77 : vector<18x32xf32>
    %c0_74 = arith.constant 0 : index
    %c19 = arith.constant 19 : index
    %c0_75 = arith.constant 0 : index
    %79 = vector.load %arg2[%c0_74, %c19, %c0_75] : memref<1x42x16xf32, #tpu.memory_space<vmem>>, vector<1x18x16xf32>
    %80 = vector.shape_cast %79 : vector<1x18x16xf32> to vector<18x16xf32>
    %c13_76 = arith.constant 13 : index
    %c0_77 = arith.constant 0 : index
    %c0_78 = arith.constant 0 : index
    %81 = vector.load %arg3[%c13_76, %c0_77, %c0_78] : memref<16x16x32xf32, #tpu.memory_space<vmem>>, vector<1x16x32xf32>
    %82 = vector.shape_cast %81 : vector<1x16x32xf32> to vector<16x32xf32>
    %cst_79 = arith.constant dense<0.000000e+00> : vector<18x32xf32>
    %83 = tpu.matmul %80, %82, %cst_79 {dimension_numbers = #tpu.dot_dimension_numbers<[1], [0], [0], [1], [0, 0, 1, 1], [], []>} : vector<18x16xf32>, vector<16x32xf32>, vector<18x32xf32> -> vector<18x32xf32>
    %84 = arith.addf %78, %83 : vector<18x32xf32>
    %c0_80 = arith.constant 0 : index
    %c20 = arith.constant 20 : index
    %c0_81 = arith.constant 0 : index
    %85 = vector.load %arg2[%c0_80, %c20, %c0_81] : memref<1x42x16xf32, #tpu.memory_space<vmem>>, vector<1x18x16xf32>
    %86 = vector.shape_cast %85 : vector<1x18x16xf32> to vector<18x16xf32>
    %c14_82 = arith.constant 14 : index
    %c0_83 = arith.constant 0 : index
    %c0_84 = arith.constant 0 : index
    %87 = vector.load %arg3[%c14_82, %c0_83, %c0_84] : memref<16x16x32xf32, #tpu.memory_space<vmem>>, vector<1x16x32xf32>
    %88 = vector.shape_cast %87 : vector<1x16x32xf32> to vector<16x32xf32>
    %cst_85 = arith.constant dense<0.000000e+00> : vector<18x32xf32>
    %89 = tpu.matmul %86, %88, %cst_85 {dimension_numbers = #tpu.dot_dimension_numbers<[1], [0], [0], [1], [0, 0, 1, 1], [], []>} : vector<18x16xf32>, vector<16x32xf32>, vector<18x32xf32> -> vector<18x32xf32>
    %90 = arith.addf %84, %89 : vector<18x32xf32>
    %c0_86 = arith.constant 0 : index
    %c21 = arith.constant 21 : index
    %c0_87 = arith.constant 0 : index
    %91 = vector.load %arg2[%c0_86, %c21, %c0_87] : memref<1x42x16xf32, #tpu.memory_space<vmem>>, vector<1x18x16xf32>
    %92 = vector.shape_cast %91 : vector<1x18x16xf32> to vector<18x16xf32>
    %c15_88 = arith.constant 15 : index
    %c0_89 = arith.constant 0 : index
    %c0_90 = arith.constant 0 : index
    %93 = vector.load %arg3[%c15_88, %c0_89, %c0_90] : memref<16x16x32xf32, #tpu.memory_space<vmem>>, vector<1x16x32xf32>
    %94 = vector.shape_cast %93 : vector<1x16x32xf32> to vector<16x32xf32>
    %cst_91 = arith.constant dense<0.000000e+00> : vector<18x32xf32>
    %95 = tpu.matmul %92, %94, %cst_91 {dimension_numbers = #tpu.dot_dimension_numbers<[1], [0], [0], [1], [0, 0, 1, 1], [], []>} : vector<18x16xf32>, vector<16x32xf32>, vector<18x32xf32> -> vector<18x32xf32>
    %96 = arith.addf %90, %95 : vector<18x32xf32>
    %c0_92 = arith.constant 0 : index
    %c0_93 = arith.constant 0 : index
    %97 = vector.load %arg4[%c0_92, %c0_93] : memref<1x32xf32, #tpu.memory_space<vmem>>, vector<1x32xf32>
    %98 = vector.broadcast %97 : vector<1x32xf32> to vector<18x32xf32>
    %99 = arith.addf %96, %98 : vector<18x32xf32>
    %100 = tpu.iota {dimensions = array<i32: 0>} : vector<18x1xi32>
    %c6_i32 = arith.constant 6 : i32
    %c0_i32 = arith.constant 0 : i32
    %101 = arith.cmpi eq, %c6_i32, %c0_i32 : i32
    %c1_i32 = arith.constant 1 : i32
    %102 = arith.select %101, %c1_i32, %c6_i32 : i32
    %103 = vector.broadcast %102 : i32 to vector<18x1xi32>
    %104 = arith.remsi %100, %103 : vector<18x1xi32>
    %c0_i32_94 = arith.constant 0 : i32
    %105 = vector.broadcast %c0_i32_94 : i32 to vector<18x1xi32>
    %106 = arith.cmpi ne, %104, %105 : vector<18x1xi32>
    %c0_i32_95 = arith.constant 0 : i32
    %107 = vector.broadcast %c0_i32_95 : i32 to vector<18x1xi32>
    %108 = arith.cmpi slt, %104, %107 : vector<18x1xi32>
    %c0_i32_96 = arith.constant 0 : i32
    %109 = arith.cmpi slt, %102, %c0_i32_96 : i32
    %110 = vector.broadcast %109 : i1 to vector<18x1xi1>
    %111 = vector.broadcast %110 : vector<18x1xi1> to vector<18x1xi1>
    %112 = arith.xori %108, %111 : vector<18x1xi1>
    %113 = arith.andi %112, %106 : vector<18x1xi1>
    %114 = vector.broadcast %102 : i32 to vector<18x1xi32>
    %115 = arith.addi %104, %114 : vector<18x1xi32>
    %116 = arith.select %113, %115, %104 : vector<18x1xi1>, vector<18x1xi32>
    %c3_i32 = arith.constant 3 : i32
    %117 = vector.broadcast %c3_i32 : i32 to vector<18x1xi32>
    %118 = arith.cmpi slt, %116, %117 : vector<18x1xi32>
    %119 = arith.extui %118 : vector<18x1xi1> to vector<18x1xi32>
    %120 = arith.sitofp %119 : vector<18x1xi32> to vector<18x1xf32>
    %121 = vector.broadcast %120 : vector<18x1xf32> to vector<18x32xf32>
    %122 = arith.mulf %99, %121 : vector<18x32xf32>
    %cst_97 = arith.constant dense<0.000000e+00> : vector<32xf32>
    %123 = vector.multi_reduction <add>, %122, %cst_97 [0] : vector<18x32xf32> to vector<32xf32>
    %124 = vector.shape_cast %123 : vector<32xf32> to vector<1x32xf32>
    %cst_98 = arith.constant 0.111111112 : f32
    %125 = vector.broadcast %cst_98 : f32 to vector<1x32xf32>
    %126 = arith.mulf %124, %125 : vector<1x32xf32>
    %127 = vector.broadcast %126 : vector<1x32xf32> to vector<18x32xf32>
    %128 = arith.subf %99, %127 : vector<18x32xf32>
    %129 = vector.broadcast %120 : vector<18x1xf32> to vector<18x32xf32>
    %130 = arith.mulf %128, %129 : vector<18x32xf32>
    %131 = arith.mulf %130, %130 : vector<18x32xf32>
    %cst_99 = arith.constant dense<0.000000e+00> : vector<32xf32>
    %132 = vector.multi_reduction <add>, %131, %cst_99 [0] : vector<18x32xf32> to vector<32xf32>
    %133 = vector.shape_cast %132 : vector<32xf32> to vector<1x32xf32>
    %cst_100 = arith.constant 0.111111112 : f32
    %134 = vector.broadcast %cst_100 : f32 to vector<1x32xf32>
    %135 = arith.mulf %133, %134 : vector<1x32xf32>
    %cst_101 = arith.constant 9.99999974E-6 : f32
    %136 = vector.broadcast %cst_101 : f32 to vector<1x32xf32>
    %137 = arith.addf %135, %136 : vector<1x32xf32>
    %138 = math.rsqrt %137 : vector<1x32xf32>
    %139 = vector.broadcast %138 : vector<1x32xf32> to vector<18x32xf32>
    %140 = arith.mulf %130, %139 : vector<18x32xf32>
    %cst_102 = arith.constant 0.000000e+00 : f32
    %141 = vector.broadcast %cst_102 : f32 to vector<18x32xf32>
    %142 = arith.cmpf oge, %140, %141 : vector<18x32xf32>
    %cst_103 = arith.constant 2.000000e-01 : f32
    %143 = vector.broadcast %cst_103 : f32 to vector<18x32xf32>
    %144 = arith.mulf %143, %140 : vector<18x32xf32>
    %145 = arith.select %142, %140, %144 : vector<18x32xi1>, vector<18x32xf32>
    %c0_104 = arith.constant 0 : index
    %c0_105 = arith.constant 0 : index
    %c0_106 = arith.constant 0 : index
    %146 = vector.load %arg5[%c0_104, %c0_105, %c0_106] : memref<1x18x32xf32, #tpu.memory_space<vmem>>, vector<1x18x32xf32>
    %147 = vector.shape_cast %146 : vector<1x18x32xf32> to vector<18x32xf32>
    %148 = vector.shape_cast %145 : vector<18x32xf32> to vector<1x18x32xf32>
    tpu.vector_store %arg5[%c0_104, %c0_105, %c0_106], %148 {strides = array<i32>} : memref<1x18x32xf32, #tpu.memory_space<vmem>>, vector<1x18x32xf32>,
    return
  }
  func.func @transform_0(%arg0: i32, %arg1: i32) -> (i32, i32, i32) {
    %c0_i32 = arith.constant 0 : i32
    %c0_i32_0 = arith.constant 0 : i32
    %c0_i32_1 = arith.constant 0 : i32
    return %arg0, %c0_i32, %c0_i32_0 : i32, i32, i32
  }
  func.func @transform_1(%arg0: i32, %arg1: i32) -> (i32, i32, i32) {
    %c0_i32 = arith.constant 0 : i32
    %c0_i32_0 = arith.constant 0 : i32
    %c0_i32_1 = arith.constant 0 : i32
    return %c0_i32, %c0_i32_0, %arg1 : i32, i32, i32
  }
  func.func @transform_2(%arg0: i32, %arg1: i32) -> (i32, i32) {
    %c0_i32 = arith.constant 0 : i32
    %c0_i32_0 = arith.constant 0 : i32
    return %c0_i32, %arg1 : i32, i32
  }
  func.func @transform_3(%arg0: i32, %arg1: i32) -> (i32, i32, i32) {
    %c0_i32 = arith.constant 0 : i32
    %c0_i32_0 = arith.constant 0 : i32
    return %arg0, %c0_i32, %arg1 : i32, i32, i32
  }
}

module attributes {stable_mosaic.version = 11 : i64} {
  func.func @_conv_tap_kernel(%arg0: i32, %arg1: i32, %arg2: memref<1x30x32xf32, #tpu.memory_space<vmem>>, %arg3: memref<16x32x8xf32, #tpu.memory_space<vmem>>, %arg4: memref<1x8xf32, #tpu.memory_space<vmem>>, %arg5: memref<1x10x8xf32, #tpu.memory_space<vmem>>) attributes {dimension_semantics = [#tpu.dimension_semantics<parallel>, #tpu.dimension_semantics<parallel>], iteration_bounds = array<i64: 2, 1>, scalar_prefetch = 0 : i64, scratch_operands = 0 : i64, tpu.core_type = #tpu.core_type<tc>, window_params = [{transform_indices = @transform_0, window_bounds = array<i64: 1, 30, 32>}, {transform_indices = @transform_1, window_bounds = array<i64: 16, 32, 8>}, {transform_indices = @transform_2, window_bounds = array<i64: 1, 8>}, {transform_indices = @transform_3, window_bounds = array<i64: 1, 10, 8>}]} {
    %cst = arith.constant 0.000000e+00 : f32
    %0 = vector.broadcast %cst : f32 to vector<10x8xf32>
    %c0 = arith.constant 0 : index
    %c0_0 = arith.constant 0 : index
    %c0_1 = arith.constant 0 : index
    %1 = vector.load %arg2[%c0, %c0_0, %c0_1] : memref<1x30x32xf32, #tpu.memory_space<vmem>>, vector<1x10x32xf32>
    %2 = vector.shape_cast %1 : vector<1x10x32xf32> to vector<10x32xf32>
    %c0_2 = arith.constant 0 : index
    %c0_3 = arith.constant 0 : index
    %c0_4 = arith.constant 0 : index
    %3 = vector.load %arg3[%c0_2, %c0_3, %c0_4] : memref<16x32x8xf32, #tpu.memory_space<vmem>>, vector<1x32x8xf32>
    %4 = vector.shape_cast %3 : vector<1x32x8xf32> to vector<32x8xf32>
    %cst_5 = arith.constant dense<0.000000e+00> : vector<10x8xf32>
    %5 = tpu.matmul %2, %4, %cst_5 {dimension_numbers = #tpu.dot_dimension_numbers<[1], [0], [0], [1], [0, 0, 1, 1], [], []>} : vector<10x32xf32>, vector<32x8xf32>, vector<10x8xf32> -> vector<10x8xf32>
    %6 = arith.addf %0, %5 : vector<10x8xf32>
    %c0_6 = arith.constant 0 : index
    %c1 = arith.constant 1 : index
    %c0_7 = arith.constant 0 : index
    %7 = vector.load %arg2[%c0_6, %c1, %c0_7] : memref<1x30x32xf32, #tpu.memory_space<vmem>>, vector<1x10x32xf32>
    %8 = vector.shape_cast %7 : vector<1x10x32xf32> to vector<10x32xf32>
    %c1_8 = arith.constant 1 : index
    %c0_9 = arith.constant 0 : index
    %c0_10 = arith.constant 0 : index
    %9 = vector.load %arg3[%c1_8, %c0_9, %c0_10] : memref<16x32x8xf32, #tpu.memory_space<vmem>>, vector<1x32x8xf32>
    %10 = vector.shape_cast %9 : vector<1x32x8xf32> to vector<32x8xf32>
    %cst_11 = arith.constant dense<0.000000e+00> : vector<10x8xf32>
    %11 = tpu.matmul %8, %10, %cst_11 {dimension_numbers = #tpu.dot_dimension_numbers<[1], [0], [0], [1], [0, 0, 1, 1], [], []>} : vector<10x32xf32>, vector<32x8xf32>, vector<10x8xf32> -> vector<10x8xf32>
    %12 = arith.addf %6, %11 : vector<10x8xf32>
    %c0_12 = arith.constant 0 : index
    %c2 = arith.constant 2 : index
    %c0_13 = arith.constant 0 : index
    %13 = vector.load %arg2[%c0_12, %c2, %c0_13] : memref<1x30x32xf32, #tpu.memory_space<vmem>>, vector<1x10x32xf32>
    %14 = vector.shape_cast %13 : vector<1x10x32xf32> to vector<10x32xf32>
    %c2_14 = arith.constant 2 : index
    %c0_15 = arith.constant 0 : index
    %c0_16 = arith.constant 0 : index
    %15 = vector.load %arg3[%c2_14, %c0_15, %c0_16] : memref<16x32x8xf32, #tpu.memory_space<vmem>>, vector<1x32x8xf32>
    %16 = vector.shape_cast %15 : vector<1x32x8xf32> to vector<32x8xf32>
    %cst_17 = arith.constant dense<0.000000e+00> : vector<10x8xf32>
    %17 = tpu.matmul %14, %16, %cst_17 {dimension_numbers = #tpu.dot_dimension_numbers<[1], [0], [0], [1], [0, 0, 1, 1], [], []>} : vector<10x32xf32>, vector<32x8xf32>, vector<10x8xf32> -> vector<10x8xf32>
    %18 = arith.addf %12, %17 : vector<10x8xf32>
    %c0_18 = arith.constant 0 : index
    %c3 = arith.constant 3 : index
    %c0_19 = arith.constant 0 : index
    %19 = vector.load %arg2[%c0_18, %c3, %c0_19] : memref<1x30x32xf32, #tpu.memory_space<vmem>>, vector<1x10x32xf32>
    %20 = vector.shape_cast %19 : vector<1x10x32xf32> to vector<10x32xf32>
    %c3_20 = arith.constant 3 : index
    %c0_21 = arith.constant 0 : index
    %c0_22 = arith.constant 0 : index
    %21 = vector.load %arg3[%c3_20, %c0_21, %c0_22] : memref<16x32x8xf32, #tpu.memory_space<vmem>>, vector<1x32x8xf32>
    %22 = vector.shape_cast %21 : vector<1x32x8xf32> to vector<32x8xf32>
    %cst_23 = arith.constant dense<0.000000e+00> : vector<10x8xf32>
    %23 = tpu.matmul %20, %22, %cst_23 {dimension_numbers = #tpu.dot_dimension_numbers<[1], [0], [0], [1], [0, 0, 1, 1], [], []>} : vector<10x32xf32>, vector<32x8xf32>, vector<10x8xf32> -> vector<10x8xf32>
    %24 = arith.addf %18, %23 : vector<10x8xf32>
    %c0_24 = arith.constant 0 : index
    %c5 = arith.constant 5 : index
    %c0_25 = arith.constant 0 : index
    %25 = vector.load %arg2[%c0_24, %c5, %c0_25] : memref<1x30x32xf32, #tpu.memory_space<vmem>>, vector<1x10x32xf32>
    %26 = vector.shape_cast %25 : vector<1x10x32xf32> to vector<10x32xf32>
    %c4 = arith.constant 4 : index
    %c0_26 = arith.constant 0 : index
    %c0_27 = arith.constant 0 : index
    %27 = vector.load %arg3[%c4, %c0_26, %c0_27] : memref<16x32x8xf32, #tpu.memory_space<vmem>>, vector<1x32x8xf32>
    %28 = vector.shape_cast %27 : vector<1x32x8xf32> to vector<32x8xf32>
    %cst_28 = arith.constant dense<0.000000e+00> : vector<10x8xf32>
    %29 = tpu.matmul %26, %28, %cst_28 {dimension_numbers = #tpu.dot_dimension_numbers<[1], [0], [0], [1], [0, 0, 1, 1], [], []>} : vector<10x32xf32>, vector<32x8xf32>, vector<10x8xf32> -> vector<10x8xf32>
    %30 = arith.addf %24, %29 : vector<10x8xf32>
    %c0_29 = arith.constant 0 : index
    %c6 = arith.constant 6 : index
    %c0_30 = arith.constant 0 : index
    %31 = vector.load %arg2[%c0_29, %c6, %c0_30] : memref<1x30x32xf32, #tpu.memory_space<vmem>>, vector<1x10x32xf32>
    %32 = vector.shape_cast %31 : vector<1x10x32xf32> to vector<10x32xf32>
    %c5_31 = arith.constant 5 : index
    %c0_32 = arith.constant 0 : index
    %c0_33 = arith.constant 0 : index
    %33 = vector.load %arg3[%c5_31, %c0_32, %c0_33] : memref<16x32x8xf32, #tpu.memory_space<vmem>>, vector<1x32x8xf32>
    %34 = vector.shape_cast %33 : vector<1x32x8xf32> to vector<32x8xf32>
    %cst_34 = arith.constant dense<0.000000e+00> : vector<10x8xf32>
    %35 = tpu.matmul %32, %34, %cst_34 {dimension_numbers = #tpu.dot_dimension_numbers<[1], [0], [0], [1], [0, 0, 1, 1], [], []>} : vector<10x32xf32>, vector<32x8xf32>, vector<10x8xf32> -> vector<10x8xf32>
    %36 = arith.addf %30, %35 : vector<10x8xf32>
    %c0_35 = arith.constant 0 : index
    %c7 = arith.constant 7 : index
    %c0_36 = arith.constant 0 : index
    %37 = vector.load %arg2[%c0_35, %c7, %c0_36] : memref<1x30x32xf32, #tpu.memory_space<vmem>>, vector<1x10x32xf32>
    %38 = vector.shape_cast %37 : vector<1x10x32xf32> to vector<10x32xf32>
    %c6_37 = arith.constant 6 : index
    %c0_38 = arith.constant 0 : index
    %c0_39 = arith.constant 0 : index
    %39 = vector.load %arg3[%c6_37, %c0_38, %c0_39] : memref<16x32x8xf32, #tpu.memory_space<vmem>>, vector<1x32x8xf32>
    %40 = vector.shape_cast %39 : vector<1x32x8xf32> to vector<32x8xf32>
    %cst_40 = arith.constant dense<0.000000e+00> : vector<10x8xf32>
    %41 = tpu.matmul %38, %40, %cst_40 {dimension_numbers = #tpu.dot_dimension_numbers<[1], [0], [0], [1], [0, 0, 1, 1], [], []>} : vector<10x32xf32>, vector<32x8xf32>, vector<10x8xf32> -> vector<10x8xf32>
    %42 = arith.addf %36, %41 : vector<10x8xf32>
    %c0_41 = arith.constant 0 : index
    %c8 = arith.constant 8 : index
    %c0_42 = arith.constant 0 : index
    %43 = vector.load %arg2[%c0_41, %c8, %c0_42] : memref<1x30x32xf32, #tpu.memory_space<vmem>>, vector<1x10x32xf32>
    %44 = vector.shape_cast %43 : vector<1x10x32xf32> to vector<10x32xf32>
    %c7_43 = arith.constant 7 : index
    %c0_44 = arith.constant 0 : index
    %c0_45 = arith.constant 0 : index
    %45 = vector.load %arg3[%c7_43, %c0_44, %c0_45] : memref<16x32x8xf32, #tpu.memory_space<vmem>>, vector<1x32x8xf32>
    %46 = vector.shape_cast %45 : vector<1x32x8xf32> to vector<32x8xf32>
    %cst_46 = arith.constant dense<0.000000e+00> : vector<10x8xf32>
    %47 = tpu.matmul %44, %46, %cst_46 {dimension_numbers = #tpu.dot_dimension_numbers<[1], [0], [0], [1], [0, 0, 1, 1], [], []>} : vector<10x32xf32>, vector<32x8xf32>, vector<10x8xf32> -> vector<10x8xf32>
    %48 = arith.addf %42, %47 : vector<10x8xf32>
    %c0_47 = arith.constant 0 : index
    %c10 = arith.constant 10 : index
    %c0_48 = arith.constant 0 : index
    %49 = vector.load %arg2[%c0_47, %c10, %c0_48] : memref<1x30x32xf32, #tpu.memory_space<vmem>>, vector<1x10x32xf32>
    %50 = vector.shape_cast %49 : vector<1x10x32xf32> to vector<10x32xf32>
    %c8_49 = arith.constant 8 : index
    %c0_50 = arith.constant 0 : index
    %c0_51 = arith.constant 0 : index
    %51 = vector.load %arg3[%c8_49, %c0_50, %c0_51] : memref<16x32x8xf32, #tpu.memory_space<vmem>>, vector<1x32x8xf32>
    %52 = vector.shape_cast %51 : vector<1x32x8xf32> to vector<32x8xf32>
    %cst_52 = arith.constant dense<0.000000e+00> : vector<10x8xf32>
    %53 = tpu.matmul %50, %52, %cst_52 {dimension_numbers = #tpu.dot_dimension_numbers<[1], [0], [0], [1], [0, 0, 1, 1], [], []>} : vector<10x32xf32>, vector<32x8xf32>, vector<10x8xf32> -> vector<10x8xf32>
    %54 = arith.addf %48, %53 : vector<10x8xf32>
    %c0_53 = arith.constant 0 : index
    %c11 = arith.constant 11 : index
    %c0_54 = arith.constant 0 : index
    %55 = vector.load %arg2[%c0_53, %c11, %c0_54] : memref<1x30x32xf32, #tpu.memory_space<vmem>>, vector<1x10x32xf32>
    %56 = vector.shape_cast %55 : vector<1x10x32xf32> to vector<10x32xf32>
    %c9 = arith.constant 9 : index
    %c0_55 = arith.constant 0 : index
    %c0_56 = arith.constant 0 : index
    %57 = vector.load %arg3[%c9, %c0_55, %c0_56] : memref<16x32x8xf32, #tpu.memory_space<vmem>>, vector<1x32x8xf32>
    %58 = vector.shape_cast %57 : vector<1x32x8xf32> to vector<32x8xf32>
    %cst_57 = arith.constant dense<0.000000e+00> : vector<10x8xf32>
    %59 = tpu.matmul %56, %58, %cst_57 {dimension_numbers = #tpu.dot_dimension_numbers<[1], [0], [0], [1], [0, 0, 1, 1], [], []>} : vector<10x32xf32>, vector<32x8xf32>, vector<10x8xf32> -> vector<10x8xf32>
    %60 = arith.addf %54, %59 : vector<10x8xf32>
    %c0_58 = arith.constant 0 : index
    %c12 = arith.constant 12 : index
    %c0_59 = arith.constant 0 : index
    %61 = vector.load %arg2[%c0_58, %c12, %c0_59] : memref<1x30x32xf32, #tpu.memory_space<vmem>>, vector<1x10x32xf32>
    %62 = vector.shape_cast %61 : vector<1x10x32xf32> to vector<10x32xf32>
    %c10_60 = arith.constant 10 : index
    %c0_61 = arith.constant 0 : index
    %c0_62 = arith.constant 0 : index
    %63 = vector.load %arg3[%c10_60, %c0_61, %c0_62] : memref<16x32x8xf32, #tpu.memory_space<vmem>>, vector<1x32x8xf32>
    %64 = vector.shape_cast %63 : vector<1x32x8xf32> to vector<32x8xf32>
    %cst_63 = arith.constant dense<0.000000e+00> : vector<10x8xf32>
    %65 = tpu.matmul %62, %64, %cst_63 {dimension_numbers = #tpu.dot_dimension_numbers<[1], [0], [0], [1], [0, 0, 1, 1], [], []>} : vector<10x32xf32>, vector<32x8xf32>, vector<10x8xf32> -> vector<10x8xf32>
    %66 = arith.addf %60, %65 : vector<10x8xf32>
    %c0_64 = arith.constant 0 : index
    %c13 = arith.constant 13 : index
    %c0_65 = arith.constant 0 : index
    %67 = vector.load %arg2[%c0_64, %c13, %c0_65] : memref<1x30x32xf32, #tpu.memory_space<vmem>>, vector<1x10x32xf32>
    %68 = vector.shape_cast %67 : vector<1x10x32xf32> to vector<10x32xf32>
    %c11_66 = arith.constant 11 : index
    %c0_67 = arith.constant 0 : index
    %c0_68 = arith.constant 0 : index
    %69 = vector.load %arg3[%c11_66, %c0_67, %c0_68] : memref<16x32x8xf32, #tpu.memory_space<vmem>>, vector<1x32x8xf32>
    %70 = vector.shape_cast %69 : vector<1x32x8xf32> to vector<32x8xf32>
    %cst_69 = arith.constant dense<0.000000e+00> : vector<10x8xf32>
    %71 = tpu.matmul %68, %70, %cst_69 {dimension_numbers = #tpu.dot_dimension_numbers<[1], [0], [0], [1], [0, 0, 1, 1], [], []>} : vector<10x32xf32>, vector<32x8xf32>, vector<10x8xf32> -> vector<10x8xf32>
    %72 = arith.addf %66, %71 : vector<10x8xf32>
    %c0_70 = arith.constant 0 : index
    %c15 = arith.constant 15 : index
    %c0_71 = arith.constant 0 : index
    %73 = vector.load %arg2[%c0_70, %c15, %c0_71] : memref<1x30x32xf32, #tpu.memory_space<vmem>>, vector<1x10x32xf32>
    %74 = vector.shape_cast %73 : vector<1x10x32xf32> to vector<10x32xf32>
    %c12_72 = arith.constant 12 : index
    %c0_73 = arith.constant 0 : index
    %c0_74 = arith.constant 0 : index
    %75 = vector.load %arg3[%c12_72, %c0_73, %c0_74] : memref<16x32x8xf32, #tpu.memory_space<vmem>>, vector<1x32x8xf32>
    %76 = vector.shape_cast %75 : vector<1x32x8xf32> to vector<32x8xf32>
    %cst_75 = arith.constant dense<0.000000e+00> : vector<10x8xf32>
    %77 = tpu.matmul %74, %76, %cst_75 {dimension_numbers = #tpu.dot_dimension_numbers<[1], [0], [0], [1], [0, 0, 1, 1], [], []>} : vector<10x32xf32>, vector<32x8xf32>, vector<10x8xf32> -> vector<10x8xf32>
    %78 = arith.addf %72, %77 : vector<10x8xf32>
    %c0_76 = arith.constant 0 : index
    %c16 = arith.constant 16 : index
    %c0_77 = arith.constant 0 : index
    %79 = vector.load %arg2[%c0_76, %c16, %c0_77] : memref<1x30x32xf32, #tpu.memory_space<vmem>>, vector<1x10x32xf32>
    %80 = vector.shape_cast %79 : vector<1x10x32xf32> to vector<10x32xf32>
    %c13_78 = arith.constant 13 : index
    %c0_79 = arith.constant 0 : index
    %c0_80 = arith.constant 0 : index
    %81 = vector.load %arg3[%c13_78, %c0_79, %c0_80] : memref<16x32x8xf32, #tpu.memory_space<vmem>>, vector<1x32x8xf32>
    %82 = vector.shape_cast %81 : vector<1x32x8xf32> to vector<32x8xf32>
    %cst_81 = arith.constant dense<0.000000e+00> : vector<10x8xf32>
    %83 = tpu.matmul %80, %82, %cst_81 {dimension_numbers = #tpu.dot_dimension_numbers<[1], [0], [0], [1], [0, 0, 1, 1], [], []>} : vector<10x32xf32>, vector<32x8xf32>, vector<10x8xf32> -> vector<10x8xf32>
    %84 = arith.addf %78, %83 : vector<10x8xf32>
    %c0_82 = arith.constant 0 : index
    %c17 = arith.constant 17 : index
    %c0_83 = arith.constant 0 : index
    %85 = vector.load %arg2[%c0_82, %c17, %c0_83] : memref<1x30x32xf32, #tpu.memory_space<vmem>>, vector<1x10x32xf32>
    %86 = vector.shape_cast %85 : vector<1x10x32xf32> to vector<10x32xf32>
    %c14 = arith.constant 14 : index
    %c0_84 = arith.constant 0 : index
    %c0_85 = arith.constant 0 : index
    %87 = vector.load %arg3[%c14, %c0_84, %c0_85] : memref<16x32x8xf32, #tpu.memory_space<vmem>>, vector<1x32x8xf32>
    %88 = vector.shape_cast %87 : vector<1x32x8xf32> to vector<32x8xf32>
    %cst_86 = arith.constant dense<0.000000e+00> : vector<10x8xf32>
    %89 = tpu.matmul %86, %88, %cst_86 {dimension_numbers = #tpu.dot_dimension_numbers<[1], [0], [0], [1], [0, 0, 1, 1], [], []>} : vector<10x32xf32>, vector<32x8xf32>, vector<10x8xf32> -> vector<10x8xf32>
    %90 = arith.addf %84, %89 : vector<10x8xf32>
    %c0_87 = arith.constant 0 : index
    %c18 = arith.constant 18 : index
    %c0_88 = arith.constant 0 : index
    %91 = vector.load %arg2[%c0_87, %c18, %c0_88] : memref<1x30x32xf32, #tpu.memory_space<vmem>>, vector<1x10x32xf32>
    %92 = vector.shape_cast %91 : vector<1x10x32xf32> to vector<10x32xf32>
    %c15_89 = arith.constant 15 : index
    %c0_90 = arith.constant 0 : index
    %c0_91 = arith.constant 0 : index
    %93 = vector.load %arg3[%c15_89, %c0_90, %c0_91] : memref<16x32x8xf32, #tpu.memory_space<vmem>>, vector<1x32x8xf32>
    %94 = vector.shape_cast %93 : vector<1x32x8xf32> to vector<32x8xf32>
    %cst_92 = arith.constant dense<0.000000e+00> : vector<10x8xf32>
    %95 = tpu.matmul %92, %94, %cst_92 {dimension_numbers = #tpu.dot_dimension_numbers<[1], [0], [0], [1], [0, 0, 1, 1], [], []>} : vector<10x32xf32>, vector<32x8xf32>, vector<10x8xf32> -> vector<10x8xf32>
    %96 = arith.addf %90, %95 : vector<10x8xf32>
    %c0_93 = arith.constant 0 : index
    %c0_94 = arith.constant 0 : index
    %97 = vector.load %arg4[%c0_93, %c0_94] : memref<1x8xf32, #tpu.memory_space<vmem>>, vector<1x8xf32>
    %98 = vector.broadcast %97 : vector<1x8xf32> to vector<10x8xf32>
    %99 = arith.addf %96, %98 : vector<10x8xf32>
    %c0_95 = arith.constant 0 : index
    %c0_96 = arith.constant 0 : index
    %c0_97 = arith.constant 0 : index
    %100 = vector.load %arg5[%c0_95, %c0_96, %c0_97] : memref<1x10x8xf32, #tpu.memory_space<vmem>>, vector<1x10x8xf32>
    %101 = vector.shape_cast %100 : vector<1x10x8xf32> to vector<10x8xf32>
    %102 = vector.shape_cast %99 : vector<10x8xf32> to vector<1x10x8xf32>
    tpu.vector_store %arg5[%c0_95, %c0_96, %c0_97], %102 {strides = array<i32>} : memref<1x10x8xf32, #tpu.memory_space<vmem>>, vector<1x10x8xf32>,
    return
  }
  func.func @transform_0(%arg0: i32, %arg1: i32) -> (i32, i32, i32) {
    %c0_i32 = arith.constant 0 : i32
    %c0_i32_0 = arith.constant 0 : i32
    %c0_i32_1 = arith.constant 0 : i32
    return %arg0, %c0_i32, %c0_i32_0 : i32, i32, i32
  }
  func.func @transform_1(%arg0: i32, %arg1: i32) -> (i32, i32, i32) {
    %c0_i32 = arith.constant 0 : i32
    %c0_i32_0 = arith.constant 0 : i32
    %c0_i32_1 = arith.constant 0 : i32
    return %c0_i32, %c0_i32_0, %arg1 : i32, i32, i32
  }
  func.func @transform_2(%arg0: i32, %arg1: i32) -> (i32, i32) {
    %c0_i32 = arith.constant 0 : i32
    %c0_i32_0 = arith.constant 0 : i32
    return %c0_i32, %arg1 : i32, i32
  }
  func.func @transform_3(%arg0: i32, %arg1: i32) -> (i32, i32, i32) {
    %c0_i32 = arith.constant 0 : i32
    %c0_i32_0 = arith.constant 0 : i32
    return %arg0, %c0_i32, %arg1 : i32, i32, i32
  }
}

</mosaic_0001>

<bundles_post_ra>
// kernel: _lambda_.4
= control target key start
LH: loop header
LB: loop body
LE: loop exit
PB: predicated region body
PF: predicated region fallthrough
CT: control target
= control target key end

     0   :  { %s610_s12 = smov 0   ;;  %s612_s13 = smov 0   ;;  %s697_s0 = inlined_call_operand.vmem [shape: f32[2,64,48], index: 0, kind: input, shape index: {}]   ;;  %s698_s1 = inlined_call_operand.vmem [shape: f32[48,8], index: 1, kind: input, shape index: {}]   ;;  %s699_s2 = inlined_call_operand.vmem [shape: f32[1,8], index: 2, kind: input, shape index: {}]   ;;  %s700_s3 = inlined_call_operand.vmem [shape: f32[2,64,8], index: 3, kind: output, shape index: {}]  }
   0x1   :  { %s614_s14 = smov 0  }
   0x2 LB: > { %s32_s15 = sadd.s32 1, %s584_s13  ;;  %p506_p0 = scmp.ge.s32.totalorder %s588_s14, 1  ;;  %s588_s14 = sphi %s614_s14, %s13_s14   ;;  %s584_s13 = sphi %s612_s13, %s702_s13   ;;  %s580_s12 = sphi %s610_s12, %s701_s12  }
   0x3   : > { %p34_p1 = scmp.ge.s32.totalorder %s32_s15, 2  ;;  %p184_p2 = scmp.lt.s32.totalorder %s588_s14, 3 }
   0x5   : > { %s704_s15 = smov (%p34_p1, %s32_s15), 0  ;;  %p185_p3 = pnand %p506_p0, %p184_p2 }
   0x6   : > { %p227_p4 = scmp.lt.s32.totalorder (!%p185_p3), %s580_s12, 1 }
   0x7   : > { %188 = sbr.rel (%p185_p3) target bundleno = 171 (0xab), region = 32 }
   0xc   : > { %v269_v0 = vld [vmem:[%s698_s1 + $0x28] sm:$0xff]  ;;  %v268_v1 = vld [vmem:[%s698_s1 + $0x20] sm:$0xff]  ;;  %v267_v2 = vld [vmem:[%s698_s1 + $0x18] sm:$0xff]  ;;  %s706_s12 = smov (!%p227_p4, %s580_s12), 1  ;;  %vm274_vm0 = vcmask 392192   ;;  %vm364_vm1 = vcmask 64512  }
   0xd   : > { %524 = vmatpush.msra.mxu2 %v269_v0  ;;  %525 = vmatpush.msra.mxu3 %v269_v0  ;;  %v266_v3 = vld [vmem:[%s698_s1 + $0x10] sm:$0xff]  ;;  %s521_s24 = sshll.u32 %s706_s12, 6  ;;  %v265_v4 = vld [vmem:[%s698_s1 + $0x8] sm:$0xff]  ;;  %v264_v5 = vld [vmem:[%s698_s1] sm:$0xff] }
   0xe   : > { %309 = vmatpush.msra.mxu0 %v269_v0  ;;  %523 = vmatpush.msra.mxu1 %v269_v0  ;;  %s234_s29 = scalar_lea.vmem %s697_s0, %s521_s24  ;;  %v565_v14 = vld [vmem:[%s699_s2] ss:$0 sm:$0xff]  ;;  %s670_s9 = scalar_lea.vmem %s700_s3, %s521_s24 }
   0xf   : > { %527 = vmatpush.msra.mxu2 %v268_v1  ;;  %528 = vmatpush.msra.mxu3 %v268_v1  ;;  %v260_v6 = vld [vmem:[%s234_s29 + $0x20] sm:$0xff]  ;;  %v262_v7 = vld [vmem:[%s234_s29 + $0x30] sm:$0xff]  ;;  %v261_v10 = vld [vmem:[%s234_s29 + $0x28] sm:$0xff] }
  0x10   : > { %310 = vmatpush.msra.mxu0 %v268_v1  ;;  %526 = vmatpush.msra.mxu1 %v268_v1  ;;  %v256_v8 = vld [vmem:[%s234_s29] sm:$0xff]  ;;  %v258_v9 = vld [vmem:[%s234_s29 + $0x10] sm:$0xff]  ;;  %v263_v11 = vld [vmem:[%s234_s29 + $0x38] sm:$0xff] }
  0x11   : > { %530 = vmatpush.msra.mxu2 %v267_v2  ;;  %531 = vmatpush.msra.mxu3 %v267_v2  ;;  %v257_v12 = vld [vmem:[%s234_s29 + $0x8] sm:$0xff]  ;;  %v259_v13 = vld [vmem:[%s234_s29 + $0x18] sm:$0xff] }
  0x12   : > { %311 = vmatpush.msra.mxu0 %v267_v2  ;;  %529 = vmatpush.msra.mxu1 %v267_v2 }
  0x13   : > { %533 = vmatpush.msra.mxu2 %v266_v3  ;;  %534 = vmatpush.msra.mxu3 %v266_v3 }
  0x14   : > { %312 = vmatpush.msra.mxu0 %v266_v3  ;;  %532 = vmatpush.msra.mxu1 %v266_v3 }
  0x15   : > { %536 = vmatpush.msra.mxu2 %v265_v4  ;;  %537 = vmatpush.msra.mxu3 %v265_v4 }
  0x16   : > { %313 = vmatpush.msra.mxu0 %v265_v4  ;;  %535 = vmatpush.msra.mxu1 %v265_v4 }
  0x17   : > { %539 = vmatpush.msra.mxu2 %v264_v5  ;;  %540 = vmatpush.msra.mxu3 %v264_v5 }
  0x18   : > { %515 = vmatmul.msk.f32.vlgmr.msra.gmra.mxu2 %vm274_vm0, %v260_v6  ;;  %517 = vmatmul.msk.f32.vlgmr.msra.gmra.mxu3 %vm274_vm0, %v262_v7 }
  0x19   : > { %314 = vmatpush.msra.mxu0 %v264_v5  ;;  %538 = vmatpush.msra.mxu1 %v264_v5 }
  0x1a   : > { %511 = vmatmul.msk.f32.vlgmr.msra.gmra.mxu0 %vm274_vm0, %v256_v8  ;;  %513 = vmatmul.msk.f32.vlgmr.msra.gmra.mxu1 %vm274_vm0, %v258_v9 }
  0x20   : > { %516 = vmatmul.msk.f32.gmra.mxu2 %vm274_vm0, %v261_v10  ;;  %518 = vmatmul.msk.f32.gmra.mxu3 %vm274_vm0, %v263_v11 }
  0x22   : > { %512 = vmatmul.msk.f32.gmra.mxu0 %vm274_vm0, %v257_v12  ;;  %514 = vmatmul.msk.f32.gmra.mxu1 %vm274_vm0, %v259_v13 }
  0x97   : > { %v316_v15 = vpop.f32.mrf.mxu0  ;;  %v322_v16 = vpop.f32.mrf.mxu1 }
  0x98   : > { %v317_v17 = vadd.f32 %v565_v14, %v316_v15  ;;  %v323_v18 = vadd.f32 %v565_v14, %v322_v16 }
  0x9a   : > { %vm340_vm2 = vcmp.ge.f32.partialorder %v317_v17, 0.0  ;;  %v348_v19 = vmul.f32 0.2, %v317_v17  ;;  %vm342_vm3 = vcmp.ge.f32.partialorder %v323_v18, 0.0  ;;  %v350_v20 = vmul.f32 0.2, %v323_v18 }
  0x9b   : > { %v328_v21 = vpop.f32.mrf.mxu2  ;;  %v334_v22 = vpop.f32.mrf.mxu3 }
  0x9c   : > { %v356_v23 = vsel %vm340_vm2, %v317_v17, %v348_v19  ;;  %v358_v24 = vsel %vm342_vm3, %v323_v18, %v350_v20  ;;  %v329_v25 = vadd.f32 %v565_v14, %v328_v21  ;;  %v335_v26 = vadd.f32 %v565_v14, %v334_v22 }
  0x9d   : > { %365 = vst.msk [vmem:[%s670_s9] sm:$0xff] %vm364_vm1, %v356_v23 }
  0x9e   : > { %367 = vst.msk [vmem:[%s670_s9 + $0x10] sm:$0xff] %vm364_vm1, %v358_v24  ;;  %vm344_vm4 = vcmp.ge.f32.partialorder %v329_v25, 0.0  ;;  %v352_v27 = vmul.f32 0.2, %v329_v25  ;;  %vm346_vm5 = vcmp.ge.f32.partialorder %v335_v26, 0.0 }
  0x9f   : > { %v354_v28 = vmul.f32 0.2, %v335_v26  ;;  %v319_v29 = vpop.f32.mrf.mxu0  ;;  %v325_v30 = vpop.f32.mrf.mxu1 }
  0xa0   : > { %v360_v31 = vsel %vm344_vm4, %v329_v25, %v352_v27  ;;  %v320_v32 = vadd.f32 %v565_v14, %v319_v29  ;;  %v326_v33 = vadd.f32 %v565_v14, %v325_v30 }
  0xa1   : > { %369 = vst.msk [vmem:[%s670_s9 + $0x20] sm:$0xff] %vm364_vm1, %v360_v31  ;;  %v362_v34 = vsel %vm346_vm5, %v335_v26, %v354_v28 }
  0xa2   : > { %371 = vst.msk [vmem:[%s670_s9 + $0x30] sm:$0xff] %vm364_vm1, %v362_v34  ;;  %vm341_vm6 = vcmp.ge.f32.partialorder %v320_v32, 0.0  ;;  %v349_v35 = vmul.f32 0.2, %v320_v32  ;;  %vm343_vm7 = vcmp.ge.f32.partialorder %v326_v33, 0.0 }
  0xa3   : > { %v351_v36 = vmul.f32 0.2, %v326_v33  ;;  %v331_v37 = vpop.f32.mrf.mxu2  ;;  %v337_v38 = vpop.f32.mrf.mxu3 }
  0xa4   : > { %v357_v39 = vsel %vm341_vm6, %v320_v32, %v349_v35  ;;  %v332_v40 = vadd.f32 %v565_v14, %v331_v37  ;;  %v338_v41 = vadd.f32 %v565_v14, %v337_v38 }
  0xa5   : > { %366 = vst.msk [vmem:[%s670_s9 + $0x8] sm:$0xff] %vm364_vm1, %v357_v39  ;;  %v359_v42 = vsel %vm343_vm7, %v326_v33, %v351_v36 }
  0xa6   : > { %368 = vst.msk [vmem:[%s670_s9 + $0x18] sm:$0xff] %vm364_vm1, %v359_v42  ;;  %vm345_vm8 = vcmp.ge.f32.partialorder %v332_v40, 0.0  ;;  %v353_v43 = vmul.f32 0.2, %v332_v40  ;;  %vm347_vm9 = vcmp.ge.f32.partialorder %v338_v41, 0.0 }
  0xa7   : > { %v355_v44 = vmul.f32 0.2, %v338_v41 }
  0xa8   : > { %v361_v45 = vsel %vm345_vm8, %v332_v40, %v353_v43 }
  0xa9   : > { %370 = vst.msk [vmem:[%s670_s9 + $0x28] sm:$0xff] %vm364_vm1, %v361_v45  ;;  %v363_v46 = vsel %vm347_vm9, %v338_v41, %v355_v44 }
  0xaa   : > { %372 = vst.msk [vmem:[%s670_s9 + $0x38] sm:$0xff] %vm364_vm1, %v363_v46 }
  0xab PF: > { %s13_s14 = sadd.s32 1, %s588_s14   ;;  %s701_s12 = smov %s584_s13 }
  0xac   : > { %p10_p5 = scmp.ge.s32.totalorder %s13_s14, 4   ;;  %s702_s13 = smov %s704_s15 }
  0xae   :  { %12 = sbr.rel (!%p10_p5) target bundleno = 2 (0x2), region = 68 }

// kernel: _lambda_.5
= control target key start
LH: loop header
LB: loop body
LE: loop exit
PB: predicated region body
PF: predicated region fallthrough
CT: control target
= control target key end

     0   :  { %s1349_s12 = smov 0   ;;  %s1351_s13 = smov 0   ;;  %s1657_s0 = inlined_call_operand.vmem [shape: f32[2,105,8], index: 0, kind: input, shape index: {}]   ;;  %s1658_s1 = inlined_call_operand.vmem [shape: f32[16,8,16], index: 1, kind: input, shape index: {}]   ;;  %s1659_s2 = inlined_call_operand.vmem [shape: f32[1,16], index: 2, kind: input, shape index: {}]   ;;  %s1660_s3 = inlined_call_operand.vmem [shape: f32[2,20,16], index: 3, kind: output, shape index: {}]  }
   0x1   :  { %s1353_s14 = smov 0  }
   0x2 LB: > { %s25_s15 = sadd.s32 1, %s1321_s13  ;;  %p1201_p0 = scmp.ge.s32.totalorder %s1325_s14, 1  ;;  %s1325_s14 = sphi %s1353_s14, %s13_s14   ;;  %s1321_s13 = sphi %s1351_s13, %s1666_s13   ;;  %s1317_s12 = sphi %s1349_s12, %s1665_s12  }
   0x3   : > { %p27_p1 = scmp.ge.s32.totalorder %s25_s15, 2  ;;  %p168_p2 = scmp.lt.s32.totalorder %s1325_s14, 3 }
   0x5   : > { %s1668_s15 = smov (%p27_p1, %s25_s15), 0  ;;  %p169_p3 = pnand %p1201_p0, %p168_p2 }
   0x6   : > { %p202_p4 = scmp.lt.s32.totalorder (!%p169_p3), %s1317_s12, 1 }
   0x7   : > { %172 = sbr.rel (%p169_p3) target bundleno = 315 (0x13b), region = 32 }
   0xc   : > { %v1204_v0 = vld [vmem:[%s1658_s1 + $0x8] sm:$0xff]  ;;  %v1211_v1 = vld [vmem:[%s1658_s1 + $0x10] sm:$0xff]  ;;  %v225_v3 = vld [vmem:[%s1658_s1] sm:$0xff]  ;;  %s1670_s12 = smov (!%p202_p4, %s1317_s12), 1  ;;  %vm231_vm0 = vcmask 64512  }
   0xd   : > { %v1227_v2 = vld [vmem:[%s1658_s1 + $0x30] sm:$0xff]  ;;  %256 = vmatpush.msra.mxu0 %v1204_v0  ;;  %331 = vmatpush.msra.mxu2 %v1211_v1  ;;  %v1215_v4 = vld [vmem:[%s1658_s1 + $0x18] sm:$0xff]  ;;  %v1219_v5 = vld [vmem:[%s1658_s1 + $0x20] sm:$0xff]  ;;  %s1272_s5 = smul.u32 112, %s1670_s12 }
   0xe   : > { %291 = vmatpush.msra.mxu1 %v225_v3  ;;  %v1231_v6 = vld [vmem:[%s1658_s1 + $0x38] sm:$0xff]  ;;  %v1223_v7 = vld [vmem:[%s1658_s1 + $0x28] sm:$0xff]  ;;  %374 = vmatpush.msra.mxu3 %v1215_v4  ;;  %v1243_v8 = vld [vmem:[%s1658_s1 + $0x50] sm:$0xff]  ;;  %s1273_s4 = smul.u32 24, %s1670_s12 }
   0xf   : > { %503 = vmatpush.msrb.mxu2 %v1227_v2  ;;  %417 = vmatpush.msrb.mxu0 %v1219_v5  ;;  %s1397_s8 = scalar_lea.vmem %s1657_s0, %s1272_s5  ;;  %v1235_v9 = vld [vmem:[%s1658_s1 + $0x40] sm:$0xff]  ;;  %v1247_v14 = vld [vmem:[%s1658_s1 + $0x58] sm:$0xff]  ;;  %v1239_v15 = vld [vmem:[%s1658_s1 + $0x48] sm:$0xff] }
  0x10   : > { %546 = vmatpush.msrb.mxu3 %v1231_v6  ;;  %460 = vmatpush.msrb.mxu1 %v1223_v7  ;;  %v226_v10 = vld [vmem:[%s1397_s8 + $0x19] sm:$0xff]  ;;  %v302_v11 = vld [vmem:[%s1397_s8 + $0x1] sm:$0xff]  ;;  %v303_v17 = vld [vmem:[%s1397_s8 + $0x9] sm:$0xff]  ;;  %s221_s7 = scalar_lea.vmem %s1660_s3, %s1273_s4 }
  0x11   : > { %v222_v12 = vld [vmem:[%s1397_s8] sm:$0xff]  ;;  %1205 = vmatmul.msk.f32.vlgmr.msra.gmra.mxu0 %vm231_vm0, %v226_v10  ;;  %1212 = vmatmul.msk.f32.vlgmr.msra.gmra.mxu2 %vm231_vm0, %v302_v11  ;;  %v223_v18 = vld [vmem:[%s1397_s8 + $0x8] sm:$0xff]  ;;  %v304_v21 = vld [vmem:[%s1397_s8 + $0x11] sm:$0xf] }
  0x12   : > { %v345_v13 = vld [vmem:[%s1397_s8 + $0x1a] sm:$0xff]  ;;  %1208 = vmatmul.msk.f32.vlgmr.msra.gmra.mxu1 %vm231_vm0, %v222_v12  ;;  %675 = vmatpush.msra.mxu2 %v1243_v8  ;;  %v346_v19 = vld [vmem:[%s1397_s8 + $0x22] sm:$0xff]  ;;  %v224_v22 = vld [vmem:[%s1397_s8 + $0x10] sm:$0xf] }
  0x13   : > { %1216 = vmatmul.msk.f32.vlgmr.msra.gmra.mxu3 %vm231_vm0, %v345_v13  ;;  %589 = vmatpush.msra.mxu0 %v1235_v9  ;;  %v227_v16 = vld [vmem:[%s1397_s8 + $0x21] sm:$0xff]  ;;  %v228_v20 = vld [vmem:[%s1397_s8 + $0x29] sm:$0xf]  ;;  %v388_v24 = vld [vmem:[%s1397_s8 + $0x32] sm:$0xff] }
  0x14   : > { %718 = vmatpush.msra.mxu3 %v1247_v14  ;;  %632 = vmatpush.msra.mxu1 %v1239_v15  ;;  %v347_v23 = vld [vmem:[%s1397_s8 + $0x2a] sm:$0xf]  ;;  %v474_v25 = vld [vmem:[%s1397_s8 + $0x33] sm:$0xff]  ;;  %v1251_v29 = vld [vmem:[%s1658_s1 + $0x60] sm:$0xff]  ;;  %v911_v14 = vlaneseq }
  0x15   : > { %v431_v26 = vld [vmem:[%s1397_s8 + $0x4b] sm:$0xff]  ;;  %v1263_v30 = vld [vmem:[%s1658_s1 + $0x78] sm:$0xff]  ;;  %v390_v36 = vld [vmem:[%s1397_s8 + $0x42] sm:$0xf] }
  0x16   : > { %v517_v27 = vld [vmem:[%s1397_s8 + $0x4c] sm:$0xff]  ;;  %v389_v32 = vld [vmem:[%s1397_s8 + $0x3a] sm:$0xff]  ;;  %v476_v37 = vld [vmem:[%s1397_s8 + $0x43] sm:$0xf] }
  0x17   : > { %v1259_v28 = vld [vmem:[%s1658_s1 + $0x70] sm:$0xff]  ;;  %v1255_v31 = vld [vmem:[%s1658_s1 + $0x68] sm:$0xff]  ;;  %v475_v33 = vld [vmem:[%s1397_s8 + $0x3b] sm:$0xff] }
  0x18   : > { %v432_v34 = vld [vmem:[%s1397_s8 + $0x53] sm:$0xff]  ;;  %v433_v38 = vld [vmem:[%s1397_s8 + $0x5b] sm:$0xf]  ;;  %v560_v40 = vld [vmem:[%s1397_s8 + $0x5] sm:$0xff] }
  0x19   : > { %1206 = vmatmul.msk.f32.gmra.mxu0 %vm231_vm0, %v227_v16  ;;  %1213 = vmatmul.msk.f32.gmra.mxu2 %vm231_vm0, %v303_v17  ;;  %v518_v35 = vld [vmem:[%s1397_s8 + $0x54] sm:$0xff]  ;;  %v519_v39 = vld [vmem:[%s1397_s8 + $0x5c] sm:$0xf]  ;;  %v646_v41 = vld [vmem:[%s1397_s8 + $0x6] sm:$0xff]  ;;  %v1539_v17 = vshrl.u32 %v911_v14, 7 }
  0x1a   : > { %1209 = vmatmul.msk.f32.gmra.mxu1 %vm231_vm0, %v223_v18  ;;  %v603_v42 = vld [vmem:[%s1397_s8 + $0x1e] sm:$0xff]  ;;  %v561_v44 = vld [vmem:[%s1397_s8 + $0xd] sm:$0xff]  ;;  %v562_v48 = vld [vmem:[%s1397_s8 + $0x15] sm:$0xf] }
  0x1b   : > { %1217 = vmatmul.msk.f32.gmra.mxu3 %vm231_vm0, %v346_v19  ;;  %v689_v43 = vld [vmem:[%s1397_s8 + $0x1f] sm:$0xff]  ;;  %v647_v45 = vld [vmem:[%s1397_s8 + $0xe] sm:$0xff]  ;;  %v648_v49 = vld [vmem:[%s1397_s8 + $0x16] sm:$0xf] }
  0x1c   : > { %v604_v46 = vld [vmem:[%s1397_s8 + $0x26] sm:$0xff]  ;;  %v605_v50 = vld [vmem:[%s1397_s8 + $0x2e] sm:$0xf]  ;;  %v732_v52 = vld [vmem:[%s1397_s8 + $0x37] sm:$0xff] }
  0x1d   : > { %v690_v47 = vld [vmem:[%s1397_s8 + $0x27] sm:$0xff]  ;;  %v691_v51 = vld [vmem:[%s1397_s8 + $0x2f] sm:$0xf]  ;;  %v818_v53 = vld [vmem:[%s1397_s8 + $0x38] sm:$0xff] }
  0x1e   : > { %v775_v54 = vld [vmem:[%s1397_s8 + $0x50] sm:$0xff]  ;;  %v733_v56 = vld [vmem:[%s1397_s8 + $0x3f] sm:$0xff]  ;;  %v734_v60 = vld [vmem:[%s1397_s8 + $0x47] sm:$0xf] }
  0x1f   : > { %v861_v55 = vld [vmem:[%s1397_s8 + $0x51] sm:$0xff]  ;;  %v819_v57 = vld [vmem:[%s1397_s8 + $0x40] sm:$0xff]  ;;  %v820_v61 = vld [vmem:[%s1397_s8 + $0x48] sm:$0xf] }
  0x20   : > { %v776_v58 = vld [vmem:[%s1397_s8 + $0x58] sm:$0xff]  ;;  %v777_v62 = vld [vmem:[%s1397_s8 + $0x60] sm:$0xf] }
  0x21   : > { %1207 = vmatmul.msk.f32.gmra.mxu0 %vm231_vm0, %v228_v20  ;;  %1214 = vmatmul.msk.f32.gmra.mxu2 %vm231_vm0, %v304_v21  ;;  %v862_v59 = vld [vmem:[%s1397_s8 + $0x59] sm:$0xff]  ;;  %v863_v63 = vld [vmem:[%s1397_s8 + $0x61] sm:$0xf]  ;;  %v1546_v20 = vadd.s32 8, %v1539_v17  ;;  %v918_v21 = vand.u32 65535, %v1539_v17 }
  0x22   : > { %1210 = vmatmul.msk.f32.gmra.mxu1 %vm231_vm0, %v224_v22 }
  0x23   : > { %1218 = vmatmul.msk.f32.gmra.mxu3 %vm231_vm0, %v347_v23  ;;  %v947_v22 = vand.u32 65535, %v1546_v20 }
  0x29   : > { %1220 = vmatmul.msk.f32.vlgmr.msrb.gmra.mxu0 %vm231_vm0, %v388_v24  ;;  %1228 = vmatmul.msk.f32.vlgmr.msrb.gmra.mxu2 %vm231_vm0, %v474_v25  ;;  %v948_v24 = vshrl.u32 %v1546_v20, 16  ;;  %v1553_v25 = vmul.u32 52428, %v947_v22 }
  0x2a   : > { %1224 = vmatmul.msk.f32.vlgmr.msrb.gmra.mxu1 %vm231_vm0, %v431_v26  ;;  %847 = vmatpush.msrb.mxu2 %v1259_v28  ;;  %v1558_v28 = vmul.u32 52428, %v918_v21 }
  0x2b   : > { %1232 = vmatmul.msk.f32.vlgmr.msrb.gmra.mxu3 %vm231_vm0, %v517_v27  ;;  %761 = vmatpush.msrb.mxu0 %v1251_v29  ;;  %v919_v27 = vshrl.u32 %v1539_v17, 16 }
  0x2c   : > { %890 = vmatpush.msrb.mxu3 %v1263_v30  ;;  %804 = vmatpush.msrb.mxu1 %v1255_v31  ;;  %v1563_v30 = vadd.s32 16, %v1539_v17 }
  0x31   : > { %1221 = vmatmul.msk.f32.gmra.mxu0 %vm231_vm0, %v389_v32  ;;  %1229 = vmatmul.msk.f32.gmra.mxu2 %vm231_vm0, %v475_v33  ;;  %v950_v32 = vmul.u32 52429, %v947_v22  ;;  %v1567_v33 = vmul.u32 52429, %v948_v24 }
  0x32   : > { %1225 = vmatmul.msk.f32.gmra.mxu1 %vm231_vm0, %v432_v34  ;;  %v954_v34 = vshll.u32 %v1553_v25, 16 }
  0x33   : > { %1233 = vmatmul.msk.f32.gmra.mxu3 %vm231_vm0, %v518_v35  ;;  %v976_v35 = vand.u32 65535, %v1563_v30 }
  0x34   : > { %vm958_vm1 = vc.u32 %v950_v32, %v954_v34 }
  0x39   : > { %1222 = vmatmul.msk.f32.gmra.mxu0 %vm231_vm0, %v390_v36  ;;  %1230 = vmatmul.msk.f32.gmra.mxu2 %vm231_vm0, %v476_v37  ;;  %v921_v36 = vmul.u32 52429, %v918_v21  ;;  %v1571_v37 = vmul.u32 52429, %v919_v27 }
  0x3a   : > { %1226 = vmatmul.msk.f32.gmra.mxu1 %vm231_vm0, %v433_v38  ;;  %v925_v38 = vshll.u32 %v1558_v28, 16 }
  0x3b   : > { %1234 = vmatmul.msk.f32.gmra.mxu3 %vm231_vm0, %v519_v39  ;;  %v977_v39 = vshrl.u32 %v1563_v30, 16 }
  0x3c   : > { %vm929_vm2 = vc.u32 %v921_v36, %v925_v38 }
  0x41   : > { %1236 = vmatmul.msk.f32.vlgmr.msra.gmra.mxu0 %vm231_vm0, %v560_v40  ;;  %1244 = vmatmul.msk.f32.vlgmr.msra.gmra.mxu2 %vm231_vm0, %v646_v41  ;;  %v1575_v40 = vmul.u32 52428, %v976_v35 }
  0x42   : > { %1240 = vmatmul.msk.f32.vlgmr.msra.gmra.mxu1 %vm231_vm0, %v603_v42 }
  0x43   : > { %1248 = vmatmul.msk.f32.vlgmr.msra.gmra.mxu3 %vm231_vm0, %v689_v43  ;;  %v956_v43 = vshll.u32 %v1567_v33, 16 }
  0x49   : > { %1237 = vmatmul.msk.f32.gmra.mxu0 %vm231_vm0, %v561_v44  ;;  %1245 = vmatmul.msk.f32.gmra.mxu2 %vm231_vm0, %v647_v45  ;;  %v960_v44 = vadd.s32 %v954_v34, %v950_v32  ;;  %v955_v32 = vshrl.u32 %v1553_v25, 16 }
  0x4a   : > { %1241 = vmatmul.msk.f32.gmra.mxu1 %vm231_vm0, %v604_v46  ;;  %v927_v46 = vshll.u32 %v1571_v37, 16 }
  0x4b   : > { %1249 = vmatmul.msk.f32.gmra.mxu3 %vm231_vm0, %v690_v47  ;;  %v931_v47 = vadd.s32 %v925_v38, %v921_v36  ;;  %vm962_vm3 = vc.u32 %v960_v44, %v956_v43  ;;  %v926_v38 = vshrl.u32 %v1558_v28, 16  ;;  %v957_v44 = vshrl.u32 %v1567_v33, 16 }
  0x4c   : > { %v984_v28 = vshrl.u32 %v1575_v40, 16 }
  0x4d   : > { %vm933_vm4 = vc.u32 %v931_v47, %v927_v46 }
  0x51   : > { %1238 = vmatmul.msk.f32.gmra.mxu0 %vm231_vm0, %v562_v48  ;;  %1246 = vmatmul.msk.f32.gmra.mxu2 %vm231_vm0, %v648_v49  ;;  %v953_v49 = vmul.u32 52428, %v948_v24 }
  0x52   : > { %1242 = vmatmul.msk.f32.gmra.mxu1 %vm231_vm0, %v605_v50  ;;  %v979_v50 = vmul.u32 52429, %v976_v35 }
  0x53   : > { %1250 = vmatmul.msk.f32.gmra.mxu3 %vm231_vm0, %v691_v51  ;;  %v1585_v51 = vmul.u32 52429, %v977_v39 }
  0x59   : > { %1252 = vmatmul.msk.f32.vlgmr.msrb.gmra.mxu0 %vm231_vm0, %v732_v52  ;;  %1260 = vmatmul.msk.f32.vlgmr.msrb.gmra.mxu2 %vm231_vm0, %v818_v53  ;;  %v983_v52 = vshll.u32 %v1575_v40, 16 }
  0x5a   : > { %1256 = vmatmul.msk.f32.vlgmr.msrb.gmra.mxu1 %vm231_vm0, %v775_v54 }
  0x5b   : > { %1264 = vmatmul.msk.f32.vlgmr.msrb.gmra.mxu3 %vm231_vm0, %v861_v55  ;;  %vm987_vm5 = vc.u32 %v979_v50, %v983_v52 }
  0x61   : > { %1253 = vmatmul.msk.f32.gmra.mxu0 %vm231_vm0, %v733_v56  ;;  %1261 = vmatmul.msk.f32.gmra.mxu2 %vm231_vm0, %v819_v57  ;;  %v1327_v56 = vmov 0  }
  0x62   : > { %1257 = vmatmul.msk.f32.gmra.mxu1 %vm231_vm0, %v776_v58  ;;  %v959_v57 = vsel %vm958_vm1, 1, %v1327_v56  ;;  %v924_v58 = vmul.u32 52428, %v919_v27  ;;  %v934_v24 = vsel %vm933_vm4, 1, %v1327_v56  ;;  %vm1033_vm4 = vcmask 125952  }
  0x63   : > { %1265 = vmatmul.msk.f32.gmra.mxu3 %vm231_vm0, %v862_v59 }
  0x69   : > { %1254 = vmatmul.msk.f32.gmra.mxu0 %vm231_vm0, %v734_v60  ;;  %1262 = vmatmul.msk.f32.gmra.mxu2 %vm231_vm0, %v820_v61  ;;  %v930_v60 = vsel %vm929_vm2, 1, %v1327_v56  ;;  %v961_v61 = vadd.s32 %v959_v57, %v953_v49 }
  0x6a   : > { %1258 = vmatmul.msk.f32.gmra.mxu1 %vm231_vm0, %v777_v62  ;;  %v985_v62 = vshll.u32 %v1585_v51, 16 }
  0x6b   : > { %1266 = vmatmul.msk.f32.gmra.mxu3 %vm231_vm0, %v863_v63  ;;  %v989_v63 = vadd.s32 %v983_v52, %v979_v50 }
  0x6d   : > { %vm991_vm6 = vc.u32 %v989_v63, %v985_v62 }
  0x6e   : > { %v992_v43 = vsel %vm991_vm6, 1, %v1327_v56 }
  0x8e   : > { %v258_v0 = vpop.f32.mrf.mxu0 }
  0x8f   : > { %v293_v1 = vpop.f32.mrf.mxu1 }
  0x90   : > { %v294_v41 = vadd.f32 %v293_v1, %v258_v0  ;;  %v963_v1 = vsel %vm962_vm3, 1, %v1327_v56  ;;  %vm1029_vm3 = vcmask 130048  }
  0x91   : > { %v965_v34 = vadd.s32 %v963_v1, %v961_v61 }
  0x93   : > { %v966_v25 = vadd.s32 %v965_v34, %v955_v32 }
  0x94   : > { %v333_v2 = vpop.f32.mrf.mxu2 }
  0x95   : > { %v342_v53 = vadd.f32 %v333_v2, %v294_v41  ;;  %v932_v2 = vadd.s32 %v930_v60, %v924_v58 }
  0x96   : > { %v1519_v3 = vpop.f32.mrf.mxu3  ;;  %v261_v4 = vpop.f32.mrf.mxu0 }
  0x97   : > { %v296_v5 = vpop.f32.mrf.mxu1  ;;  %v385_v0 = vadd.f32 %v1519_v3, %v342_v53  ;;  %v967_v53 = vadd.s32 %v966_v25, %v957_v44 }
  0x98   : > { %v297_v54 = vadd.f32 %v296_v5, %v261_v4  ;;  %v982_v4 = vmul.u32 52428, %v977_v39  ;;  %v936_v39 = vadd.s32 %v934_v24, %v932_v2 }
  0x99   : > { %v968_v58 = vshrl.u32 %v967_v53, 2 }
  0x9c   : > { %v336_v6 = vpop.f32.mrf.mxu2 }
  0x9d   : > { %v343_v59 = vadd.f32 %v336_v6, %v297_v54  ;;  %v988_v6 = vsel %vm987_vm5, 1, %v1327_v56  ;;  %v986_v56 = vshrl.u32 %v1585_v51, 16 }
  0x9e   : > { %v1521_v7 = vpop.f32.mrf.mxu3  ;;  %v1523_v8 = vpop.f32.mrf.mxu0 }
  0x9f   : > { %v1525_v9 = vpop.f32.mrf.mxu1  ;;  %v386_v5 = vadd.f32 %v1521_v7, %v343_v59  ;;  %v990_v7 = vadd.s32 %v988_v6, %v982_v4 }
  0xa0   : > { %v300_v35 = vadd.f32 %v1525_v9, %v1523_v8  ;;  %v928_v9 = vshrl.u32 %v1571_v37, 16 }
  0xa1   : > { %v994_v49 = vadd.s32 %v992_v43, %v990_v7 }
  0xa3   : > { %v995_v37 = vadd.s32 %v994_v49, %v984_v28  ;;  %v1300_v28 = vld [vmem:[%s1659_s2] ss:$0 sm:$0xff] }
  0xa4   : > { %v1527_v10 = vpop.f32.mrf.mxu2 }
  0xa5   : > { %v996_v61 = vadd.s32 %v995_v37, %v986_v56 }
  0xa6   : > { %v1529_v11 = vpop.f32.mrf.mxu3  ;;  %v1531_v12 = vpop.f32.mrf.mxu0 }
  0xa7   : > { %v1533_v13 = vpop.f32.mrf.mxu1  ;;  %v428_v21 = vadd.f32 %v1531_v12, %v385_v0  ;;  %v344_v12 = vadd.f32 %v1527_v10, %v300_v35  ;;  %v969_v0 = vmul.u32 5, %v968_v58  ;;  %v997_v4 = vshrl.u32 %v996_v61, 2 }
  0xa9   : > { %v471_v41 = vadd.f32 %v1533_v13, %v428_v21  ;;  %v387_v50 = vadd.f32 %v1529_v11, %v344_v12 }
  0xac   : > { %v1535_v15 = vpop.f32.mrf.mxu2 }
  0xad   : > { %v514_v46 = vadd.f32 %v1535_v15, %v471_v41 }
  0xae   : > { %v1537_v16 = vpop.f32.mrf.mxu3  ;;  %v1541_v18 = vpop.f32.mrf.mxu0 }
  0xaf   : > { %v1543_v19 = vpop.f32.mrf.mxu1  ;;  %v429_v3 = vadd.f32 %v1541_v18, %v386_v5  ;;  %v937_v18 = vadd.s32 %v936_v39, %v926_v38  ;;  %v557_v33 = vadd.f32 %v1537_v16, %v514_v46 }
  0xb1   : > { %v472_v47 = vadd.f32 %v1543_v19, %v429_v3  ;;  %v938_v19 = vadd.s32 %v937_v18, %v928_v9 }
  0xb3   : > { %v939_v60 = vshrl.u32 %v938_v19, 2 }
  0xb4   : > { %v1550_v23 = vpop.f32.mrf.mxu2 }
  0xb5   : > { %v515_v10 = vadd.f32 %v1550_v23, %v472_v47 }
  0xb6   : > { %v1555_v26 = vpop.f32.mrf.mxu3  ;;  %v1560_v29 = vpop.f32.mrf.mxu0 }
  0xb7   : > { %v1565_v31 = vpop.f32.mrf.mxu1  ;;  %v430_v15 = vadd.f32 %v1560_v29, %v387_v50  ;;  %v558_v57 = vadd.f32 %v1555_v26, %v515_v10  ;;  %v940_v26 = vmul.u32 5, %v939_v60 }
  0xb9   : > { %v473_v11 = vadd.f32 %v1565_v31, %v430_v15  ;;  %v970_v31 = vsub.s32 %v1546_v20, %v969_v0 }
  0xbb   : > { %vm1003_vm7 = vcmp.ne.s32.totalorder %v970_v31, 0  ;;  %vm1006_vm8 = vcmp.lt.s32.totalorder %v970_v31, 0 }
  0xbc   : > { %v1577_v42 = vpop.f32.mrf.mxu2  ;;  %vm1620_vm11 = vmand %vm1006_vm8, %vm1003_vm7 }
  0xbd   : > { %v516_v16 = vadd.f32 %v1577_v42, %v473_v11  ;;  %v941_v42 = vsub.s32 %v1539_v17, %v940_v26 }
  0xbe   : > { %v1580_v45 = vpop.f32.mrf.mxu3  ;;  %v1583_v48 = vpop.f32.mrf.mxu0 }
  0xbf   : > { %v1588_v55 = vpop.f32.mrf.mxu1  ;;  %v600_v40 = vadd.f32 %v1583_v48, %v557_v33  ;;  %v559_v48 = vadd.f32 %v1580_v45, %v516_v16  ;;  %vm1002_vm9 = vcmp.ne.s32.totalorder %v941_v42, 0  ;;  %vm1005_vm10 = vcmp.lt.s32.totalorder %v941_v42, 0 }
  0xc0   : > { %v1012_v45 = vadd.s32 5, %v970_v31  ;;  %v1011_v17 = vadd.s32 5, %v941_v42  ;;  %vm1624_vm12 = vmand %vm1005_vm10, %vm1002_vm9 }
  0xc1   : > { %v643_v29 = vadd.f32 %v1588_v55, %v600_v40 }
  0xc2   : > { %v1015_v44 = vsel %vm1620_vm11, %v1012_v45, %v970_v31  ;;  %v1014_v47 = vsel %vm1624_vm12, %v1011_v17, %v941_v42 }
  0xc3   : > { %vm1018_vm15 = vcmp.lt.s32.totalorder %v1015_v44, 4  ;;  %vm1017_vm1 = vcmp.lt.s32.totalorder %v1014_v47, 4 }
  0xc4   : > { %v677_v14 = vpop.f32.mrf.mxu2 }
  0xc5   : > { %v686_v51 = vadd.f32 %v677_v14, %v643_v29 }
  0xc6   : > { %v720_v22 = vpop.f32.mrf.mxu3  ;;  %v594_v27 = vpop.f32.mrf.mxu0 }
  0xc7   : > { %v637_v36 = vpop.f32.mrf.mxu1  ;;  %v601_v23 = vadd.f32 %v594_v27, %v558_v57  ;;  %v729_v21 = vadd.f32 %v720_v22, %v686_v51  ;;  %v998_v27 = vmul.u32 5, %v997_v4 }
  0xc9   : > { %v644_v1 = vadd.f32 %v637_v36, %v601_v23  ;;  %v999_v20 = vsub.s32 %v1563_v30, %v998_v27 }
  0xcb   : > { %vm1004_vm13 = vcmp.ne.s32.totalorder %v999_v20, 0  ;;  %vm1007_vm14 = vcmp.lt.s32.totalorder %v999_v20, 0  ;;  %v1013_v9 = vadd.s32 5, %v999_v20 }
  0xcc   : > { %v680_v8 = vpop.f32.mrf.mxu2  ;;  %vm1010_vm0 = vmand %vm1007_vm14, %vm1004_vm13 }
  0xcd   : > { %v687_v5 = vadd.f32 %v680_v8, %v644_v1  ;;  %v1016_v33 = vsel %vm1010_vm0, %v1013_v9, %v999_v20 }
  0xce   : > { %v723_v13 = vpop.f32.mrf.mxu3  ;;  %v597_v52 = vpop.f32.mrf.mxu0  ;;  %vm1019_vm2 = vcmp.lt.s32.totalorder %v1016_v33, 4 }
  0xcf   : > { %v640_v54 = vpop.f32.mrf.mxu1  ;;  %v602_v24 = vadd.f32 %v597_v52, %v559_v48  ;;  %v730_v55 = vadd.f32 %v723_v13, %v687_v5  ;;  %v1328_v52 = vmov 0.0  }
  0xd0   : > { %v1268_v53 = vsel %vm1018_vm15, 1.0, %v1328_v52  ;;  %v1267_v19 = vsel %vm1017_vm1, 1.0, %v1328_v52  ;;  %v1269_v23 = vsel %vm1019_vm2, 1.0, %v1328_v52 }
  0xd1   : > { %v645_v14 = vadd.f32 %v640_v54, %v602_v24 }
  0xd4   : > { %v683_v59 = vpop.f32.mrf.mxu2 }
  0xd5   : > { %v688_v22 = vadd.f32 %v683_v59, %v645_v14 }
  0xd6   : > { %v726_v62 = vpop.f32.mrf.mxu3  ;;  %v763_v63 = vpop.f32.mrf.mxu0 }
  0xd7   : > { %v806_v2 = vpop.f32.mrf.mxu1  ;;  %v772_v32 = vadd.f32 %v763_v63, %v729_v21  ;;  %v731_v30 = vadd.f32 %v726_v62, %v688_v22 }
  0xd9   : > { %v815_v38 = vadd.f32 %v806_v2, %v772_v32 }
  0xdc   : > { %v849_v6 = vpop.f32.mrf.mxu2 }
  0xdd   : > { %v858_v7 = vadd.f32 %v849_v6, %v815_v38 }
  0xde   : > { %v892_v34 = vpop.f32.mrf.mxu3  ;;  %v766_v35 = vpop.f32.mrf.mxu0 }
  0xdf   : > { %v773_v3 = vadd.f32 %v766_v35, %v730_v55  ;;  %v809_v36 = vpop.f32.mrf.mxu1  ;;  %v901_v18 = vadd.f32 %v892_v34, %v858_v7 }
  0xe1   : > { %v816_v41 = vadd.f32 %v809_v36, %v773_v3  ;;  %v908_v15 = vadd.f32 %v1300_v28, %v901_v18 }
  0xe3   : > { %v1026_v58 = vmul.f32 %v1267_v19, %v908_v15 }
  0xe4   : > { %v852_v43 = vpop.f32.mrf.mxu2 }
  0xe5   : > { %v859_v25 = vadd.f32 %v852_v43, %v816_v41  ;;  %v1030_v61 = vsel %vm1029_vm3, %v1026_v58, 0.0 }
  0xe6   : > { %v895_v46 = vpop.f32.mrf.mxu3  ;;  %v769_v8 = vpop.f32.mrf.mxu0 }
  0xe7   : > { %v774_v49 = vadd.f32 %v769_v8, %v731_v30  ;;  %v902_v50 = vadd.f32 %v895_v46, %v859_v25  ;;  %v812_v10 = vpop.f32.mrf.mxu1 }
  0xe9   : > { %v909_v13 = vadd.f32 %v1300_v28, %v902_v50  ;;  %v817_v54 = vadd.f32 %v812_v10, %v774_v49 }
  0xeb   : > { %v1027_v37 = vmul.f32 %v1268_v53, %v909_v13 }
  0xec   : > { %v855_v56 = vpop.f32.mrf.mxu2 }
  0xed   : > { %v860_v57 = vadd.f32 %v855_v56, %v817_v54  ;;  %v1031_v59 = vsel %vm1029_vm3, %v1027_v37, 0.0 }
  0xee   : > { %v898_v40 = vpop.f32.mrf.mxu3  ;;  %v1032_v29 = vadd.f32 %v1031_v59, %v1030_v61 }
  0xef   : > { %v903_v11 = vadd.f32 %v898_v40, %v860_v57 }
  0xf1   : > { %v910_v60 = vadd.f32 %v1300_v28, %v903_v11 }
  0xf3   : > { %v1028_v16 = vmul.f32 %v1269_v23, %v910_v60 }
  0xf5   : > { %v1034_v62 = vsel %vm1033_vm4, %v1028_v16, 0.0 }
  0xf6   : > { %v1035_v63 = vadd.f32 %v1034_v62, %v1032_v29 }
  0xf8   : > { %v1036_v0 = vrot.slane %v1035_v63, 4 }
  0xfa   : > { %v1037_v51 = vadd.f32 %v1036_v0, %v1035_v63 }
  0xfc   : > { %v1038_v1 = vrot.slane %v1037_v51, 2 }
  0xfe   : > { %v1039_v2 = vadd.f32 %v1038_v1, %v1037_v51 }
 0x100   : > { %v1040_v26 = vrot.slane %v1039_v2, 1 }
 0x102   : > { %v1041_v4 = vadd.f32 %v1040_v26, %v1039_v2 }
 0x104   : > { %v1042_v48 = vmul.f32 0.0625, %v1041_v4 }
 0x106   : > { %v1043_v5 = vsub.f32 %v908_v15, %v1042_v48  ;;  %v1044_v31 = vsub.f32 %v909_v13, %v1042_v48  ;;  %v1045_v21 = vsub.f32 %v910_v60, %v1042_v48 }
 0x108   : > { %v1046_v24 = vmul.f32 %v1267_v19, %v1043_v5  ;;  %v1047_v6 = vmul.f32 %v1268_v53, %v1044_v31  ;;  %v1048_v42 = vmul.f32 %v1269_v23, %v1045_v21 }
 0x10a   : > { %v1049_v27 = vmul.f32 %v1046_v24, %v1046_v24  ;;  %v1050_v55 = vmul.f32 %v1047_v6, %v1047_v6  ;;  %v1051_v32 = vmul.f32 %v1048_v42, %v1048_v42 }
 0x10c   : > { %v1052_v34 = vsel %vm1029_vm3, %v1049_v27, 0.0  ;;  %v1053_v35 = vsel %vm1029_vm3, %v1050_v55, 0.0  ;;  %v1055_v3 = vsel %vm1033_vm4, %v1051_v32, 0.0 }
 0x10d   : > { %v1054_v14 = vadd.f32 %v1053_v35, %v1052_v34 }
 0x10f   : > { %v1056_v36 = vadd.f32 %v1055_v3, %v1054_v14 }
 0x111   : > { %v1057_v45 = vrot.slane %v1056_v36, 4 }
 0x113   : > { %v1058_v20 = vadd.f32 %v1057_v45, %v1056_v36 }
 0x115   : > { %v1059_v22 = vrot.slane %v1058_v20, 2 }
 0x117   : > { %v1060_v38 = vadd.f32 %v1059_v22, %v1058_v20 }
 0x119   : > { %v1061_v39 = vrot.slane %v1060_v38, 1 }
 0x11b   : > { %v1062_v17 = vadd.f32 %v1061_v39, %v1060_v38 }
 0x11d   : > { %v1063_v7 = vmul.f32 0.0625, %v1062_v17 }
 0x11f   : > { %v1064_v12 = vadd.f32 1e-05, %v1063_v7 }
 0x121   : > { %1301 = vrsqrt.f32 %v1064_v12  ;;  %vm1071_vm6 = vweird.f32 %v1064_v12 }
 0x127   : > { %v1302_v41 = vpop.eup %1301 }
 0x128   : > { %v1066_v43 = vmul.f32 %v1302_v41, %v1064_v12  ;;  %vm1072_vm5 = vweird.f32 %v1302_v41 }
 0x129   : > { %vm1073_vm7 = vmor %vm1071_vm6, %vm1072_vm5 }
 0x12a   : > { %v1067_v44 = vmul.f32 %v1302_v41, %v1066_v43 }
 0x12c   : > { %v1068_v30 = vmul.f32 0.5, %v1067_v44 }
 0x12e   : > { %v1069_v25 = vsub.f32 1.5, %v1068_v30 }
 0x130   : > { %v1070_v46 = vmul.f32 %v1302_v41, %v1069_v25 }
 0x132   : > { %v1074_v47 = vsel %vm1073_vm7, %v1302_v41, %v1070_v46 }
 0x133   : > { %v1075_v8 = vmul.f32 %v1074_v47, %v1046_v24  ;;  %v1076_v9 = vmul.f32 %v1074_v47, %v1047_v6  ;;  %v1077_v18 = vmul.f32 %v1074_v47, %v1048_v42 }
 0x135   : > { %vm1078_vm8 = vcmp.ge.f32.partialorder %v1075_v8, 0.0  ;;  %vm1079_vm9 = vcmp.ge.f32.partialorder %v1076_v9, 0.0  ;;  %vm1080_vm10 = vcmp.ge.f32.partialorder %v1077_v18, 0.0  ;;  %v1081_v28 = vmul.f32 0.2, %v1075_v8 }
 0x136   : > { %v1082_v49 = vmul.f32 0.2, %v1076_v9  ;;  %v1083_v50 = vmul.f32 0.2, %v1077_v18 }
 0x137   : > { %v1084_v10 = vsel %vm1078_vm8, %v1075_v8, %v1081_v28 }
 0x138   : > { %v1085_v13 = vsel %vm1079_vm9, %v1076_v9, %v1082_v49  ;;  %v1086_v52 = vsel %vm1080_vm10, %v1077_v18, %v1083_v50  ;;  %1087 = vst.msk [vmem:[%s221_s7] sm:$0xff] %vm1029_vm3, %v1084_v10 }
 0x139   : > { %1088 = vst.msk [vmem:[%s221_s7 + $0x8] sm:$0xff] %vm1029_vm3, %v1085_v13 }
 0x13a   : > { %1089 = vst.msk [vmem:[%s221_s7 + $0x10] sm:$0xf] %vm1033_vm4, %v1086_v52 }
 0x13b PF: > { %s13_s14 = sadd.s32 1, %s1325_s14   ;;  %s1665_s12 = smov %s1321_s13 }
 0x13c   : > { %p10_p5 = scmp.ge.s32.totalorder %s13_s14, 4   ;;  %s1666_s13 = smov %s1668_s15 }
 0x13e   :  { %12 = sbr.rel (!%p10_p5) target bundleno = 2 (0x2), region = 83 }

// kernel: _lambda_.7
= control target key start
LH: loop header
LB: loop body
LE: loop exit
PB: predicated region body
PF: predicated region fallthrough
CT: control target
= control target key end

     0   :  { %s1117_s12 = smov 0   ;;  %s1119_s13 = smov 0   ;;  %s1415_s0 = inlined_call_operand.vmem [shape: f32[2,30,32], index: 0, kind: input, shape index: {}]   ;;  %s1416_s1 = inlined_call_operand.vmem [shape: f32[16,32,8], index: 1, kind: input, shape index: {}]   ;;  %s1417_s2 = inlined_call_operand.vmem [shape: f32[1,8], index: 2, kind: input, shape index: {}]   ;;  %s1418_s3 = inlined_call_operand.vmem [shape: f32[2,10,8], index: 3, kind: output, shape index: {}]  }
   0x1   :  { %s1121_s14 = smov 0  }
   0x2 LB: > { %s25_s15 = sadd.s32 1, %s1091_s13  ;;  %p947_p0 = scmp.ge.s32.totalorder %s1095_s14, 1  ;;  %s1095_s14 = sphi %s1121_s14, %s13_s14   ;;  %s1091_s13 = sphi %s1119_s13, %s1420_s13   ;;  %s1087_s12 = sphi %s1117_s12, %s1419_s12  }
   0x3   : > { %p27_p1 = scmp.ge.s32.totalorder %s25_s15, 2  ;;  %p168_p2 = scmp.lt.s32.totalorder %s1095_s14, 3 }
   0x5   : > { %s1422_s15 = smov (%p27_p1, %s25_s15), 0  ;;  %p169_p3 = pnand %p947_p0, %p168_p2 }
   0x6   : > { %p202_p4 = scmp.lt.s32.totalorder (!%p169_p3), %s1087_s12, 1 }
   0x7   : > { %172 = sbr.rel (%p169_p3) target bundleno = 217 (0xd9), region = 32 }
   0xc   : > { %v955_v0 = vld [vmem:[%s1416_s1 + $0x38] sm:$0xff]  ;;  %v954_v2 = vld [vmem:[%s1416_s1 + $0x30] sm:$0xff]  ;;  %v953_v6 = vld [vmem:[%s1416_s1 + $0x28] sm:$0xff]  ;;  %s1424_s12 = smov (!%p202_p4, %s1087_s12), 1  ;;  %vm235_vm0 = vcmask 261120   ;;  %vm832_vm1 = vcmask 64512  }
   0xd   : > { %v963_v1 = vld [vmem:[%s1416_s1 + $0x58] sm:$0xff]  ;;  %254 = vmatpush.msra.mxu0 %v955_v0  ;;  %v962_v4 = vld [vmem:[%s1416_s1 + $0x50] sm:$0xff]  ;;  %v961_v8 = vld [vmem:[%s1416_s1 + $0x48] sm:$0xff]  ;;  %s1046_s21 = sshll.u32 %s1424_s12, 5  ;;  %vm834_vm2 = vcmask 58368  }
   0xe   : > { %319 = vmatpush.msra.mxu2 %v963_v1  ;;  %v227_v3 = vld [vmem:[%s1416_s1 + $0x18] sm:$0xff]  ;;  %v226_v7 = vld [vmem:[%s1416_s1 + $0x10] sm:$0xff]  ;;  %v225_v10 = vld [vmem:[%s1416_s1 + $0x8] sm:$0xff]  ;;  %s1183_s24 = scalar_lea.vmem %s1415_s0, %s1046_s21 }
   0xf   : > { %v969_v5 = vld [vmem:[%s1416_s1 + $0x78] sm:$0xff]  ;;  %283 = vmatpush.msra.mxu1 %v227_v3  ;;  %255 = vmatpush.msra.mxu0 %v954_v2  ;;  %v968_v9 = vld [vmem:[%s1416_s1 + $0x70] sm:$0xff]  ;;  %v952_v11 = vld [vmem:[%s1416_s1 + $0x20] sm:$0xff] }
  0x10   : > { %357 = vmatpush.msra.mxu3 %v969_v5  ;;  %320 = vmatpush.msra.mxu2 %v962_v4  ;;  %v960_v12 = vld [vmem:[%s1416_s1 + $0x40] sm:$0xff]  ;;  %v967_v13 = vld [vmem:[%s1416_s1 + $0x68] sm:$0xff]  ;;  %v987_v14 = vld [vmem:[%s1416_s1 + $0xd8] sm:$0xff] }
  0x11   : > { %284 = vmatpush.msra.mxu1 %v226_v7  ;;  %256 = vmatpush.msra.mxu0 %v953_v6  ;;  %v228_v15 = vld [vmem:[%s1183_s24 + $0x1] sm:$0xff]  ;;  %v975_v21 = vld [vmem:[%s1416_s1 + $0x98] sm:$0xff]  ;;  %v986_v24 = vld [vmem:[%s1416_s1 + $0xd0] sm:$0xff] }
  0x12   : > { %358 = vmatpush.msra.mxu3 %v968_v9  ;;  %321 = vmatpush.msra.mxu2 %v961_v8  ;;  %v294_v16 = vld [vmem:[%s1183_s24 + $0x2] sm:$0xff]  ;;  %v993_v22 = vld [vmem:[%s1416_s1 + $0xf8] sm:$0xff]  ;;  %v974_v25 = vld [vmem:[%s1416_s1 + $0x90] sm:$0xff] }
  0x13   : > { %285 = vmatpush.msra.mxu1 %v225_v10  ;;  %v224_v17 = vld [vmem:[%s1416_s1] sm:$0xff]  ;;  %257 = vmatpush.msra.mxu0 %v952_v11  ;;  %v981_v23 = vld [vmem:[%s1416_s1 + $0xb8] sm:$0xff]  ;;  %v992_v26 = vld [vmem:[%s1416_s1 + $0xf0] sm:$0xff] }
  0x14   : > { %359 = vmatpush.msra.mxu3 %v967_v13  ;;  %322 = vmatpush.msra.mxu2 %v960_v12  ;;  %v966_v18 = vld [vmem:[%s1416_s1 + $0x60] sm:$0xff]  ;;  %v980_v27 = vld [vmem:[%s1416_s1 + $0xb0] sm:$0xff]  ;;  %v985_v28 = vld [vmem:[%s1416_s1 + $0xc8] sm:$0xff] }
  0x15   : > { %v222_v19 = vld [vmem:[%s1183_s24] sm:$0xff]  ;;  %956 = vmatmul.msk.f32.vlgmr.msra.gmra.mxu0 %vm235_vm0, %v228_v15  ;;  %964 = vmatmul.msk.f32.vlgmr.msra.gmra.mxu2 %vm235_vm0, %v294_v16  ;;  %v973_v29 = vld [vmem:[%s1416_s1 + $0x88] sm:$0xff]  ;;  %v1011_v40 = vld [vmem:[%s1416_s1 + $0x158] sm:$0xff] }
  0x16   : > { %v332_v20 = vld [vmem:[%s1183_s24 + $0x3] sm:$0xff]  ;;  %471 = vmatpush.msrb.mxu2 %v987_v14  ;;  %286 = vmatpush.msra.mxu1 %v224_v17  ;;  %v333_v36 = vld [vmem:[%s1183_s24 + $0xb] sm:$0x3]  ;;  %v999_v41 = vld [vmem:[%s1416_s1 + $0x118] sm:$0xff] }
  0x17   : > { %360 = vmatpush.msra.mxu3 %v966_v18  ;;  %958 = vmatmul.msk.f32.vlgmr.msra.gmra.mxu1 %vm235_vm0, %v222_v19  ;;  %v229_v30 = vld [vmem:[%s1183_s24 + $0x9] sm:$0x3]  ;;  %v984_v35 = vld [vmem:[%s1416_s1 + $0xc0] sm:$0xff]  ;;  %v1017_v42 = vld [vmem:[%s1416_s1 + $0x178] sm:$0xff] }
  0x18   : > { %970 = vmatmul.msk.f32.vlgmr.msra.gmra.mxu3 %vm235_vm0, %v332_v20  ;;  %395 = vmatpush.msrb.mxu0 %v975_v21  ;;  %v295_v31 = vld [vmem:[%s1183_s24 + $0xa] sm:$0x3]  ;;  %v223_v34 = vld [vmem:[%s1183_s24 + $0x8] sm:$0x3]  ;;  %v972_v37 = vld [vmem:[%s1416_s1 + $0x80] sm:$0xff] }
  0x19   : > { %509 = vmatpush.msrb.mxu3 %v993_v22  ;;  %433 = vmatpush.msrb.mxu1 %v981_v23  ;;  %v991_v32 = vld [vmem:[%s1416_s1 + $0xe8] sm:$0xff]  ;;  %v990_v38 = vld [vmem:[%s1416_s1 + $0xe0] sm:$0xff]  ;;  %v1005_v43 = vld [vmem:[%s1416_s1 + $0x138] sm:$0xff] }
  0x1a   : > { %472 = vmatpush.msrb.mxu2 %v986_v24  ;;  %396 = vmatpush.msrb.mxu0 %v974_v25  ;;  %v979_v33 = vld [vmem:[%s1416_s1 + $0xa8] sm:$0xff]  ;;  %v978_v39 = vld [vmem:[%s1416_s1 + $0xa0] sm:$0xff]  ;;  %v1010_v44 = vld [vmem:[%s1416_s1 + $0x150] sm:$0xff] }
  0x1b   : > { %510 = vmatpush.msrb.mxu3 %v992_v26  ;;  %434 = vmatpush.msrb.mxu1 %v980_v27  ;;  %v998_v45 = vld [vmem:[%s1416_s1 + $0x110] sm:$0xff]  ;;  %v370_v46 = vld [vmem:[%s1183_s24 + $0x5] sm:$0xff]  ;;  %v1035_v60 = vld [vmem:[%s1416_s1 + $0x1d8] sm:$0xff] }
  0x1c   : > { %473 = vmatpush.msrb.mxu2 %v985_v28  ;;  %397 = vmatpush.msrb.mxu0 %v973_v29  ;;  %v446_v47 = vld [vmem:[%s1183_s24 + $0x7] sm:$0xff]  ;;  %v1016_v48 = vld [vmem:[%s1416_s1 + $0x170] sm:$0xff]  ;;  %v1023_v61 = vld [vmem:[%s1416_s1 + $0x198] sm:$0xff] }
  0x1d   : > { %957 = vmatmul.msk.f32.gmra.mxu0 %vm235_vm0, %v229_v30  ;;  %965 = vmatmul.msk.f32.gmra.mxu2 %vm235_vm0, %v295_v31  ;;  %v1004_v49 = vld [vmem:[%s1416_s1 + $0x130] sm:$0xff]  ;;  %v408_v50 = vld [vmem:[%s1183_s24 + $0x6] sm:$0xff]  ;;  %v1041_v0 = vld [vmem:[%s1416_s1 + $0x1f8] sm:$0xff] }
  0x1e   : > { %511 = vmatpush.msrb.mxu3 %v991_v32  ;;  %435 = vmatpush.msrb.mxu1 %v979_v33  ;;  %v1009_v51 = vld [vmem:[%s1416_s1 + $0x148] sm:$0xff]  ;;  %v1008_v56 = vld [vmem:[%s1416_s1 + $0x140] sm:$0xff]  ;;  %v1029_v1 = vld [vmem:[%s1416_s1 + $0x1b8] sm:$0xff] }
  0x1f   : > { %959 = vmatmul.msk.f32.gmra.mxu1 %vm235_vm0, %v223_v34  ;;  %474 = vmatpush.msrb.mxu2 %v984_v35  ;;  %v484_v52 = vld [vmem:[%s1183_s24 + $0x8] sm:$0xff]  ;;  %v996_v57 = vld [vmem:[%s1416_s1 + $0x100] sm:$0xff]  ;;  %v1034_v3 = vld [vmem:[%s1416_s1 + $0x1d0] sm:$0xff] }
  0x20   : > { %971 = vmatmul.msk.f32.gmra.mxu3 %vm235_vm0, %v333_v36  ;;  %398 = vmatpush.msrb.mxu0 %v972_v37  ;;  %v997_v53 = vld [vmem:[%s1416_s1 + $0x108] sm:$0xff]  ;;  %v1014_v58 = vld [vmem:[%s1416_s1 + $0x160] sm:$0xff]  ;;  %v485_v4 = vld [vmem:[%s1183_s24 + $0x10] sm:$0x3] }
  0x21   : > { %512 = vmatpush.msrb.mxu3 %v990_v38  ;;  %436 = vmatpush.msrb.mxu1 %v978_v39  ;;  %v1015_v54 = vld [vmem:[%s1416_s1 + $0x168] sm:$0xff]  ;;  %v1002_v59 = vld [vmem:[%s1416_s1 + $0x120] sm:$0xff]  ;;  %v1022_v5 = vld [vmem:[%s1416_s1 + $0x190] sm:$0xff] }
  0x22   : > { %623 = vmatpush.msra.mxu2 %v1011_v40  ;;  %547 = vmatpush.msra.mxu0 %v999_v41  ;;  %v1003_v55 = vld [vmem:[%s1416_s1 + $0x128] sm:$0xff]  ;;  %v1040_v6 = vld [vmem:[%s1416_s1 + $0x1f0] sm:$0xff]  ;;  %v1032_v12 = vld [vmem:[%s1416_s1 + $0x1c0] sm:$0xff] }
  0x23   : > { %661 = vmatpush.msra.mxu3 %v1017_v42  ;;  %585 = vmatpush.msra.mxu1 %v1005_v43  ;;  %v371_v62 = vld [vmem:[%s1183_s24 + $0xd] sm:$0x3]  ;;  %v447_v63 = vld [vmem:[%s1183_s24 + $0xf] sm:$0x3]  ;;  %v1020_v13 = vld [vmem:[%s1416_s1 + $0x180] sm:$0xff] }
  0x24   : > { %624 = vmatpush.msra.mxu2 %v1010_v44  ;;  %548 = vmatpush.msra.mxu0 %v998_v45  ;;  %v409_v2 = vld [vmem:[%s1183_s24 + $0xe] sm:$0x3]  ;;  %v1028_v7 = vld [vmem:[%s1416_s1 + $0x1b0] sm:$0xff]  ;;  %v1038_v16 = vld [vmem:[%s1416_s1 + $0x1e0] sm:$0xff] }
  0x25   : > { %976 = vmatmul.msk.f32.vlgmr.msrb.gmra.mxu0 %vm235_vm0, %v370_v46  ;;  %988 = vmatmul.msk.f32.vlgmr.msrb.gmra.mxu2 %vm235_vm0, %v446_v47  ;;  %v1033_v8 = vld [vmem:[%s1416_s1 + $0x1c8] sm:$0xff]  ;;  %v1026_v17 = vld [vmem:[%s1416_s1 + $0x1a0] sm:$0xff]  ;;  %v523_v20 = vld [vmem:[%s1183_s24 + $0x12] sm:$0x3] }
  0x26   : > { %662 = vmatpush.msra.mxu3 %v1016_v48  ;;  %586 = vmatpush.msra.mxu1 %v1004_v49  ;;  %v1021_v9 = vld [vmem:[%s1416_s1 + $0x188] sm:$0xff]  ;;  %v599_v21 = vld [vmem:[%s1183_s24 + $0x14] sm:$0x3]  ;;  %v675_v28 = vld [vmem:[%s1183_s24 + $0x17] sm:$0x3] }
  0x27   : > { %982 = vmatmul.msk.f32.vlgmr.msrb.gmra.mxu1 %vm235_vm0, %v408_v50  ;;  %625 = vmatpush.msra.mxu2 %v1009_v51  ;;  %v1039_v10 = vld [vmem:[%s1416_s1 + $0x1e8] sm:$0xff]  ;;  %v561_v22 = vld [vmem:[%s1183_s24 + $0x13] sm:$0x3]  ;;  %v637_v23 = vld [vmem:[%s1183_s24 + $0x15] sm:$0x3] }
  0x28   : > { %994 = vmatmul.msk.f32.vlgmr.msrb.gmra.mxu3 %vm235_vm0, %v484_v52  ;;  %549 = vmatpush.msra.mxu0 %v997_v53  ;;  %v1027_v11 = vld [vmem:[%s1416_s1 + $0x1a8] sm:$0xff]  ;;  %v750_v25 = vld [vmem:[%s1183_s24 + $0x11] sm:$0xff]  ;;  %v751_v29 = vld [vmem:[%s1183_s24 + $0x19] sm:$0x3] }
  0x29   : > { %663 = vmatpush.msra.mxu3 %v1015_v54  ;;  %587 = vmatpush.msra.mxu1 %v1003_v55  ;;  %v522_v14 = vld [vmem:[%s1183_s24 + $0xa] sm:$0xff]  ;;  %v788_v27 = vld [vmem:[%s1183_s24 + $0x12] sm:$0xff]  ;;  %v789_v31 = vld [vmem:[%s1183_s24 + $0x1a] sm:$0x3] }
  0x2a   : > { %626 = vmatpush.msra.mxu2 %v1008_v56  ;;  %550 = vmatpush.msra.mxu0 %v996_v57  ;;  %v598_v15 = vld [vmem:[%s1183_s24 + $0xc] sm:$0xff]  ;;  %v713_v30 = vld [vmem:[%s1183_s24 + $0x18] sm:$0x3] }
  0x2b   : > { %664 = vmatpush.msra.mxu3 %v1014_v58  ;;  %588 = vmatpush.msra.mxu1 %v1002_v59  ;;  %v560_v18 = vld [vmem:[%s1183_s24 + $0xb] sm:$0xff] }
  0x2c   : > { %775 = vmatpush.msrb.mxu2 %v1035_v60  ;;  %699 = vmatpush.msrb.mxu0 %v1023_v61  ;;  %v636_v19 = vld [vmem:[%s1183_s24 + $0xd] sm:$0xff] }
  0x2d   : > { %977 = vmatmul.msk.f32.gmra.mxu0 %vm235_vm0, %v371_v62  ;;  %989 = vmatmul.msk.f32.gmra.mxu2 %vm235_vm0, %v447_v63  ;;  %v674_v24 = vld [vmem:[%s1183_s24 + $0xf] sm:$0xff] }
  0x2e   : > { %813 = vmatpush.msrb.mxu3 %v1041_v0  ;;  %737 = vmatpush.msrb.mxu1 %v1029_v1  ;;  %v712_v26 = vld [vmem:[%s1183_s24 + $0x10] sm:$0xff]  ;;  %s1047_s24 = sshll.u32 %s1424_s12, 4 }
  0x2f   : > { %983 = vmatmul.msk.f32.gmra.mxu1 %vm235_vm0, %v409_v2  ;;  %776 = vmatpush.msrb.mxu2 %v1034_v3  ;;  %s221_s18 = scalar_lea.vmem %s1418_s3, %s1047_s24 }
  0x30   : > { %995 = vmatmul.msk.f32.gmra.mxu3 %vm235_vm0, %v485_v4  ;;  %700 = vmatpush.msrb.mxu0 %v1022_v5 }
  0x31   : > { %814 = vmatpush.msrb.mxu3 %v1040_v6  ;;  %738 = vmatpush.msrb.mxu1 %v1028_v7 }
  0x32   : > { %777 = vmatpush.msrb.mxu2 %v1033_v8  ;;  %701 = vmatpush.msrb.mxu0 %v1021_v9 }
  0x33   : > { %815 = vmatpush.msrb.mxu3 %v1039_v10  ;;  %739 = vmatpush.msrb.mxu1 %v1027_v11 }
  0x34   : > { %778 = vmatpush.msrb.mxu2 %v1032_v12  ;;  %702 = vmatpush.msrb.mxu0 %v1020_v13 }
  0x35   : > { %1000 = vmatmul.msk.f32.vlgmr.msra.gmra.mxu0 %vm235_vm0, %v522_v14  ;;  %1012 = vmatmul.msk.f32.vlgmr.msra.gmra.mxu2 %vm235_vm0, %v598_v15 }
  0x36   : > { %816 = vmatpush.msrb.mxu3 %v1038_v16  ;;  %740 = vmatpush.msrb.mxu1 %v1026_v17 }
  0x37   : > { %1006 = vmatmul.msk.f32.vlgmr.msra.gmra.mxu1 %vm235_vm0, %v560_v18 }
  0x38   : > { %1018 = vmatmul.msk.f32.vlgmr.msra.gmra.mxu3 %vm235_vm0, %v636_v19 }
  0x3d   : > { %1001 = vmatmul.msk.f32.gmra.mxu0 %vm235_vm0, %v523_v20  ;;  %1013 = vmatmul.msk.f32.gmra.mxu2 %vm235_vm0, %v599_v21  ;;  %v1072_v21 = vld [vmem:[%s1417_s2] ss:$0 sm:$0xff] }
  0x3f   : > { %1007 = vmatmul.msk.f32.gmra.mxu1 %vm235_vm0, %v561_v22 }
  0x40   : > { %1019 = vmatmul.msk.f32.gmra.mxu3 %vm235_vm0, %v637_v23 }
  0x45   : > { %1024 = vmatmul.msk.f32.vlgmr.msrb.gmra.mxu0 %vm235_vm0, %v674_v24  ;;  %1036 = vmatmul.msk.f32.vlgmr.msrb.gmra.mxu2 %vm235_vm0, %v750_v25 }
  0x47   : > { %1030 = vmatmul.msk.f32.vlgmr.msrb.gmra.mxu1 %vm235_vm0, %v712_v26 }
  0x48   : > { %1042 = vmatmul.msk.f32.vlgmr.msrb.gmra.mxu3 %vm235_vm0, %v788_v27 }
  0x4d   : > { %1025 = vmatmul.msk.f32.gmra.mxu0 %vm235_vm0, %v675_v28  ;;  %1037 = vmatmul.msk.f32.gmra.mxu2 %vm235_vm0, %v751_v29 }
  0x4f   : > { %1031 = vmatmul.msk.f32.gmra.mxu1 %vm235_vm0, %v713_v30 }
  0x50   : > { %1043 = vmatmul.msk.f32.gmra.mxu3 %vm235_vm0, %v789_v31 }
  0x92   : > { %v259_v32 = vpop.f32.mrf.mxu0 }
  0x94   : > { %v288_v33 = vpop.f32.mrf.mxu1 }
  0x95   : > { %v289_v40 = vadd.f32 %v288_v33, %v259_v32 }
  0x98   : > { %v324_v34 = vpop.f32.mrf.mxu2 }
  0x99   : > { %v330_v43 = vadd.f32 %v324_v34, %v289_v40 }
  0x9a   : > { %v262_v35 = vpop.f32.mrf.mxu0 }
  0x9b   : > { %v362_v36 = vpop.f32.mrf.mxu3 }
  0x9c   : > { %v291_v37 = vpop.f32.mrf.mxu1  ;;  %v368_v45 = vadd.f32 %v362_v36, %v330_v43 }
  0x9d   : > { %v292_v47 = vadd.f32 %v291_v37, %v262_v35 }
  0xa0   : > { %v327_v38 = vpop.f32.mrf.mxu2 }
  0xa1   : > { %v331_v51 = vadd.f32 %v327_v38, %v292_v47 }
  0xa2   : > { %v400_v39 = vpop.f32.mrf.mxu0 }
  0xa3   : > { %v365_v41 = vpop.f32.mrf.mxu3  ;;  %v406_v48 = vadd.f32 %v400_v39, %v368_v45 }
  0xa4   : > { %v438_v42 = vpop.f32.mrf.mxu1  ;;  %v369_v54 = vadd.f32 %v365_v41, %v331_v51 }
  0xa5   : > { %v444_v52 = vadd.f32 %v438_v42, %v406_v48 }
  0xa8   : > { %v476_v44 = vpop.f32.mrf.mxu2 }
  0xa9   : > { %v482_v55 = vadd.f32 %v476_v44, %v444_v52 }
  0xaa   : > { %v403_v46 = vpop.f32.mrf.mxu0 }
  0xab   : > { %v514_v49 = vpop.f32.mrf.mxu3  ;;  %v407_v57 = vadd.f32 %v403_v46, %v369_v54 }
  0xac   : > { %v441_v50 = vpop.f32.mrf.mxu1  ;;  %v520_v60 = vadd.f32 %v514_v49, %v482_v55 }
  0xad   : > { %v445_v61 = vadd.f32 %v441_v50, %v407_v57 }
  0xb0   : > { %v479_v53 = vpop.f32.mrf.mxu2 }
  0xb1   : > { %v483_v0 = vadd.f32 %v479_v53, %v445_v61 }
  0xb2   : > { %v552_v56 = vpop.f32.mrf.mxu0 }
  0xb3   : > { %v517_v58 = vpop.f32.mrf.mxu3  ;;  %v558_v62 = vadd.f32 %v552_v56, %v520_v60 }
  0xb4   : > { %v590_v59 = vpop.f32.mrf.mxu1  ;;  %v521_v5 = vadd.f32 %v517_v58, %v483_v0 }
  0xb5   : > { %v596_v2 = vadd.f32 %v590_v59, %v558_v62 }
  0xb8   : > { %v628_v63 = vpop.f32.mrf.mxu2 }
  0xb9   : > { %v634_v6 = vadd.f32 %v628_v63, %v596_v2 }
  0xba   : > { %v555_v1 = vpop.f32.mrf.mxu0 }
  0xbb   : > { %v666_v3 = vpop.f32.mrf.mxu3  ;;  %v559_v7 = vadd.f32 %v555_v1, %v521_v5 }
  0xbc   : > { %v593_v4 = vpop.f32.mrf.mxu1  ;;  %v672_v9 = vadd.f32 %v666_v3, %v634_v6 }
  0xbd   : > { %v597_v11 = vadd.f32 %v593_v4, %v559_v7 }
  0xc0   : > { %v631_v8 = vpop.f32.mrf.mxu2 }
  0xc1   : > { %v635_v15 = vadd.f32 %v631_v8, %v597_v11 }
  0xc2   : > { %v704_v10 = vpop.f32.mrf.mxu0 }
  0xc3   : > { %v669_v12 = vpop.f32.mrf.mxu3  ;;  %v710_v13 = vadd.f32 %v704_v10, %v672_v9 }
  0xc4   : > { %v742_v14 = vpop.f32.mrf.mxu1  ;;  %v673_v18 = vadd.f32 %v669_v12, %v635_v15 }
  0xc5   : > { %v748_v16 = vadd.f32 %v742_v14, %v710_v13 }
  0xc8   : > { %v780_v17 = vpop.f32.mrf.mxu2 }
  0xc9   : > { %v786_v19 = vadd.f32 %v780_v17, %v748_v16 }
  0xca   : > { %v707_v20 = vpop.f32.mrf.mxu0 }
  0xcb   : > { %v711_v22 = vadd.f32 %v707_v20, %v673_v18  ;;  %v818_v23 = vpop.f32.mrf.mxu3 }
  0xcc   : > { %v824_v24 = vadd.f32 %v818_v23, %v786_v19  ;;  %v745_v25 = vpop.f32.mrf.mxu1 }
  0xcd   : > { %v749_v27 = vadd.f32 %v745_v25, %v711_v22 }
  0xce   : > { %v830_v26 = vadd.f32 %v1072_v21, %v824_v24 }
  0xd0   : > { %833 = vst.msk [vmem:[%s221_s18] sm:$0xff] %vm832_vm1, %v830_v26  ;;  %v783_v28 = vpop.f32.mrf.mxu2 }
  0xd1   : > { %v787_v29 = vadd.f32 %v783_v28, %v749_v27 }
  0xd3   : > { %v821_v30 = vpop.f32.mrf.mxu3 }
  0xd4   : > { %v825_v31 = vadd.f32 %v821_v30, %v787_v29 }
  0xd6   : > { %v831_v32 = vadd.f32 %v1072_v21, %v825_v31 }
  0xd8   : > { %835 = vst.msk [vmem:[%s221_s18 + $0x8] sm:$0x3] %vm834_vm2, %v831_v32 }
  0xd9 PF: > { %s13_s14 = sadd.s32 1, %s1095_s14   ;;  %s1419_s12 = smov %s1091_s13 }
  0xda   : > { %p10_p5 = scmp.ge.s32.totalorder %s13_s14, 4   ;;  %s1420_s13 = smov %s1422_s15 }
  0xdc   :  { %12 = sbr.rel (!%p10_p5) target bundleno = 2 (0x2), region = 83 }

// kernel: _lambda_.6
= control target key start
LH: loop header
LB: loop body
LE: loop exit
PB: predicated region body
PF: predicated region fallthrough
CT: control target
= control target key end

     0   :  { %s1380_s12 = smov 0   ;;  %s1382_s13 = smov 0   ;;  %s1730_s0 = inlined_call_operand.vmem [shape: f32[2,42,16], index: 0, kind: input, shape index: {}]   ;;  %s1731_s1 = inlined_call_operand.vmem [shape: f32[16,16,32], index: 1, kind: input, shape index: {}]   ;;  %s1732_s2 = inlined_call_operand.vmem [shape: f32[1,32], index: 2, kind: input, shape index: {}]   ;;  %s1733_s3 = inlined_call_operand.vmem [shape: f32[2,18,32], index: 3, kind: output, shape index: {}]  }
   0x1   :  { %s1384_s14 = smov 0  }
   0x2 LB: > { %s25_s15 = sadd.s32 1, %s1352_s13  ;;  %p1217_p0 = scmp.ge.s32.totalorder %s1356_s14, 1  ;;  %s1356_s14 = sphi %s1384_s14, %s13_s14   ;;  %s1352_s13 = sphi %s1382_s13, %s1739_s13   ;;  %s1348_s12 = sphi %s1380_s12, %s1738_s12  }
   0x3   : > { %p27_p1 = scmp.ge.s32.totalorder %s25_s15, 2  ;;  %p168_p2 = scmp.lt.s32.totalorder %s1356_s14, 3 }
   0x5   : > { %s1741_s15 = smov (%p27_p1, %s25_s15), 0  ;;  %p169_p3 = pnand %p1217_p0, %p168_p2 }
   0x6   : > { %p202_p4 = scmp.lt.s32.totalorder (!%p169_p3), %s1348_s12, 1 }
   0x7   : > { %172 = sbr.rel (%p169_p3) target bundleno = 318 (0x13e), region = 32 }
   0xc   : > { %v1221_v0 = vld [vmem:[%s1731_s1 + $0x18] sm:$0xff]  ;;  %v1229_v1 = vld [vmem:[%s1731_s1 + $0x28] sm:$0xff]  ;;  %v1220_v2 = vld [vmem:[%s1731_s1 + $0x10] sm:$0xff]  ;;  %s1743_s12 = smov (!%p202_p4, %s1348_s12), 1  ;;  %vm233_vm0 = vcmask 130048  }
   0xd   : > { %257 = vmatpush.msra.mxu0 %v1221_v0  ;;  %333 = vmatpush.msra.mxu2 %v1229_v1  ;;  %v226_v3 = vld [vmem:[%s1731_s1 + $0x8] sm:$0xff]  ;;  %v1228_v4 = vld [vmem:[%s1731_s1 + $0x20] sm:$0xff]  ;;  %v1234_v5 = vld [vmem:[%s1731_s1 + $0x38] sm:$0xff]  ;;  %s1303_s17 = smul.u32 48, %s1743_s12 }
   0xe   : > { %292 = vmatpush.msra.mxu1 %v226_v3  ;;  %377 = vmatpush.msra.mxu3 %v1234_v5  ;;  %v1249_v6 = vld [vmem:[%s1731_s1 + $0x68] sm:$0xff]  ;;  %v225_v7 = vld [vmem:[%s1731_s1] sm:$0xff]  ;;  %v1233_v8 = vld [vmem:[%s1731_s1 + $0x30] sm:$0xff] }
   0xf   : > { %258 = vmatpush.msra.mxu0 %v1220_v2  ;;  %334 = vmatpush.msra.mxu2 %v1228_v4  ;;  %v1239_v9 = vld [vmem:[%s1731_s1 + $0x48] sm:$0xff]  ;;  %v1254_v10 = vld [vmem:[%s1731_s1 + $0x78] sm:$0xff]  ;;  %v1248_v12 = vld [vmem:[%s1731_s1 + $0x60] sm:$0xff]  ;;  %s1446_s24 = scalar_lea.vmem %s1730_s0, %s1303_s17  ;;  %s1304_s17 = smul.u32 24, %s1743_s12 }
  0x10   : > { %v1244_v11 = vld [vmem:[%s1731_s1 + $0x58] sm:$0xff]  ;;  %293 = vmatpush.msra.mxu1 %v225_v7  ;;  %v1238_v13 = vld [vmem:[%s1731_s1 + $0x40] sm:$0xff]  ;;  %378 = vmatpush.msra.mxu3 %v1233_v8  ;;  %v1253_v14 = vld [vmem:[%s1731_s1 + $0x70] sm:$0xff] }
  0x11   : > { %509 = vmatpush.msrb.mxu2 %v1249_v6  ;;  %421 = vmatpush.msrb.mxu0 %v1239_v9  ;;  %v1243_v15 = vld [vmem:[%s1731_s1 + $0x50] sm:$0xff]  ;;  %v227_v16 = vld [vmem:[%s1446_s24 + $0x1] sm:$0xff]  ;;  %v1274_v22 = vld [vmem:[%s1731_s1 + $0xb8] sm:$0xff]  ;;  %s221_s20 = scalar_lea.vmem %s1733_s3, %s1304_s17 }
  0x12   : > { %553 = vmatpush.msrb.mxu3 %v1254_v10  ;;  %465 = vmatpush.msrb.mxu1 %v1244_v11  ;;  %v304_v17 = vld [vmem:[%s1446_s24 + $0x2] sm:$0xff]  ;;  %v1264_v23 = vld [vmem:[%s1731_s1 + $0x98] sm:$0xff]  ;;  %v305_v25 = vld [vmem:[%s1446_s24 + $0xa] sm:$0xff] }
  0x13   : > { %v222_v18 = vld [vmem:[%s1446_s24] sm:$0xff]  ;;  %510 = vmatpush.msrb.mxu2 %v1248_v12  ;;  %422 = vmatpush.msrb.mxu0 %v1238_v13  ;;  %v1269_v20 = vld [vmem:[%s1731_s1 + $0xa8] sm:$0xff]  ;;  %v1273_v28 = vld [vmem:[%s1731_s1 + $0xb0] sm:$0xff] }
  0x14   : > { %1222 = vmatmul.msk.f32.vlgmr.msra.gmra.mxu0 %vm233_vm0, %v227_v16  ;;  %1230 = vmatmul.msk.f32.vlgmr.msra.gmra.mxu2 %vm233_vm0, %v304_v17  ;;  %v348_v19 = vld [vmem:[%s1446_s24 + $0x3] sm:$0xff]  ;;  %v349_v30 = vld [vmem:[%s1446_s24 + $0xb] sm:$0xff]  ;;  %v350_v35 = vld [vmem:[%s1446_s24 + $0x13] sm:$0x3] }
  0x15   : > { %v1259_v21 = vld [vmem:[%s1731_s1 + $0x88] sm:$0xff]  ;;  %1225 = vmatmul.msk.f32.vlgmr.msra.gmra.mxu1 %vm233_vm0, %v222_v18  ;;  %1235 = vmatmul.msk.f32.vlgmr.msra.gmra.mxu3 %vm233_vm0, %v348_v19  ;;  %v1268_v26 = vld [vmem:[%s1731_s1 + $0xa0] sm:$0xff]  ;;  %v1263_v31 = vld [vmem:[%s1731_s1 + $0x90] sm:$0xff] }
  0x16   : > { %554 = vmatpush.msrb.mxu3 %v1253_v14  ;;  %466 = vmatpush.msrb.mxu1 %v1243_v15  ;;  %v228_v24 = vld [vmem:[%s1446_s24 + $0x9] sm:$0xff]  ;;  %v1258_v27 = vld [vmem:[%s1731_s1 + $0x80] sm:$0xff]  ;;  %v229_v32 = vld [vmem:[%s1446_s24 + $0x11] sm:$0x3] }
  0x17   : > { %685 = vmatpush.msra.mxu2 %v1269_v20  ;;  %597 = vmatpush.msra.mxu0 %v1259_v21  ;;  %v223_v29 = vld [vmem:[%s1446_s24 + $0x8] sm:$0xff]  ;;  %v306_v33 = vld [vmem:[%s1446_s24 + $0x12] sm:$0x3]  ;;  %v224_v34 = vld [vmem:[%s1446_s24 + $0x10] sm:$0x3] }
  0x18   : > { %729 = vmatpush.msra.mxu3 %v1274_v22  ;;  %641 = vmatpush.msra.mxu1 %v1264_v23  ;;  %v392_v36 = vld [vmem:[%s1446_s24 + $0x6] sm:$0xff]  ;;  %v1294_v40 = vld [vmem:[%s1731_s1 + $0xf8] sm:$0xff]  ;;  %v1293_v44 = vld [vmem:[%s1731_s1 + $0xf0] sm:$0xff] }
  0x19   : > { %686 = vmatpush.msra.mxu2 %v1268_v26  ;;  %598 = vmatpush.msra.mxu0 %v1258_v27  ;;  %v436_v37 = vld [vmem:[%s1446_s24 + $0x7] sm:$0xff]  ;;  %v1284_v41 = vld [vmem:[%s1731_s1 + $0xd8] sm:$0xff]  ;;  %v481_v46 = vld [vmem:[%s1446_s24 + $0x10] sm:$0xff] }
  0x1a   : > { %730 = vmatpush.msra.mxu3 %v1273_v28  ;;  %642 = vmatpush.msra.mxu1 %v1263_v31  ;;  %v1289_v38 = vld [vmem:[%s1731_s1 + $0xe8] sm:$0xff]  ;;  %v1288_v42 = vld [vmem:[%s1731_s1 + $0xe0] sm:$0xff]  ;;  %v525_v48 = vld [vmem:[%s1446_s24 + $0x11] sm:$0xff] }
  0x1b   : > { %v1279_v39 = vld [vmem:[%s1731_s1 + $0xc8] sm:$0xff]  ;;  %v1278_v43 = vld [vmem:[%s1731_s1 + $0xc0] sm:$0xff]  ;;  %v1283_v49 = vld [vmem:[%s1731_s1 + $0xd0] sm:$0xff] }
  0x1c   : > { %1223 = vmatmul.msk.f32.gmra.mxu0 %vm233_vm0, %v228_v24  ;;  %1231 = vmatmul.msk.f32.gmra.mxu2 %vm233_vm0, %v305_v25  ;;  %v393_v45 = vld [vmem:[%s1446_s24 + $0xe] sm:$0xff]  ;;  %v394_v50 = vld [vmem:[%s1446_s24 + $0x16] sm:$0x3]  ;;  %v482_v51 = vld [vmem:[%s1446_s24 + $0x18] sm:$0x3] }
  0x1d   : > { %1226 = vmatmul.msk.f32.gmra.mxu1 %vm233_vm0, %v223_v29  ;;  %1236 = vmatmul.msk.f32.gmra.mxu3 %vm233_vm0, %v349_v30  ;;  %v437_v47 = vld [vmem:[%s1446_s24 + $0xf] sm:$0xff]  ;;  %v438_v52 = vld [vmem:[%s1446_s24 + $0x17] sm:$0x3]  ;;  %v526_v53 = vld [vmem:[%s1446_s24 + $0x19] sm:$0x3] }
  0x1e   : > { %v568_v54 = vld [vmem:[%s1446_s24 + $0xc] sm:$0xff]  ;;  %v569_v56 = vld [vmem:[%s1446_s24 + $0x14] sm:$0xff]  ;;  %v570_v60 = vld [vmem:[%s1446_s24 + $0x1c] sm:$0x3] }
  0x1f   : > { %v612_v55 = vld [vmem:[%s1446_s24 + $0xd] sm:$0xff]  ;;  %v657_v57 = vld [vmem:[%s1446_s24 + $0x16] sm:$0xff]  ;;  %v658_v61 = vld [vmem:[%s1446_s24 + $0x1e] sm:$0x3] }
  0x20   : > { %v613_v58 = vld [vmem:[%s1446_s24 + $0x15] sm:$0xff]  ;;  %v614_v62 = vld [vmem:[%s1446_s24 + $0x1d] sm:$0x3]  ;;  %v702_v63 = vld [vmem:[%s1446_s24 + $0x1f] sm:$0x3] }
  0x21   : > { %v701_v59 = vld [vmem:[%s1446_s24 + $0x17] sm:$0xff]  ;;  %v746_v6 = vld [vmem:[%s1446_s24 + $0x22] sm:$0x3]  ;;  %v834_v7 = vld [vmem:[%s1446_s24 + $0x24] sm:$0x3] }
  0x22   : > { %v744_v0 = vld [vmem:[%s1446_s24 + $0x12] sm:$0xff]  ;;  %v745_v2 = vld [vmem:[%s1446_s24 + $0x1a] sm:$0xff]  ;;  %v790_v8 = vld [vmem:[%s1446_s24 + $0x23] sm:$0x3] }
  0x23   : > { %v788_v1 = vld [vmem:[%s1446_s24 + $0x13] sm:$0xff]  ;;  %v833_v3 = vld [vmem:[%s1446_s24 + $0x1c] sm:$0xff]  ;;  %v878_v9 = vld [vmem:[%s1446_s24 + $0x25] sm:$0x3] }
  0x24   : > { %1224 = vmatmul.msk.f32.gmra.mxu0 %vm233_vm0, %v229_v32  ;;  %1232 = vmatmul.msk.f32.gmra.mxu2 %vm233_vm0, %v306_v33  ;;  %v789_v4 = vld [vmem:[%s1446_s24 + $0x1b] sm:$0xff] }
  0x25   : > { %1227 = vmatmul.msk.f32.gmra.mxu1 %vm233_vm0, %v224_v34  ;;  %1237 = vmatmul.msk.f32.gmra.mxu3 %vm233_vm0, %v350_v35  ;;  %v877_v5 = vld [vmem:[%s1446_s24 + $0x1d] sm:$0xff] }
  0x2c   : > { %1240 = vmatmul.msk.f32.vlgmr.msrb.gmra.mxu0 %vm233_vm0, %v392_v36  ;;  %1250 = vmatmul.msk.f32.vlgmr.msrb.gmra.mxu2 %vm233_vm0, %v223_v29 }
  0x2d   : > { %1245 = vmatmul.msk.f32.vlgmr.msrb.gmra.mxu1 %vm233_vm0, %v436_v37  ;;  %1255 = vmatmul.msk.f32.vlgmr.msrb.gmra.mxu3 %vm233_vm0, %v228_v24  ;;  %v927_v24 = vlaneseq }
  0x2e   : > { %861 = vmatpush.msrb.mxu2 %v1289_v38  ;;  %773 = vmatpush.msrb.mxu0 %v1279_v39 }
  0x2f   : > { %905 = vmatpush.msrb.mxu3 %v1294_v40  ;;  %817 = vmatpush.msrb.mxu1 %v1284_v41  ;;  %v1612_v27 = vshrl.u32 %v927_v24, 7 }
  0x30   : > { %862 = vmatpush.msrb.mxu2 %v1288_v42  ;;  %774 = vmatpush.msrb.mxu0 %v1278_v43 }
  0x31   : > { %906 = vmatpush.msrb.mxu3 %v1293_v44  ;;  %818 = vmatpush.msrb.mxu1 %v1283_v49  ;;  %v1619_v30 = vadd.s32 8, %v1612_v27  ;;  %v934_v31 = vand.u32 65535, %v1612_v27  ;;  %v935_v37 = vshrl.u32 %v1612_v27, 16  ;;  %v1636_v40 = vadd.s32 16, %v1612_v27 }
  0x33   : > { %v963_v32 = vand.u32 65535, %v1619_v30  ;;  %v964_v34 = vshrl.u32 %v1619_v30, 16  ;;  %v1631_v38 = vmul.u32 43690, %v934_v31  ;;  %v993_v49 = vshrl.u32 %v1636_v40, 16 }
  0x34   : > { %1241 = vmatmul.msk.f32.gmra.mxu0 %vm233_vm0, %v393_v45  ;;  %1251 = vmatmul.msk.f32.gmra.mxu2 %vm233_vm0, %v481_v46  ;;  %v937_v46 = vmul.u32 43691, %v934_v31 }
  0x35   : > { %1246 = vmatmul.msk.f32.gmra.mxu1 %vm233_vm0, %v437_v47  ;;  %1256 = vmatmul.msk.f32.gmra.mxu3 %vm233_vm0, %v525_v48  ;;  %v1626_v35 = vmul.u32 43690, %v963_v32  ;;  %v966_v42 = vmul.u32 43691, %v963_v32  ;;  %v1640_v43 = vmul.u32 43691, %v964_v34  ;;  %v941_v48 = vshll.u32 %v1631_v38, 16 }
  0x37   : > { %v970_v44 = vshll.u32 %v1626_v35, 16  ;;  %vm945_vm2 = vc.u32 %v937_v46, %v941_v48 }
  0x39   : > { %vm974_vm1 = vc.u32 %v966_v42, %v970_v44 }
  0x3c   : > { %1242 = vmatmul.msk.f32.gmra.mxu0 %vm233_vm0, %v394_v50  ;;  %1252 = vmatmul.msk.f32.gmra.mxu2 %vm233_vm0, %v482_v51 }
  0x3d   : > { %1247 = vmatmul.msk.f32.gmra.mxu1 %vm233_vm0, %v438_v52  ;;  %1257 = vmatmul.msk.f32.gmra.mxu3 %vm233_vm0, %v526_v53  ;;  %v972_v53 = vshll.u32 %v1640_v43, 16 }
  0x44   : > { %1260 = vmatmul.msk.f32.vlgmr.msra.gmra.mxu0 %vm233_vm0, %v568_v54  ;;  %1270 = vmatmul.msk.f32.vlgmr.msra.gmra.mxu2 %vm233_vm0, %v393_v45  ;;  %v992_v45 = vand.u32 65535, %v1636_v40  ;;  %v976_v54 = vadd.s32 %v970_v44, %v966_v42  ;;  %v971_v42 = vshrl.u32 %v1626_v35, 16 }
  0x45   : > { %1265 = vmatmul.msk.f32.vlgmr.msra.gmra.mxu1 %vm233_vm0, %v612_v55  ;;  %1275 = vmatmul.msk.f32.vlgmr.msra.gmra.mxu3 %vm233_vm0, %v437_v47  ;;  %v1644_v47 = vmul.u32 43691, %v935_v37 }
  0x46   : > { %v1648_v50 = vmul.u32 43690, %v992_v45  ;;  %vm978_vm3 = vc.u32 %v976_v54, %v972_v53  ;;  %v973_v54 = vshrl.u32 %v1640_v43, 16 }
  0x4c   : > { %1261 = vmatmul.msk.f32.gmra.mxu0 %vm233_vm0, %v569_v56  ;;  %1271 = vmatmul.msk.f32.gmra.mxu2 %vm233_vm0, %v657_v57  ;;  %v947_v57 = vadd.s32 %v941_v48, %v937_v46  ;;  %v942_v48 = vshrl.u32 %v1631_v38, 16  ;;  %v1000_v38 = vshrl.u32 %v1648_v50, 16 }
  0x4d   : > { %1266 = vmatmul.msk.f32.gmra.mxu1 %vm233_vm0, %v613_v58  ;;  %1276 = vmatmul.msk.f32.gmra.mxu3 %vm233_vm0, %v701_v59  ;;  %v969_v59 = vmul.u32 43690, %v964_v34 }
  0x54   : > { %1262 = vmatmul.msk.f32.gmra.mxu0 %vm233_vm0, %v570_v60  ;;  %1272 = vmatmul.msk.f32.gmra.mxu2 %vm233_vm0, %v658_v61  ;;  %v995_v60 = vmul.u32 43691, %v992_v45  ;;  %v1658_v61 = vmul.u32 43691, %v993_v49 }
  0x55   : > { %1267 = vmatmul.msk.f32.gmra.mxu1 %vm233_vm0, %v614_v62  ;;  %1277 = vmatmul.msk.f32.gmra.mxu3 %vm233_vm0, %v702_v63  ;;  %v999_v62 = vshll.u32 %v1648_v50, 16 }
  0x57   : > { %vm1003_vm5 = vc.u32 %v995_v60, %v999_v62 }
  0x5c   : > { %1280 = vmatmul.msk.f32.vlgmr.msrb.gmra.mxu0 %vm233_vm0, %v744_v0  ;;  %1290 = vmatmul.msk.f32.vlgmr.msrb.gmra.mxu2 %vm233_vm0, %v569_v56  ;;  %v943_v56 = vshll.u32 %v1644_v47, 16 }
  0x5d   : > { %1285 = vmatmul.msk.f32.vlgmr.msrb.gmra.mxu1 %vm233_vm0, %v788_v1  ;;  %1295 = vmatmul.msk.f32.vlgmr.msrb.gmra.mxu3 %vm233_vm0, %v613_v58 }
  0x5e   : > { %vm949_vm4 = vc.u32 %v947_v57, %v943_v56 }
  0x64   : > { %1281 = vmatmul.msk.f32.gmra.mxu0 %vm233_vm0, %v745_v2  ;;  %1291 = vmatmul.msk.f32.gmra.mxu2 %vm233_vm0, %v833_v3  ;;  %v1358_v2 = vmov 0  }
  0x65   : > { %1286 = vmatmul.msk.f32.gmra.mxu1 %vm233_vm0, %v789_v4  ;;  %1296 = vmatmul.msk.f32.gmra.mxu3 %vm233_vm0, %v877_v5  ;;  %v975_v3 = vsel %vm974_vm1, 1, %v1358_v2  ;;  %v940_v4 = vmul.u32 43690, %v935_v37  ;;  %v950_v34 = vsel %vm949_vm4, 1, %v1358_v2  ;;  %vm1049_vm4 = vcmask 254976  }
  0x6c   : > { %1282 = vmatmul.msk.f32.gmra.mxu0 %vm233_vm0, %v746_v6  ;;  %1292 = vmatmul.msk.f32.gmra.mxu2 %vm233_vm0, %v834_v7  ;;  %v946_v6 = vsel %vm945_vm2, 1, %v1358_v2  ;;  %v977_v7 = vadd.s32 %v975_v3, %v969_v59 }
  0x6d   : > { %1287 = vmatmul.msk.f32.gmra.mxu1 %vm233_vm0, %v790_v8  ;;  %1297 = vmatmul.msk.f32.gmra.mxu3 %vm233_vm0, %v878_v9  ;;  %v1001_v8 = vshll.u32 %v1658_v61, 16  ;;  %v1005_v9 = vadd.s32 %v999_v62, %v995_v60 }
  0x6f   : > { %vm1007_vm6 = vc.u32 %v1005_v9, %v1001_v8 }
  0x70   : > { %v1008_v53 = vsel %vm1007_vm6, 1, %v1358_v2 }
  0x91   : > { %v260_v10 = vpop.f32.mrf.mxu0 }
  0x92   : > { %v295_v11 = vpop.f32.mrf.mxu1 }
  0x93   : > { %v296_v51 = vadd.f32 %v295_v11, %v260_v10  ;;  %v979_v11 = vsel %vm978_vm3, 1, %v1358_v2  ;;  %vm1045_vm3 = vcmask 261120  }
  0x94   : > { %v981_v44 = vadd.s32 %v979_v11, %v977_v7 }
  0x96   : > { %v982_v35 = vadd.s32 %v981_v44, %v971_v42 }
  0x97   : > { %v336_v12 = vpop.f32.mrf.mxu2 }
  0x98   : > { %v1592_v13 = vpop.f32.mrf.mxu3  ;;  %v345_v63 = vadd.f32 %v336_v12, %v296_v51  ;;  %v948_v12 = vadd.s32 %v946_v6, %v940_v4 }
  0x99   : > { %v263_v14 = vpop.f32.mrf.mxu0 }
  0x9a   : > { %v298_v15 = vpop.f32.mrf.mxu1  ;;  %v389_v10 = vadd.f32 %v1592_v13, %v345_v63  ;;  %v983_v63 = vadd.s32 %v982_v35, %v973_v54 }
  0x9b   : > { %v299_v0 = vadd.f32 %v298_v15, %v263_v14  ;;  %v998_v14 = vmul.u32 43690, %v993_v49  ;;  %v952_v49 = vadd.s32 %v950_v34, %v948_v12 }
  0x9c   : > { %v984_v4 = vshrl.u32 %v983_v63, 2 }
  0x9f   : > { %v339_v16 = vpop.f32.mrf.mxu2 }
  0xa0   : > { %v1594_v17 = vpop.f32.mrf.mxu3  ;;  %v346_v5 = vadd.f32 %v339_v16, %v299_v0  ;;  %v1004_v16 = vsel %vm1003_vm5, 1, %v1358_v2  ;;  %v1002_v2 = vshrl.u32 %v1658_v61, 16 }
  0xa1   : > { %v1596_v18 = vpop.f32.mrf.mxu0 }
  0xa2   : > { %v1598_v19 = vpop.f32.mrf.mxu1  ;;  %v390_v15 = vadd.f32 %v1594_v17, %v346_v5  ;;  %v1006_v17 = vadd.s32 %v1004_v16, %v998_v14 }
  0xa3   : > { %v302_v45 = vadd.f32 %v1598_v19, %v1596_v18  ;;  %v944_v19 = vshrl.u32 %v1644_v47, 16 }
  0xa4   : > { %v1010_v59 = vadd.s32 %v1008_v53, %v1006_v17 }
  0xa6   : > { %v1011_v47 = vadd.s32 %v1010_v59, %v1000_v38  ;;  %v1331_v38 = vld [vmem:[%s1732_s2] ss:$0 sm:$0xff] }
  0xa7   : > { %v1600_v20 = vpop.f32.mrf.mxu2 }
  0xa8   : > { %v1602_v21 = vpop.f32.mrf.mxu3  ;;  %v1012_v7 = vadd.s32 %v1011_v47, %v1002_v2 }
  0xa9   : > { %v1604_v22 = vpop.f32.mrf.mxu0 }
  0xaa   : > { %v1606_v23 = vpop.f32.mrf.mxu1  ;;  %v433_v31 = vadd.f32 %v1604_v22, %v389_v10  ;;  %v347_v22 = vadd.f32 %v1600_v20, %v302_v45  ;;  %v985_v10 = vmul.u32 6, %v984_v4  ;;  %v1013_v14 = vshrl.u32 %v1012_v7, 2 }
  0xac   : > { %v477_v51 = vadd.f32 %v1606_v23, %v433_v31  ;;  %v391_v60 = vadd.f32 %v1602_v21, %v347_v22 }
  0xaf   : > { %v1608_v25 = vpop.f32.mrf.mxu2 }
  0xb0   : > { %v1610_v26 = vpop.f32.mrf.mxu3  ;;  %v521_v56 = vadd.f32 %v1608_v25, %v477_v51 }
  0xb1   : > { %v1614_v28 = vpop.f32.mrf.mxu0 }
  0xb2   : > { %v1616_v29 = vpop.f32.mrf.mxu1  ;;  %v434_v13 = vadd.f32 %v1614_v28, %v390_v15  ;;  %v953_v28 = vadd.s32 %v952_v49, %v942_v48  ;;  %v565_v43 = vadd.f32 %v1610_v26, %v521_v56 }
  0xb4   : > { %v478_v57 = vadd.f32 %v1616_v29, %v434_v13  ;;  %v954_v29 = vadd.s32 %v953_v28, %v944_v19 }
  0xb6   : > { %v955_v6 = vshrl.u32 %v954_v29, 2 }
  0xb7   : > { %v1623_v33 = vpop.f32.mrf.mxu2 }
  0xb8   : > { %v1628_v36 = vpop.f32.mrf.mxu3  ;;  %v522_v20 = vadd.f32 %v1623_v33, %v478_v57 }
  0xb9   : > { %v1633_v39 = vpop.f32.mrf.mxu0 }
  0xba   : > { %v1638_v41 = vpop.f32.mrf.mxu1  ;;  %v435_v25 = vadd.f32 %v1633_v39, %v391_v60  ;;  %v566_v3 = vadd.f32 %v1628_v36, %v522_v20  ;;  %v956_v36 = vmul.u32 6, %v955_v6 }
  0xbc   : > { %v479_v21 = vadd.f32 %v1638_v41, %v435_v25  ;;  %v986_v41 = vsub.s32 %v1619_v30, %v985_v10 }
  0xbe   : > { %vm1019_vm7 = vcmp.ne.s32.totalorder %v986_v41, 0  ;;  %vm1022_vm8 = vcmp.lt.s32.totalorder %v986_v41, 0 }
  0xbf   : > { %v1650_v52 = vpop.f32.mrf.mxu2  ;;  %vm1693_vm11 = vmand %vm1022_vm8, %vm1019_vm7 }
  0xc0   : > { %v1653_v55 = vpop.f32.mrf.mxu3  ;;  %v523_v26 = vadd.f32 %v1650_v52, %v479_v21  ;;  %v957_v52 = vsub.s32 %v1612_v27, %v956_v36 }
  0xc1   : > { %v1656_v58 = vpop.f32.mrf.mxu0 }
  0xc2   : > { %v1661_v1 = vpop.f32.mrf.mxu1  ;;  %v609_v50 = vadd.f32 %v1656_v58, %v565_v43  ;;  %v567_v58 = vadd.f32 %v1653_v55, %v523_v26  ;;  %vm1018_vm9 = vcmp.ne.s32.totalorder %v957_v52, 0  ;;  %vm1021_vm10 = vcmp.lt.s32.totalorder %v957_v52, 0 }
  0xc3   : > { %v1028_v55 = vadd.s32 6, %v986_v41  ;;  %v1027_v27 = vadd.s32 6, %v957_v52  ;;  %vm1697_vm12 = vmand %vm1021_vm10, %vm1018_vm9 }
  0xc4   : > { %v653_v39 = vadd.f32 %v1661_v1, %v609_v50 }
  0xc5   : > { %v1031_v54 = vsel %vm1693_vm11, %v1028_v55, %v986_v41  ;;  %v1030_v57 = vsel %vm1697_vm12, %v1027_v27, %v957_v52 }
  0xc6   : > { %vm1034_vm15 = vcmp.lt.s32.totalorder %v1031_v54, 3  ;;  %vm1033_vm1 = vcmp.lt.s32.totalorder %v1030_v57, 3 }
  0xc7   : > { %v688_v24 = vpop.f32.mrf.mxu2 }
  0xc8   : > { %v732_v32 = vpop.f32.mrf.mxu3  ;;  %v697_v61 = vadd.f32 %v688_v24, %v653_v39 }
  0xc9   : > { %v603_v37 = vpop.f32.mrf.mxu0 }
  0xca   : > { %v647_v46 = vpop.f32.mrf.mxu1  ;;  %v610_v33 = vadd.f32 %v603_v37, %v566_v3  ;;  %v741_v31 = vadd.f32 %v732_v32, %v697_v61  ;;  %v1014_v37 = vmul.u32 6, %v1013_v14 }
  0xcc   : > { %v654_v11 = vadd.f32 %v647_v46, %v610_v33  ;;  %v1015_v30 = vsub.s32 %v1636_v40, %v1014_v37 }
  0xce   : > { %vm1020_vm13 = vcmp.ne.s32.totalorder %v1015_v30, 0  ;;  %vm1023_vm14 = vcmp.lt.s32.totalorder %v1015_v30, 0  ;;  %v1029_v19 = vadd.s32 6, %v1015_v30 }
  0xcf   : > { %v691_v18 = vpop.f32.mrf.mxu2  ;;  %vm1026_vm0 = vmand %vm1023_vm14, %vm1020_vm13 }
  0xd0   : > { %v735_v23 = vpop.f32.mrf.mxu3  ;;  %v698_v15 = vadd.f32 %v691_v18, %v654_v11  ;;  %v1032_v43 = vsel %vm1026_vm0, %v1029_v19, %v1015_v30 }
  0xd1   : > { %v606_v62 = vpop.f32.mrf.mxu0  ;;  %vm1035_vm2 = vcmp.lt.s32.totalorder %v1032_v43, 3 }
  0xd2   : > { %v650_v0 = vpop.f32.mrf.mxu1  ;;  %v611_v34 = vadd.f32 %v606_v62, %v567_v58  ;;  %v742_v1 = vadd.f32 %v735_v23, %v698_v15  ;;  %v1359_v62 = vmov 0.0  }
  0xd3   : > { %v1299_v63 = vsel %vm1034_vm15, 1.0, %v1359_v62  ;;  %v1298_v29 = vsel %vm1033_vm1, 1.0, %v1359_v62  ;;  %v1300_v33 = vsel %vm1035_vm2, 1.0, %v1359_v62 }
  0xd4   : > { %v655_v24 = vadd.f32 %v650_v0, %v611_v34 }
  0xd7   : > { %v694_v5 = vpop.f32.mrf.mxu2 }
  0xd8   : > { %v738_v8 = vpop.f32.mrf.mxu3  ;;  %v699_v32 = vadd.f32 %v694_v5, %v655_v24 }
  0xd9   : > { %v776_v9 = vpop.f32.mrf.mxu0 }
  0xda   : > { %v820_v12 = vpop.f32.mrf.mxu1  ;;  %v785_v42 = vadd.f32 %v776_v9, %v741_v31  ;;  %v743_v40 = vadd.f32 %v738_v8, %v699_v32 }
  0xdc   : > { %v829_v48 = vadd.f32 %v820_v12, %v785_v42 }
  0xdf   : > { %v864_v16 = vpop.f32.mrf.mxu2 }
  0xe0   : > { %v908_v44 = vpop.f32.mrf.mxu3  ;;  %v873_v17 = vadd.f32 %v864_v16, %v829_v48 }
  0xe1   : > { %v779_v45 = vpop.f32.mrf.mxu0 }
  0xe2   : > { %v786_v13 = vadd.f32 %v779_v45, %v742_v1  ;;  %v823_v46 = vpop.f32.mrf.mxu1  ;;  %v917_v28 = vadd.f32 %v908_v44, %v873_v17 }
  0xe4   : > { %v830_v51 = vadd.f32 %v823_v46, %v786_v13  ;;  %v924_v25 = vadd.f32 %v1331_v38, %v917_v28 }
  0xe6   : > { %v1042_v4 = vmul.f32 %v1298_v29, %v924_v25 }
  0xe7   : > { %v867_v53 = vpop.f32.mrf.mxu2 }
  0xe8   : > { %v874_v35 = vadd.f32 %v867_v53, %v830_v51  ;;  %v911_v56 = vpop.f32.mrf.mxu3  ;;  %v1046_v7 = vsel %vm1045_vm3, %v1042_v4, 0.0 }
  0xe9   : > { %v782_v18 = vpop.f32.mrf.mxu0 }
  0xea   : > { %v787_v59 = vadd.f32 %v782_v18, %v743_v40  ;;  %v918_v60 = vadd.f32 %v911_v56, %v874_v35  ;;  %v826_v20 = vpop.f32.mrf.mxu1 }
  0xec   : > { %v925_v23 = vadd.f32 %v1331_v38, %v918_v60  ;;  %v831_v0 = vadd.f32 %v826_v20, %v787_v59 }
  0xee   : > { %v1043_v47 = vmul.f32 %v1299_v63, %v925_v23 }
  0xef   : > { %v870_v2 = vpop.f32.mrf.mxu2 }
  0xf0   : > { %v875_v3 = vadd.f32 %v870_v2, %v831_v0  ;;  %v914_v50 = vpop.f32.mrf.mxu3  ;;  %v1047_v5 = vsel %vm1045_vm3, %v1043_v47, 0.0 }
  0xf1   : > { %v1048_v39 = vadd.f32 %v1047_v5, %v1046_v7 }
  0xf2   : > { %v919_v21 = vadd.f32 %v914_v50, %v875_v3 }
  0xf4   : > { %v926_v6 = vadd.f32 %v1331_v38, %v919_v21 }
  0xf6   : > { %v1044_v26 = vmul.f32 %v1300_v33, %v926_v6 }
  0xf8   : > { %v1050_v8 = vsel %vm1049_vm4, %v1044_v26, 0.0 }
  0xf9   : > { %v1051_v9 = vadd.f32 %v1050_v8, %v1048_v39 }
  0xfb   : > { %v1052_v10 = vrot.slane %v1051_v9, 4 }
  0xfd   : > { %v1053_v61 = vadd.f32 %v1052_v10, %v1051_v9 }
  0xff   : > { %v1054_v11 = vrot.slane %v1053_v61, 2 }
 0x101   : > { %v1055_v12 = vadd.f32 %v1054_v11, %v1053_v61 }
 0x103   : > { %v1056_v36 = vrot.slane %v1055_v12, 1 }
 0x105   : > { %v1057_v14 = vadd.f32 %v1056_v36, %v1055_v12 }
 0x107   : > { %v1058_v58 = vmul.f32 0.11111111, %v1057_v14 }
 0x109   : > { %v1059_v15 = vsub.f32 %v924_v25, %v1058_v58  ;;  %v1060_v41 = vsub.f32 %v925_v23, %v1058_v58  ;;  %v1061_v31 = vsub.f32 %v926_v6, %v1058_v58 }
 0x10b   : > { %v1062_v34 = vmul.f32 %v1298_v29, %v1059_v15  ;;  %v1063_v16 = vmul.f32 %v1299_v63, %v1060_v41  ;;  %v1064_v52 = vmul.f32 %v1300_v33, %v1061_v31 }
 0x10d   : > { %v1065_v37 = vmul.f32 %v1062_v34, %v1062_v34  ;;  %v1066_v1 = vmul.f32 %v1063_v16, %v1063_v16  ;;  %v1067_v42 = vmul.f32 %v1064_v52, %v1064_v52 }
 0x10f   : > { %v1068_v44 = vsel %vm1045_vm3, %v1065_v37, 0.0  ;;  %v1069_v45 = vsel %vm1045_vm3, %v1066_v1, 0.0  ;;  %v1071_v13 = vsel %vm1049_vm4, %v1067_v42, 0.0 }
 0x110   : > { %v1070_v24 = vadd.f32 %v1069_v45, %v1068_v44 }
 0x112   : > { %v1072_v46 = vadd.f32 %v1071_v13, %v1070_v24 }
 0x114   : > { %v1073_v55 = vrot.slane %v1072_v46, 4 }
 0x116   : > { %v1074_v30 = vadd.f32 %v1073_v55, %v1072_v46 }
 0x118   : > { %v1075_v32 = vrot.slane %v1074_v30, 2 }
 0x11a   : > { %v1076_v48 = vadd.f32 %v1075_v32, %v1074_v30 }
 0x11c   : > { %v1077_v49 = vrot.slane %v1076_v48, 1 }
 0x11e   : > { %v1078_v27 = vadd.f32 %v1077_v49, %v1076_v48 }
 0x120   : > { %v1079_v17 = vmul.f32 0.11111111, %v1078_v27 }
 0x122   : > { %v1080_v22 = vadd.f32 1e-05, %v1079_v17 }
 0x124   : > { %1332 = vrsqrt.f32 %v1080_v22  ;;  %vm1087_vm6 = vweird.f32 %v1080_v22 }
 0x12a   : > { %v1333_v51 = vpop.eup %1332 }
 0x12b   : > { %v1082_v53 = vmul.f32 %v1333_v51, %v1080_v22  ;;  %vm1088_vm5 = vweird.f32 %v1333_v51 }
 0x12c   : > { %vm1089_vm7 = vmor %vm1087_vm6, %vm1088_vm5 }
 0x12d   : > { %v1083_v54 = vmul.f32 %v1333_v51, %v1082_v53 }
 0x12f   : > { %v1084_v40 = vmul.f32 0.5, %v1083_v54 }
 0x131   : > { %v1085_v35 = vsub.f32 1.5, %v1084_v40 }
 0x133   : > { %v1086_v56 = vmul.f32 %v1333_v51, %v1085_v35 }
 0x135   : > { %v1090_v57 = vsel %vm1089_vm7, %v1333_v51, %v1086_v56 }
 0x136   : > { %v1091_v18 = vmul.f32 %v1090_v57, %v1062_v34  ;;  %v1092_v19 = vmul.f32 %v1090_v57, %v1063_v16  ;;  %v1093_v28 = vmul.f32 %v1090_v57, %v1064_v52 }
 0x138   : > { %vm1094_vm8 = vcmp.ge.f32.partialorder %v1091_v18, 0.0  ;;  %vm1095_vm9 = vcmp.ge.f32.partialorder %v1092_v19, 0.0  ;;  %vm1096_vm10 = vcmp.ge.f32.partialorder %v1093_v28, 0.0  ;;  %v1097_v38 = vmul.f32 0.2, %v1091_v18 }
 0x139   : > { %v1098_v59 = vmul.f32 0.2, %v1092_v19  ;;  %v1099_v60 = vmul.f32 0.2, %v1093_v28 }
 0x13a   : > { %v1100_v20 = vsel %vm1094_vm8, %v1091_v18, %v1097_v38 }
 0x13b   : > { %v1101_v23 = vsel %vm1095_vm9, %v1092_v19, %v1098_v59  ;;  %v1102_v62 = vsel %vm1096_vm10, %v1093_v28, %v1099_v60  ;;  %1103 = vst.msk [vmem:[%s221_s20] sm:$0xff] %vm1045_vm3, %v1100_v20 }
 0x13c   : > { %1104 = vst.msk [vmem:[%s221_s20 + $0x8] sm:$0xff] %vm1045_vm3, %v1101_v23 }
 0x13d   : > { %1105 = vst.msk [vmem:[%s221_s20 + $0x10] sm:$0x3] %vm1049_vm4, %v1102_v62 }
 0x13e PF: > { %s13_s14 = sadd.s32 1, %s1356_s14   ;;  %s1738_s12 = smov %s1352_s13 }
 0x13f   : > { %p10_p5 = scmp.ge.s32.totalorder %s13_s14, 4   ;;  %s1739_s13 = smov %s1741_s15 }
 0x141   :  { %12 = sbr.rel (!%p10_p5) target bundleno = 2 (0x2), region = 83 }

</bundles_post_ra>
